<compile_context>
chip_gen: v7x
topology: tpu7x:2x2x1
jax: 0.10.0
libtpu: 0.0.40
codegen_flags: <defaults>
</compile_context>

<pallas_src>
import math

import jax
import jax.numpy as jnp
from jax.experimental import pallas as pl
from jax.experimental.pallas import tpu as pltpu

# ----------------------------- model dims -----------------------------------
D_MODEL = 32
N_HEAD = 4
D_HEAD = D_MODEL // N_HEAD
D_FF = 64
NUM_LAYERS = 2
LN_EPS = 1e-5

_HIGHEST = jax.lax.Precision.HIGHEST

# Order in which the stacked/prepared parameters are passed to the kernel.
PARAM_ORDER = (
    "sa_w", "sa_b", "sa_ow", "sa_ob",
    "ca_w", "ca_b", "ca_ow", "ca_ob",
    "w1", "b1", "w2", "b2",
    "n1w", "n1b", "n2w", "n2b", "n3w", "n3b",
    "fn_w", "fn_b",
)


# ----------------------------- kernel helpers --------------------------------
def _layer_norm(x, w, b):
    mu = jnp.mean(x, axis=-1, keepdims=True)
    var = jnp.mean((x - mu) ** 2, axis=-1, keepdims=True)
    return (x - mu) * jax.lax.rsqrt(var + LN_EPS) * w + b


def _mha(q_in, kv_in, w_qkv, b_qkv, w_out, b_out, *, self_attn):
    """Multi-head attention on 2-D (S, E) activations (one batch element).

    w_qkv is the packed in_proj weight in (E, 3E) layout with the 1/sqrt(dh)
    scale already folded into its Q columns (and b_qkv's Q entries).
    """
    e = q_in.shape[-1]
    if self_attn:
        # Single fused QKV matmul against the packed in_proj weight (N = 3E).
        qkv = jnp.dot(q_in, w_qkv, preferred_element_type=jnp.float32) + b_qkv
        q, k, v = qkv[:, :e], qkv[:, e:2 * e], qkv[:, 2 * e:]
    else:
        # Cross attention: Q from the target stream, packed KV from memory.
        q = jnp.dot(q_in, w_qkv[:, :e],
                    preferred_element_type=jnp.float32) + b_qkv[:, :e]
        kv = jnp.dot(kv_in, w_qkv[:, e:],
                     preferred_element_type=jnp.float32) + b_qkv[:, e:]
        k, v = kv[:, :e], kv[:, e:]

    # Head-batched attention: (H, S, dh) stacks -> two 3-D einsums + 1 softmax.
    qh = jnp.stack([q[:, h * D_HEAD:(h + 1) * D_HEAD] for h in range(N_HEAD)], axis=0)
    kh = jnp.stack([k[:, h * D_HEAD:(h + 1) * D_HEAD] for h in range(N_HEAD)], axis=0)
    vh = jnp.stack([v[:, h * D_HEAD:(h + 1) * D_HEAD] for h in range(N_HEAD)], axis=0)

    s = jnp.einsum("hqd,hkd->hqk", qh, kh, preferred_element_type=jnp.float32)
    s = s - jnp.max(s, axis=-1, keepdims=True)
    p = jnp.exp(s)
    p = p / jnp.sum(p, axis=-1, keepdims=True)
    ctx_h = jnp.einsum("hqk,hkd->hqd", p, vh, preferred_element_type=jnp.float32)

    ctx = jnp.concatenate([ctx_h[h] for h in range(N_HEAD)], axis=-1)  # (Sq, E)
    return jnp.dot(ctx, w_out, preferred_element_type=jnp.float32) + b_out


# ----------------------------- fused Pallas kernel ---------------------------
def decoder_stack_kernel(
    tgt_ref, mem_ref,
    sa_w_ref, sa_b_ref, sa_ow_ref, sa_ob_ref,
    ca_w_ref, ca_b_ref, ca_ow_ref, ca_ob_ref,
    w1_ref, b1_ref, w2_ref, b2_ref,
    n1w_ref, n1b_ref, n2w_ref, n2b_ref, n3w_ref, n3b_ref,
    fnw_ref, fnb_ref,
    out_ref,
):
    """Whole decoder stack for one batch element (grid axis = batch)."""
    x = tgt_ref[...]     # (S_T, E)
    mem = mem_ref[...]   # (S_M, E)

    for layer in range(NUM_LAYERS):  # static unroll: residual stays in VMEM
        # --- self attention + residual + norm1 ---
        sa = _mha(x, x, sa_w_ref[layer], sa_b_ref[layer],
                  sa_ow_ref[layer], sa_ob_ref[layer], self_attn=True)
        x = _layer_norm(x + sa, n1w_ref[layer], n1b_ref[layer])

        # --- cross attention + residual + norm2 ---
        ca = _mha(x, mem, ca_w_ref[layer], ca_b_ref[layer],
                  ca_ow_ref[layer], ca_ob_ref[layer], self_attn=False)
        x = _layer_norm(x + ca, n2w_ref[layer], n2b_ref[layer])

        # --- feed-forward + residual + norm3 --- (dropout == identity in eval)
        h = jnp.dot(x, w1_ref[layer],
                    preferred_element_type=jnp.float32) + b1_ref[layer]
        h = jnp.maximum(h, 0.0)
        ff = jnp.dot(h, w2_ref[layer],
                     preferred_element_type=jnp.float32) + b2_ref[layer]
        x = _layer_norm(x + ff, n3w_ref[layer], n3b_ref[layer])

    # Decoder's optional final norm, fused into the same kernel.
    x = _layer_norm(x, fnw_ref[...], fnb_ref[...])
    out_ref[...] = x.astype(out_ref.dtype)


# ----------------------------- wrapper ---------------------------------------
def _full_block_spec(shape):
    nd = len(shape)
    return pl.BlockSpec(shape, lambda b, _nd=nd: (0,) * _nd)


@jax.jit
def decoder_forward(tgt_sbe, mem_sbe, params):
    """Matches Decoder.forward: tgt/memory in PyTorch (S, B, E) layout."""
    # Batch-major inside the kernel; Mosaic cannot lower a (1,0,2) transpose
    # in-kernel, so the single layout change per tensor stays here (it now
    # brackets one fused kernel instead of three separate pallas_calls).
    tgt = jnp.transpose(tgt_sbe, (1, 0, 2))   # (B, S_T, E)
    mem = jnp.transpose(mem_sbe, (1, 0, 2))   # (B, S_M, E)
    batch, s_t, e = tgt.shape
    s_m = mem.shape[1]

    weights = tuple(params[k] for k in PARAM_ORDER)
    in_specs = [
        pl.BlockSpec((None, s_t, e), lambda b: (b, 0, 0)),   # tgt, per-batch block
        pl.BlockSpec((None, s_m, e), lambda b: (b, 0, 0)),   # memory, per-batch block
    ] + [_full_block_spec(w.shape) for w in weights]          # weights fully resident

    out = pl.pallas_call(
        decoder_stack_kernel,
        out_shape=jax.ShapeDtypeStruct((batch, s_t, e), tgt.dtype),
        grid=(batch,),
        in_specs=in_specs,
        out_specs=pl.BlockSpec((None, s_t, e), lambda b: (b, 0, 0)),
        compiler_params=pltpu.CompilerParams(
            dimension_semantics=("parallel",)),   # v7x: one batch element per TC
    )(tgt, mem, *weights)

    return jnp.transpose(out, (1, 0, 2))   # back to (S, B, E)


# ----------------------------- parameters ------------------------------------
def init_layer_params(key):
    """Parameters in PyTorch nn.TransformerDecoderLayer layout."""
    ks = jax.random.split(key, 8)
    e, f = D_MODEL, D_FF
    s = 0.05
    one = jnp.ones((1, e), jnp.float32)
    zero = jnp.zeros((1, e), jnp.float32)
    return {
        # self-attention (in_proj packed as in PyTorch: (3E, E) / (3E,))
        "sa_iw": jax.random.normal(ks[0], (3 * e, e), jnp.float32) * s,
        "sa_ib": jax.random.normal(ks[6], (1, 3 * e), jnp.float32) * s,
        "sa_ow": jax.random.normal(ks[1], (e, e), jnp.float32) * s,
        "sa_ob": zero,
        # cross-attention
        "ca_iw": jax.random.normal(ks[2], (3 * e, e), jnp.float32) * s,
        "ca_ib": jax.random.normal(ks[7], (1, 3 * e), jnp.float32) * s,
        "ca_ow": jax.random.normal(ks[3], (e, e), jnp.float32) * s,
        "ca_ob": zero,
        # feed-forward (nn.Linear weight layout: (out, in))
        "l1_w": jax.random.normal(ks[4], (f, e), jnp.float32) * s,
        "l1_b": jnp.zeros((1, f), jnp.float32),
        "l2_w": jax.random.normal(ks[5], (e, f), jnp.float32) * s,
        "l2_b": zero,
        # layer norms
        "n1_w": one, "n1_b": zero,
        "n2_w": one, "n2_b": zero,
        "n3_w": one, "n3_b": zero,
    }


def prepare_params(layer_params, final_norm):
    """One-time host transform: transpose weights to (in, out), fold the
    1/sqrt(dh) attention scale into the Q projection, stack layers on a
    leading layer axis so the whole stack feeds one pallas_call."""
    e = D_MODEL
    scale = 1.0 / math.sqrt(D_HEAD)

    def prep(p):
        def fold_q(iw, ib):
            w = jnp.transpose(iw)                 # (E, 3E)
            b = ib.reshape(1, 3 * e)
            w = w.at[:, :e].multiply(scale)       # fold scale into Q weight
            b = b.at[:, :e].multiply(scale)       # ... and Q bias
            return w, b

        sa_w, sa_b = fold_q(p["sa_iw"], p["sa_ib"])
        ca_w, ca_b = fold_q(p["ca_iw"], p["ca_ib"])
        return {
            "sa_w": sa_w, "sa_b": sa_b,
            "sa_ow": jnp.transpose(p["sa_ow"]), "sa_ob": p["sa_ob"].reshape(1, e),
            "ca_w": ca_w, "ca_b": ca_b,
            "ca_ow": jnp.transpose(p["ca_ow"]), "ca_ob": p["ca_ob"].reshape(1, e),
            "w1": jnp.transpose(p["l1_w"]), "b1": p["l1_b"].reshape(1, D_FF),
            "w2": jnp.transpose(p["l2_w"]), "b2": p["l2_b"].reshape(1, e),
            "n1w": p["n1_w"].reshape(1, e), "n1b": p["n1_b"].reshape(1, e),
            "n2w": p["n2_w"].reshape(1, e), "n2b": p["n2_b"].reshape(1, e),
            "n3w": p["n3_w"].reshape(1, e), "n3b": p["n3_b"].reshape(1, e),
        }

    per_layer = [prep(p) for p in layer_params]
    stacked = {k: jnp.stack([lp[k] for lp in per_layer], axis=0)
               for k in per_layer[0]}
    stacked["fn_w"] = final_norm["w"].reshape(1, e)
    stacked["fn_b"] = final_norm["b"].reshape(1, e)
    return stacked


# ----------------------------- pure-JAX reference ----------------------------
def _ref_ln(x, w, b):
    mu = jnp.mean(x, axis=-1, keepdims=True)
    var = jnp.mean((x - mu) ** 2, axis=-1, keepdims=True)
    return (x - mu) * jax.lax.rsqrt(var + LN_EPS) * w + b


def _ref_mha(q_in, kv_in, iw, ib, ow, ob):
    e = q_in.shape[-1]
    q = jnp.einsum("bsd,ed->bse", q_in, iw[:e], precision=_HIGHEST) + ib[:, :e]
    k = jnp.einsum("bsd,ed->bse", kv_in, iw[e:2 * e], precision=_HIGHEST) + ib[:, e:2 * e]
    v = jnp.einsum("bsd,ed->bse", kv_in, iw[2 * e:], precision=_HIGHEST) + ib[:, 2 * e:]
    b_, sq, _ = q.shape
    sk = k.shape[1]
    q = q.reshape(b_, sq, N_HEAD, D_HEAD) / math.sqrt(D_HEAD)
    k = k.reshape(b_, sk, N_HEAD, D_HEAD)
    v = v.reshape(b_, sk, N_HEAD, D_HEAD)
    s = jnp.einsum("bqhd,bkhd->bhqk", q, k, precision=_HIGHEST)
    p = jax.nn.softmax(s, axis=-1)
    ctx = jnp.einsum("bhqk,bkhd->bqhd", p, v, precision=_HIGHEST).reshape(b_, sq, e)
    return jnp.einsum("bsd,ed->bse", ctx, ow, precision=_HIGHEST) + ob


def reference_decoder(tgt_sbe, mem_sbe, layer_params, final_norm):
    x = jnp.transpose(tgt_sbe, (1, 0, 2))
    mem = jnp.transpose(mem_sbe, (1, 0, 2))
    for p in layer_params:
        sa = _ref_mha(x, x, p["sa_iw"], p["sa_ib"], p["sa_ow"], p["sa_ob"])
        x = _ref_ln(x + sa, p["n1_w"], p["n1_b"])
        ca = _ref_mha(x, mem, p["ca_iw"], p["ca_ib"], p["ca_ow"], p["ca_ob"])
        x = _ref_ln(x + ca, p["n2_w"], p["n2_b"])
        h = jnp.maximum(
            jnp.einsum("bsd,fd->bsf", x, p["l1_w"], precision=_HIGHEST) + p["l1_b"], 0.0)
        ff = jnp.einsum("bsf,ef->bse", h, p["l2_w"], precision=_HIGHEST) + p["l2_b"]
        x = _ref_ln(x + ff, p["n3_w"], p["n3_b"])
    x = _ref_ln(x, final_norm["w"], final_norm["b"])
    return jnp.transpose(x, (1, 0, 2))


# ----------------------------- main -------------------------------------------
if __name__ == "__main__":
    key = jax.random.PRNGKey(0)
    k_tgt, k_mem, k_p = jax.random.split(key, 3)

    S_TGT, S_MEM, B = 8, 12, 2
    # PyTorch (S, B, E) layout, as nn.MultiheadAttention expects by default.
    tgt = jax.random.normal(k_tgt, (S_TGT, B, D_MODEL), jnp.float32)
    memory = jax.random.normal(k_mem, (S_MEM, B, D_MODEL), jnp.float32)

    layer_keys = jax.random.split(k_p, NUM_LAYERS)
    layer_params = tuple(init_layer_params(k) for k in layer_keys)
    k_fn1, k_fn2 = jax.random.split(jax.random.PRNGKey(1))
    final_norm = {
        "w": 1.0 + 0.1 * jax.random.normal(k_fn1, (1, D_MODEL), jnp.float32),
        "b": 0.1 * jax.random.normal(k_fn2, (1, D_MODEL), jnp.float32),
    }

    fused_params = prepare_params(layer_params, final_norm)

    out = decoder_forward(tgt, memory, fused_params)
    out = jax.block_until_ready(out)

    assert out.shape == (S_TGT, B, D_MODEL)
    assert bool(jnp.all(jnp.isfinite(out)))

    # Numerical fidelity vs. a pure-JAX implementation of the PyTorch math
    # (original parameter layouts, explicit 1/sqrt(dh) scaling).
    ref = reference_decoder(tgt, memory, layer_params, final_norm)
    err = float(jnp.max(jnp.abs(out - ref)))
    assert err < 2e-2, f"max abs error vs reference: {err}"

    print("KERNEL_OK")
</pallas_src>

<mosaic_0001>
module attributes {stable_mosaic.version = 11 : i64} {
  func.func @decoder_stack_kernel(%arg0: i32, %arg1: memref<1x8x32xf32, #tpu.memory_space<vmem>>, %arg2: memref<1x12x32xf32, #tpu.memory_space<vmem>>, %arg3: memref<2x32x96xf32, #tpu.memory_space<vmem>>, %arg4: memref<2x1x96xf32, #tpu.memory_space<vmem>>, %arg5: memref<2x32x32xf32, #tpu.memory_space<vmem>>, %arg6: memref<2x1x32xf32, #tpu.memory_space<vmem>>, %arg7: memref<2x32x96xf32, #tpu.memory_space<vmem>>, %arg8: memref<2x1x96xf32, #tpu.memory_space<vmem>>, %arg9: memref<2x32x32xf32, #tpu.memory_space<vmem>>, %arg10: memref<2x1x32xf32, #tpu.memory_space<vmem>>, %arg11: memref<2x32x64xf32, #tpu.memory_space<vmem>>, %arg12: memref<2x1x64xf32, #tpu.memory_space<vmem>>, %arg13: memref<2x64x32xf32, #tpu.memory_space<vmem>>, %arg14: memref<2x1x32xf32, #tpu.memory_space<vmem>>, %arg15: memref<2x1x32xf32, #tpu.memory_space<vmem>>, %arg16: memref<2x1x32xf32, #tpu.memory_space<vmem>>, %arg17: memref<2x1x32xf32, #tpu.memory_space<vmem>>, %arg18: memref<2x1x32xf32, #tpu.memory_space<vmem>>, %arg19: memref<2x1x32xf32, #tpu.memory_space<vmem>>, %arg20: memref<2x1x32xf32, #tpu.memory_space<vmem>>, %arg21: memref<1x32xf32, #tpu.memory_space<vmem>>, %arg22: memref<1x32xf32, #tpu.memory_space<vmem>>, %arg23: memref<1x8x32xf32, #tpu.memory_space<vmem>>) attributes {dimension_semantics = [#tpu.dimension_semantics<parallel>], iteration_bounds = array<i64: 2>, scalar_prefetch = 0 : i64, scratch_operands = 0 : i64, tpu.core_type = #tpu.core_type<tc>, window_params = [{transform_indices = @transform_0, window_bounds = array<i64: 1, 8, 32>}, {transform_indices = @transform_1, window_bounds = array<i64: 1, 12, 32>}, {pipeline_mode = #tpu.pipeline_mode<synchronous>, transform_indices = @transform_2, window_bounds = array<i64: 2, 32, 96>}, {pipeline_mode = #tpu.pipeline_mode<synchronous>, transform_indices = @transform_3, window_bounds = array<i64: 2, 1, 96>}, {pipeline_mode = #tpu.pipeline_mode<synchronous>, transform_indices = @transform_4, window_bounds = array<i64: 2, 32, 32>}, {pipeline_mode = #tpu.pipeline_mode<synchronous>, transform_indices = @transform_5, window_bounds = array<i64: 2, 1, 32>}, {pipeline_mode = #tpu.pipeline_mode<synchronous>, transform_indices = @transform_6, window_bounds = array<i64: 2, 32, 96>}, {pipeline_mode = #tpu.pipeline_mode<synchronous>, transform_indices = @transform_7, window_bounds = array<i64: 2, 1, 96>}, {pipeline_mode = #tpu.pipeline_mode<synchronous>, transform_indices = @transform_8, window_bounds = array<i64: 2, 32, 32>}, {pipeline_mode = #tpu.pipeline_mode<synchronous>, transform_indices = @transform_9, window_bounds = array<i64: 2, 1, 32>}, {pipeline_mode = #tpu.pipeline_mode<synchronous>, transform_indices = @transform_10, window_bounds = array<i64: 2, 32, 64>}, {pipeline_mode = #tpu.pipeline_mode<synchronous>, transform_indices = @transform_11, window_bounds = array<i64: 2, 1, 64>}, {pipeline_mode = #tpu.pipeline_mode<synchronous>, transform_indices = @transform_12, window_bounds = array<i64: 2, 64, 32>}, {pipeline_mode = #tpu.pipeline_mode<synchronous>, transform_indices = @transform_13, window_bounds = array<i64: 2, 1, 32>}, {pipeline_mode = #tpu.pipeline_mode<synchronous>, transform_indices = @transform_14, window_bounds = array<i64: 2, 1, 32>}, {pipeline_mode = #tpu.pipeline_mode<synchronous>, transform_indices = @transform_15, window_bounds = array<i64: 2, 1, 32>}, {pipeline_mode = #tpu.pipeline_mode<synchronous>, transform_indices = @transform_16, window_bounds = array<i64: 2, 1, 32>}, {pipeline_mode = #tpu.pipeline_mode<synchronous>, transform_indices = @transform_17, window_bounds = array<i64: 2, 1, 32>}, {pipeline_mode = #tpu.pipeline_mode<synchronous>, transform_indices = @transform_18, window_bounds = array<i64: 2, 1, 32>}, {pipeline_mode = #tpu.pipeline_mode<synchronous>, transform_indices = @transform_19, window_bounds = array<i64: 2, 1, 32>}, {pipeline_mode = #tpu.pipeline_mode<synchronous>, transform_indices = @transform_20, window_bounds = array<i64: 1, 32>}, {pipeline_mode = #tpu.pipeline_mode<synchronous>, transform_indices = @transform_21, window_bounds = array<i64: 1, 32>}, {transform_indices = @transform_22, window_bounds = array<i64: 1, 8, 32>}]} {
    %c0 = arith.constant 0 : index
    %c0_0 = arith.constant 0 : index
    %c0_1 = arith.constant 0 : index
    %0 = vector.load %arg1[%c0, %c0_0, %c0_1] : memref<1x8x32xf32, #tpu.memory_space<vmem>>, vector<1x8x32xf32>
    %1 = vector.shape_cast %0 : vector<1x8x32xf32> to vector<8x32xf32>
    %c0_2 = arith.constant 0 : index
    %c0_3 = arith.constant 0 : index
    %c0_4 = arith.constant 0 : index
    %2 = vector.load %arg2[%c0_2, %c0_3, %c0_4] : memref<1x12x32xf32, #tpu.memory_space<vmem>>, vector<1x12x32xf32>
    %3 = vector.shape_cast %2 : vector<1x12x32xf32> to vector<12x32xf32>
    %c0_5 = arith.constant 0 : index
    %c0_6 = arith.constant 0 : index
    %c0_7 = arith.constant 0 : index
    %4 = vector.load %arg3[%c0_5, %c0_6, %c0_7] : memref<2x32x96xf32, #tpu.memory_space<vmem>>, vector<1x32x96xf32>
    %5 = vector.shape_cast %4 : vector<1x32x96xf32> to vector<32x96xf32>
    %c0_8 = arith.constant 0 : index
    %c0_9 = arith.constant 0 : index
    %c0_10 = arith.constant 0 : index
    %6 = vector.load %arg4[%c0_8, %c0_9, %c0_10] : memref<2x1x96xf32, #tpu.memory_space<vmem>>, vector<1x1x96xf32>
    %7 = vector.shape_cast %6 : vector<1x1x96xf32> to vector<1x96xf32>
    %c0_11 = arith.constant 0 : index
    %c0_12 = arith.constant 0 : index
    %c0_13 = arith.constant 0 : index
    %8 = vector.load %arg5[%c0_11, %c0_12, %c0_13] : memref<2x32x32xf32, #tpu.memory_space<vmem>>, vector<1x32x32xf32>
    %9 = vector.shape_cast %8 : vector<1x32x32xf32> to vector<32x32xf32>
    %c0_14 = arith.constant 0 : index
    %c0_15 = arith.constant 0 : index
    %c0_16 = arith.constant 0 : index
    %10 = vector.load %arg6[%c0_14, %c0_15, %c0_16] : memref<2x1x32xf32, #tpu.memory_space<vmem>>, vector<1x1x32xf32>
    %11 = vector.shape_cast %10 : vector<1x1x32xf32> to vector<1x32xf32>
    %cst = arith.constant dense<0.000000e+00> : vector<8x96xf32>
    %12 = tpu.matmul %1, %5, %cst {dimension_numbers = #tpu.dot_dimension_numbers<[1], [0], [0], [1], [0, 0, 1, 1], [], []>} : vector<8x32xf32>, vector<32x96xf32>, vector<8x96xf32> -> vector<8x96xf32>
    %13 = vector.broadcast %7 : vector<1x96xf32> to vector<8x96xf32>
    %14 = arith.addf %12, %13 : vector<8x96xf32>
    %15 = vector.extract_strided_slice %14 {offsets = [0, 0], sizes = [8, 32], strides = [1, 1]} : vector<8x96xf32> to vector<8x32xf32>
    %16 = vector.extract_strided_slice %14 {offsets = [0, 32], sizes = [8, 32], strides = [1, 1]} : vector<8x96xf32> to vector<8x32xf32>
    %17 = vector.extract_strided_slice %14 {offsets = [0, 64], sizes = [8, 32], strides = [1, 1]} : vector<8x96xf32> to vector<8x32xf32>
    %18 = vector.extract_strided_slice %15 {offsets = [0, 0], sizes = [8, 8], strides = [1, 1]} : vector<8x32xf32> to vector<8x8xf32>
    %19 = vector.extract_strided_slice %15 {offsets = [0, 8], sizes = [8, 8], strides = [1, 1]} : vector<8x32xf32> to vector<8x8xf32>
    %20 = vector.extract_strided_slice %15 {offsets = [0, 16], sizes = [8, 8], strides = [1, 1]} : vector<8x32xf32> to vector<8x8xf32>
    %21 = vector.extract_strided_slice %15 {offsets = [0, 24], sizes = [8, 8], strides = [1, 1]} : vector<8x32xf32> to vector<8x8xf32>
    %22 = vector.shape_cast %18 : vector<8x8xf32> to vector<1x8x8xf32>
    %23 = vector.shape_cast %19 : vector<8x8xf32> to vector<1x8x8xf32>
    %24 = vector.shape_cast %20 : vector<8x8xf32> to vector<1x8x8xf32>
    %25 = vector.shape_cast %21 : vector<8x8xf32> to vector<1x8x8xf32>
    %26 = tpu.concatenate %22, %23, %24, %25 in 0 : vector<1x8x8xf32>, vector<1x8x8xf32>, vector<1x8x8xf32>, vector<1x8x8xf32> -> vector<4x8x8xf32>
    %27 = vector.extract_strided_slice %16 {offsets = [0, 0], sizes = [8, 8], strides = [1, 1]} : vector<8x32xf32> to vector<8x8xf32>
    %28 = vector.extract_strided_slice %16 {offsets = [0, 8], sizes = [8, 8], strides = [1, 1]} : vector<8x32xf32> to vector<8x8xf32>
    %29 = vector.extract_strided_slice %16 {offsets = [0, 16], sizes = [8, 8], strides = [1, 1]} : vector<8x32xf32> to vector<8x8xf32>
    %30 = vector.extract_strided_slice %16 {offsets = [0, 24], sizes = [8, 8], strides = [1, 1]} : vector<8x32xf32> to vector<8x8xf32>
    %31 = vector.shape_cast %27 : vector<8x8xf32> to vector<1x8x8xf32>
    %32 = vector.shape_cast %28 : vector<8x8xf32> to vector<1x8x8xf32>
    %33 = vector.shape_cast %29 : vector<8x8xf32> to vector<1x8x8xf32>
    %34 = vector.shape_cast %30 : vector<8x8xf32> to vector<1x8x8xf32>
    %35 = tpu.concatenate %31, %32, %33, %34 in 0 : vector<1x8x8xf32>, vector<1x8x8xf32>, vector<1x8x8xf32>, vector<1x8x8xf32> -> vector<4x8x8xf32>
    %36 = vector.extract_strided_slice %17 {offsets = [0, 0], sizes = [8, 8], strides = [1, 1]} : vector<8x32xf32> to vector<8x8xf32>
    %37 = vector.extract_strided_slice %17 {offsets = [0, 8], sizes = [8, 8], strides = [1, 1]} : vector<8x32xf32> to vector<8x8xf32>
    %38 = vector.extract_strided_slice %17 {offsets = [0, 16], sizes = [8, 8], strides = [1, 1]} : vector<8x32xf32> to vector<8x8xf32>
    %39 = vector.extract_strided_slice %17 {offsets = [0, 24], sizes = [8, 8], strides = [1, 1]} : vector<8x32xf32> to vector<8x8xf32>
    %40 = vector.shape_cast %36 : vector<8x8xf32> to vector<1x8x8xf32>
    %41 = vector.shape_cast %37 : vector<8x8xf32> to vector<1x8x8xf32>
    %42 = vector.shape_cast %38 : vector<8x8xf32> to vector<1x8x8xf32>
    %43 = vector.shape_cast %39 : vector<8x8xf32> to vector<1x8x8xf32>
    %44 = tpu.concatenate %40, %41, %42, %43 in 0 : vector<1x8x8xf32>, vector<1x8x8xf32>, vector<1x8x8xf32>, vector<1x8x8xf32> -> vector<4x8x8xf32>
    "tpu.trace_start"() <{level = 10 : i32, message = "hqd,hkd->hqk"}> : () -> ()
    %cst_17 = arith.constant dense<0.000000e+00> : vector<4x8x8xf32>
    %45 = tpu.matmul %26, %35, %cst_17 {dimension_numbers = #tpu.dot_dimension_numbers<[2], [2], [1], [1], [0, 0, 0, 1, 1, 1], [0], [0]>} : vector<4x8x8xf32>, vector<4x8x8xf32>, vector<4x8x8xf32> -> vector<4x8x8xf32>
    "tpu.trace_stop"() : () -> ()
    %cst_18 = arith.constant dense<0xFF800000> : vector<4x8xf32>
    %46 = vector.multi_reduction <maximumf>, %45, %cst_18 [2] : vector<4x8x8xf32> to vector<4x8xf32>
    %47 = vector.shape_cast %46 : vector<4x8xf32> to vector<4x8x1xf32>
    %48 = vector.broadcast %47 : vector<4x8x1xf32> to vector<4x8x8xf32>
    %49 = arith.subf %45, %48 : vector<4x8x8xf32>
    %50 = math.exp %49 : vector<4x8x8xf32>
    %cst_19 = arith.constant dense<0.000000e+00> : vector<4x8xf32>
    %51 = vector.multi_reduction <add>, %50, %cst_19 [2] : vector<4x8x8xf32> to vector<4x8xf32>
    %52 = vector.shape_cast %51 : vector<4x8xf32> to vector<4x8x1xf32>
    %53 = vector.broadcast %52 : vector<4x8x1xf32> to vector<4x8x8xf32>
    %54 = arith.divf %50, %53 : vector<4x8x8xf32>
    "tpu.trace_start"() <{level = 10 : i32, message = "hqk,hkd->hqd"}> : () -> ()
    %cst_20 = arith.constant dense<0.000000e+00> : vector<4x8x8xf32>
    %55 = tpu.matmul %54, %44, %cst_20 {dimension_numbers = #tpu.dot_dimension_numbers<[2], [1], [1], [2], [0, 0, 0, 1, 1, 2], [0], [0]>} : vector<4x8x8xf32>, vector<4x8x8xf32>, vector<4x8x8xf32> -> vector<4x8x8xf32>
    "tpu.trace_stop"() : () -> ()
    %56 = vector.extract_strided_slice %55 {offsets = [0, 0, 0], sizes = [1, 8, 8], strides = [1, 1, 1]} : vector<4x8x8xf32> to vector<1x8x8xf32>
    %57 = vector.shape_cast %56 : vector<1x8x8xf32> to vector<8x8xf32>
    %58 = vector.extract_strided_slice %55 {offsets = [1, 0, 0], sizes = [1, 8, 8], strides = [1, 1, 1]} : vector<4x8x8xf32> to vector<1x8x8xf32>
    %59 = vector.shape_cast %58 : vector<1x8x8xf32> to vector<8x8xf32>
    %60 = vector.extract_strided_slice %55 {offsets = [2, 0, 0], sizes = [1, 8, 8], strides = [1, 1, 1]} : vector<4x8x8xf32> to vector<1x8x8xf32>
    %61 = vector.shape_cast %60 : vector<1x8x8xf32> to vector<8x8xf32>
    %62 = vector.extract_strided_slice %55 {offsets = [3, 0, 0], sizes = [1, 8, 8], strides = [1, 1, 1]} : vector<4x8x8xf32> to vector<1x8x8xf32>
    %63 = vector.shape_cast %62 : vector<1x8x8xf32> to vector<8x8xf32>
    %64 = tpu.concatenate %57, %59, %61, %63 in 1 : vector<8x8xf32>, vector<8x8xf32>, vector<8x8xf32>, vector<8x8xf32> -> vector<8x32xf32>
    %cst_21 = arith.constant dense<0.000000e+00> : vector<8x32xf32>
    %65 = tpu.matmul %64, %9, %cst_21 {dimension_numbers = #tpu.dot_dimension_numbers<[1], [0], [0], [1], [0, 0, 1, 1], [], []>} : vector<8x32xf32>, vector<32x32xf32>, vector<8x32xf32> -> vector<8x32xf32>
    %66 = vector.broadcast %11 : vector<1x32xf32> to vector<8x32xf32>
    %67 = arith.addf %65, %66 : vector<8x32xf32>
    %68 = arith.addf %1, %67 : vector<8x32xf32>
    %c0_22 = arith.constant 0 : index
    %c0_23 = arith.constant 0 : index
    %c0_24 = arith.constant 0 : index
    %69 = vector.load %arg15[%c0_22, %c0_23, %c0_24] : memref<2x1x32xf32, #tpu.memory_space<vmem>>, vector<1x1x32xf32>
    %70 = vector.shape_cast %69 : vector<1x1x32xf32> to vector<1x32xf32>
    %c0_25 = arith.constant 0 : index
    %c0_26 = arith.constant 0 : index
    %c0_27 = arith.constant 0 : index
    %71 = vector.load %arg16[%c0_25, %c0_26, %c0_27] : memref<2x1x32xf32, #tpu.memory_space<vmem>>, vector<1x1x32xf32>
    %72 = vector.shape_cast %71 : vector<1x1x32xf32> to vector<1x32xf32>
    %cst_28 = arith.constant dense<0.000000e+00> : vector<8xf32>
    %73 = vector.multi_reduction <add>, %68, %cst_28 [1] : vector<8x32xf32> to vector<8xf32>
    %74 = vector.shape_cast %73 : vector<8xf32> to vector<8x1xf32>
    %cst_29 = arith.constant 3.200000e+01 : f32
    %75 = vector.broadcast %cst_29 : f32 to vector<8x1xf32>
    %76 = arith.divf %74, %75 : vector<8x1xf32>
    %77 = vector.broadcast %76 : vector<8x1xf32> to vector<8x32xf32>
    %78 = arith.subf %68, %77 : vector<8x32xf32>
    %79 = arith.mulf %78, %78 : vector<8x32xf32>
    %cst_30 = arith.constant dense<0.000000e+00> : vector<8xf32>
    %80 = vector.multi_reduction <add>, %79, %cst_30 [1] : vector<8x32xf32> to vector<8xf32>
    %81 = vector.shape_cast %80 : vector<8xf32> to vector<8x1xf32>
    %cst_31 = arith.constant 3.200000e+01 : f32
    %82 = vector.broadcast %cst_31 : f32 to vector<8x1xf32>
    %83 = arith.divf %81, %82 : vector<8x1xf32>
    %84 = vector.broadcast %76 : vector<8x1xf32> to vector<8x32xf32>
    %85 = arith.subf %68, %84 : vector<8x32xf32>
    %cst_32 = arith.constant 9.99999974E-6 : f32
    %86 = vector.broadcast %cst_32 : f32 to vector<8x1xf32>
    %87 = arith.addf %83, %86 : vector<8x1xf32>
    %88 = math.rsqrt %87 : vector<8x1xf32>
    %89 = vector.broadcast %88 : vector<8x1xf32> to vector<8x32xf32>
    %90 = arith.mulf %85, %89 : vector<8x32xf32>
    %91 = vector.broadcast %70 : vector<1x32xf32> to vector<8x32xf32>
    %92 = arith.mulf %90, %91 : vector<8x32xf32>
    %93 = vector.broadcast %72 : vector<1x32xf32> to vector<8x32xf32>
    %94 = arith.addf %92, %93 : vector<8x32xf32>
    %c0_33 = arith.constant 0 : index
    %c0_34 = arith.constant 0 : index
    %c0_35 = arith.constant 0 : index
    %95 = vector.load %arg7[%c0_33, %c0_34, %c0_35] : memref<2x32x96xf32, #tpu.memory_space<vmem>>, vector<1x32x96xf32>
    %96 = vector.shape_cast %95 : vector<1x32x96xf32> to vector<32x96xf32>
    %c0_36 = arith.constant 0 : index
    %c0_37 = arith.constant 0 : index
    %c0_38 = arith.constant 0 : index
    %97 = vector.load %arg8[%c0_36, %c0_37, %c0_38] : memref<2x1x96xf32, #tpu.memory_space<vmem>>, vector<1x1x96xf32>
    %98 = vector.shape_cast %97 : vector<1x1x96xf32> to vector<1x96xf32>
    %c0_39 = arith.constant 0 : index
    %c0_40 = arith.constant 0 : index
    %c0_41 = arith.constant 0 : index
    %99 = vector.load %arg9[%c0_39, %c0_40, %c0_41] : memref<2x32x32xf32, #tpu.memory_space<vmem>>, vector<1x32x32xf32>
    %100 = vector.shape_cast %99 : vector<1x32x32xf32> to vector<32x32xf32>
    %c0_42 = arith.constant 0 : index
    %c0_43 = arith.constant 0 : index
    %c0_44 = arith.constant 0 : index
    %101 = vector.load %arg10[%c0_42, %c0_43, %c0_44] : memref<2x1x32xf32, #tpu.memory_space<vmem>>, vector<1x1x32xf32>
    %102 = vector.shape_cast %101 : vector<1x1x32xf32> to vector<1x32xf32>
    %103 = vector.extract_strided_slice %96 {offsets = [0, 0], sizes = [32, 32], strides = [1, 1]} : vector<32x96xf32> to vector<32x32xf32>
    %cst_45 = arith.constant dense<0.000000e+00> : vector<8x32xf32>
    %104 = tpu.matmul %94, %103, %cst_45 {dimension_numbers = #tpu.dot_dimension_numbers<[1], [0], [0], [1], [0, 0, 1, 1], [], []>} : vector<8x32xf32>, vector<32x32xf32>, vector<8x32xf32> -> vector<8x32xf32>
    %105 = vector.extract_strided_slice %98 {offsets = [0, 0], sizes = [1, 32], strides = [1, 1]} : vector<1x96xf32> to vector<1x32xf32>
    %106 = vector.broadcast %105 : vector<1x32xf32> to vector<8x32xf32>
    %107 = arith.addf %104, %106 : vector<8x32xf32>
    %108 = vector.extract_strided_slice %96 {offsets = [0, 32], sizes = [32, 64], strides = [1, 1]} : vector<32x96xf32> to vector<32x64xf32>
    %cst_46 = arith.constant dense<0.000000e+00> : vector<12x64xf32>
    %109 = tpu.matmul %3, %108, %cst_46 {dimension_numbers = #tpu.dot_dimension_numbers<[1], [0], [0], [1], [0, 0, 1, 1], [], []>} : vector<12x32xf32>, vector<32x64xf32>, vector<12x64xf32> -> vector<12x64xf32>
    %110 = vector.extract_strided_slice %98 {offsets = [0, 32], sizes = [1, 64], strides = [1, 1]} : vector<1x96xf32> to vector<1x64xf32>
    %111 = vector.broadcast %110 : vector<1x64xf32> to vector<12x64xf32>
    %112 = arith.addf %109, %111 : vector<12x64xf32>
    %113 = vector.extract_strided_slice %112 {offsets = [0, 0], sizes = [12, 32], strides = [1, 1]} : vector<12x64xf32> to vector<12x32xf32>
    %114 = vector.extract_strided_slice %112 {offsets = [0, 32], sizes = [12, 32], strides = [1, 1]} : vector<12x64xf32> to vector<12x32xf32>
    %115 = vector.extract_strided_slice %107 {offsets = [0, 0], sizes = [8, 8], strides = [1, 1]} : vector<8x32xf32> to vector<8x8xf32>
    %116 = vector.extract_strided_slice %107 {offsets = [0, 8], sizes = [8, 8], strides = [1, 1]} : vector<8x32xf32> to vector<8x8xf32>
    %117 = vector.extract_strided_slice %107 {offsets = [0, 16], sizes = [8, 8], strides = [1, 1]} : vector<8x32xf32> to vector<8x8xf32>
    %118 = vector.extract_strided_slice %107 {offsets = [0, 24], sizes = [8, 8], strides = [1, 1]} : vector<8x32xf32> to vector<8x8xf32>
    %119 = vector.shape_cast %115 : vector<8x8xf32> to vector<1x8x8xf32>
    %120 = vector.shape_cast %116 : vector<8x8xf32> to vector<1x8x8xf32>
    %121 = vector.shape_cast %117 : vector<8x8xf32> to vector<1x8x8xf32>
    %122 = vector.shape_cast %118 : vector<8x8xf32> to vector<1x8x8xf32>
    %123 = tpu.concatenate %119, %120, %121, %122 in 0 : vector<1x8x8xf32>, vector<1x8x8xf32>, vector<1x8x8xf32>, vector<1x8x8xf32> -> vector<4x8x8xf32>
    %124 = vector.extract_strided_slice %113 {offsets = [0, 0], sizes = [12, 8], strides = [1, 1]} : vector<12x32xf32> to vector<12x8xf32>
    %125 = vector.extract_strided_slice %113 {offsets = [0, 8], sizes = [12, 8], strides = [1, 1]} : vector<12x32xf32> to vector<12x8xf32>
    %126 = vector.extract_strided_slice %113 {offsets = [0, 16], sizes = [12, 8], strides = [1, 1]} : vector<12x32xf32> to vector<12x8xf32>
    %127 = vector.extract_strided_slice %113 {offsets = [0, 24], sizes = [12, 8], strides = [1, 1]} : vector<12x32xf32> to vector<12x8xf32>
    %128 = vector.shape_cast %124 : vector<12x8xf32> to vector<1x12x8xf32>
    %129 = vector.shape_cast %125 : vector<12x8xf32> to vector<1x12x8xf32>
    %130 = vector.shape_cast %126 : vector<12x8xf32> to vector<1x12x8xf32>
    %131 = vector.shape_cast %127 : vector<12x8xf32> to vector<1x12x8xf32>
    %132 = tpu.concatenate %128, %129, %130, %131 in 0 : vector<1x12x8xf32>, vector<1x12x8xf32>, vector<1x12x8xf32>, vector<1x12x8xf32> -> vector<4x12x8xf32>
    %133 = vector.extract_strided_slice %114 {offsets = [0, 0], sizes = [12, 8], strides = [1, 1]} : vector<12x32xf32> to vector<12x8xf32>
    %134 = vector.extract_strided_slice %114 {offsets = [0, 8], sizes = [12, 8], strides = [1, 1]} : vector<12x32xf32> to vector<12x8xf32>
    %135 = vector.extract_strided_slice %114 {offsets = [0, 16], sizes = [12, 8], strides = [1, 1]} : vector<12x32xf32> to vector<12x8xf32>
    %136 = vector.extract_strided_slice %114 {offsets = [0, 24], sizes = [12, 8], strides = [1, 1]} : vector<12x32xf32> to vector<12x8xf32>
    %137 = vector.shape_cast %133 : vector<12x8xf32> to vector<1x12x8xf32>
    %138 = vector.shape_cast %134 : vector<12x8xf32> to vector<1x12x8xf32>
    %139 = vector.shape_cast %135 : vector<12x8xf32> to vector<1x12x8xf32>
    %140 = vector.shape_cast %136 : vector<12x8xf32> to vector<1x12x8xf32>
    %141 = tpu.concatenate %137, %138, %139, %140 in 0 : vector<1x12x8xf32>, vector<1x12x8xf32>, vector<1x12x8xf32>, vector<1x12x8xf32> -> vector<4x12x8xf32>
    "tpu.trace_start"() <{level = 10 : i32, message = "hqd,hkd->hqk"}> : () -> ()
    %cst_47 = arith.constant dense<0.000000e+00> : vector<4x8x12xf32>
    %142 = tpu.matmul %123, %132, %cst_47 {dimension_numbers = #tpu.dot_dimension_numbers<[2], [2], [1], [1], [0, 0, 0, 1, 1, 1], [0], [0]>} : vector<4x8x8xf32>, vector<4x12x8xf32>, vector<4x8x12xf32> -> vector<4x8x12xf32>
    "tpu.trace_stop"() : () -> ()
    %cst_48 = arith.constant dense<0xFF800000> : vector<4x8xf32>
    %143 = vector.multi_reduction <maximumf>, %142, %cst_48 [2] : vector<4x8x12xf32> to vector<4x8xf32>
    %144 = vector.shape_cast %143 : vector<4x8xf32> to vector<4x8x1xf32>
    %145 = vector.broadcast %144 : vector<4x8x1xf32> to vector<4x8x12xf32>
    %146 = arith.subf %142, %145 : vector<4x8x12xf32>
    %147 = math.exp %146 : vector<4x8x12xf32>
    %cst_49 = arith.constant dense<0.000000e+00> : vector<4x8xf32>
    %148 = vector.multi_reduction <add>, %147, %cst_49 [2] : vector<4x8x12xf32> to vector<4x8xf32>
    %149 = vector.shape_cast %148 : vector<4x8xf32> to vector<4x8x1xf32>
    %150 = vector.broadcast %149 : vector<4x8x1xf32> to vector<4x8x12xf32>
    %151 = arith.divf %147, %150 : vector<4x8x12xf32>
    "tpu.trace_start"() <{level = 10 : i32, message = "hqk,hkd->hqd"}> : () -> ()
    %cst_50 = arith.constant dense<0.000000e+00> : vector<4x8x8xf32>
    %152 = tpu.matmul %151, %141, %cst_50 {dimension_numbers = #tpu.dot_dimension_numbers<[2], [1], [1], [2], [0, 0, 0, 1, 1, 2], [0], [0]>} : vector<4x8x12xf32>, vector<4x12x8xf32>, vector<4x8x8xf32> -> vector<4x8x8xf32>
    "tpu.trace_stop"() : () -> ()
    %153 = vector.extract_strided_slice %152 {offsets = [0, 0, 0], sizes = [1, 8, 8], strides = [1, 1, 1]} : vector<4x8x8xf32> to vector<1x8x8xf32>
    %154 = vector.shape_cast %153 : vector<1x8x8xf32> to vector<8x8xf32>
    %155 = vector.extract_strided_slice %152 {offsets = [1, 0, 0], sizes = [1, 8, 8], strides = [1, 1, 1]} : vector<4x8x8xf32> to vector<1x8x8xf32>
    %156 = vector.shape_cast %155 : vector<1x8x8xf32> to vector<8x8xf32>
    %157 = vector.extract_strided_slice %152 {offsets = [2, 0, 0], sizes = [1, 8, 8], strides = [1, 1, 1]} : vector<4x8x8xf32> to vector<1x8x8xf32>
    %158 = vector.shape_cast %157 : vector<1x8x8xf32> to vector<8x8xf32>
    %159 = vector.extract_strided_slice %152 {offsets = [3, 0, 0], sizes = [1, 8, 8], strides = [1, 1, 1]} : vector<4x8x8xf32> to vector<1x8x8xf32>
    %160 = vector.shape_cast %159 : vector<1x8x8xf32> to vector<8x8xf32>
    %161 = tpu.concatenate %154, %156, %158, %160 in 1 : vector<8x8xf32>, vector<8x8xf32>, vector<8x8xf32>, vector<8x8xf32> -> vector<8x32xf32>
    %cst_51 = arith.constant dense<0.000000e+00> : vector<8x32xf32>
    %162 = tpu.matmul %161, %100, %cst_51 {dimension_numbers = #tpu.dot_dimension_numbers<[1], [0], [0], [1], [0, 0, 1, 1], [], []>} : vector<8x32xf32>, vector<32x32xf32>, vector<8x32xf32> -> vector<8x32xf32>
    %163 = vector.broadcast %102 : vector<1x32xf32> to vector<8x32xf32>
    %164 = arith.addf %162, %163 : vector<8x32xf32>
    %165 = arith.addf %94, %164 : vector<8x32xf32>
    %c0_52 = arith.constant 0 : index
    %c0_53 = arith.constant 0 : index
    %c0_54 = arith.constant 0 : index
    %166 = vector.load %arg17[%c0_52, %c0_53, %c0_54] : memref<2x1x32xf32, #tpu.memory_space<vmem>>, vector<1x1x32xf32>
    %167 = vector.shape_cast %166 : vector<1x1x32xf32> to vector<1x32xf32>
    %c0_55 = arith.constant 0 : index
    %c0_56 = arith.constant 0 : index
    %c0_57 = arith.constant 0 : index
    %168 = vector.load %arg18[%c0_55, %c0_56, %c0_57] : memref<2x1x32xf32, #tpu.memory_space<vmem>>, vector<1x1x32xf32>
    %169 = vector.shape_cast %168 : vector<1x1x32xf32> to vector<1x32xf32>
    %cst_58 = arith.constant dense<0.000000e+00> : vector<8xf32>
    %170 = vector.multi_reduction <add>, %165, %cst_58 [1] : vector<8x32xf32> to vector<8xf32>
    %171 = vector.shape_cast %170 : vector<8xf32> to vector<8x1xf32>
    %cst_59 = arith.constant 3.200000e+01 : f32
    %172 = vector.broadcast %cst_59 : f32 to vector<8x1xf32>
    %173 = arith.divf %171, %172 : vector<8x1xf32>
    %174 = vector.broadcast %173 : vector<8x1xf32> to vector<8x32xf32>
    %175 = arith.subf %165, %174 : vector<8x32xf32>
    %176 = arith.mulf %175, %175 : vector<8x32xf32>
    %cst_60 = arith.constant dense<0.000000e+00> : vector<8xf32>
    %177 = vector.multi_reduction <add>, %176, %cst_60 [1] : vector<8x32xf32> to vector<8xf32>
    %178 = vector.shape_cast %177 : vector<8xf32> to vector<8x1xf32>
    %cst_61 = arith.constant 3.200000e+01 : f32
    %179 = vector.broadcast %cst_61 : f32 to vector<8x1xf32>
    %180 = arith.divf %178, %179 : vector<8x1xf32>
    %181 = vector.broadcast %173 : vector<8x1xf32> to vector<8x32xf32>
    %182 = arith.subf %165, %181 : vector<8x32xf32>
    %cst_62 = arith.constant 9.99999974E-6 : f32
    %183 = vector.broadcast %cst_62 : f32 to vector<8x1xf32>
    %184 = arith.addf %180, %183 : vector<8x1xf32>
    %185 = math.rsqrt %184 : vector<8x1xf32>
    %186 = vector.broadcast %185 : vector<8x1xf32> to vector<8x32xf32>
    %187 = arith.mulf %182, %186 : vector<8x32xf32>
    %188 = vector.broadcast %167 : vector<1x32xf32> to vector<8x32xf32>
    %189 = arith.mulf %187, %188 : vector<8x32xf32>
    %190 = vector.broadcast %169 : vector<1x32xf32> to vector<8x32xf32>
    %191 = arith.addf %189, %190 : vector<8x32xf32>
    %c0_63 = arith.constant 0 : index
    %c0_64 = arith.constant 0 : index
    %c0_65 = arith.constant 0 : index
    %192 = vector.load %arg11[%c0_63, %c0_64, %c0_65] : memref<2x32x64xf32, #tpu.memory_space<vmem>>, vector<1x32x64xf32>
    %193 = vector.shape_cast %192 : vector<1x32x64xf32> to vector<32x64xf32>
    %cst_66 = arith.constant dense<0.000000e+00> : vector<8x64xf32>
    %194 = tpu.matmul %191, %193, %cst_66 {dimension_numbers = #tpu.dot_dimension_numbers<[1], [0], [0], [1], [0, 0, 1, 1], [], []>} : vector<8x32xf32>, vector<32x64xf32>, vector<8x64xf32> -> vector<8x64xf32>
    %c0_67 = arith.constant 0 : index
    %c0_68 = arith.constant 0 : index
    %c0_69 = arith.constant 0 : index
    %195 = vector.load %arg12[%c0_67, %c0_68, %c0_69] : memref<2x1x64xf32, #tpu.memory_space<vmem>>, vector<1x1x64xf32>
    %196 = vector.shape_cast %195 : vector<1x1x64xf32> to vector<1x64xf32>
    %197 = vector.broadcast %196 : vector<1x64xf32> to vector<8x64xf32>
    %198 = arith.addf %194, %197 : vector<8x64xf32>
    %cst_70 = arith.constant 0.000000e+00 : f32
    %199 = vector.broadcast %cst_70 : f32 to vector<8x64xf32>
    %200 = arith.maximumf %198, %199 : vector<8x64xf32>
    %c0_71 = arith.constant 0 : index
    %c0_72 = arith.constant 0 : index
    %c0_73 = arith.constant 0 : index
    %201 = vector.load %arg13[%c0_71, %c0_72, %c0_73] : memref<2x64x32xf32, #tpu.memory_space<vmem>>, vector<1x64x32xf32>
    %202 = vector.shape_cast %201 : vector<1x64x32xf32> to vector<64x32xf32>
    %cst_74 = arith.constant dense<0.000000e+00> : vector<8x32xf32>
    %203 = tpu.matmul %200, %202, %cst_74 {dimension_numbers = #tpu.dot_dimension_numbers<[1], [0], [0], [1], [0, 0, 1, 1], [], []>} : vector<8x64xf32>, vector<64x32xf32>, vector<8x32xf32> -> vector<8x32xf32>
    %c0_75 = arith.constant 0 : index
    %c0_76 = arith.constant 0 : index
    %c0_77 = arith.constant 0 : index
    %204 = vector.load %arg14[%c0_75, %c0_76, %c0_77] : memref<2x1x32xf32, #tpu.memory_space<vmem>>, vector<1x1x32xf32>
    %205 = vector.shape_cast %204 : vector<1x1x32xf32> to vector<1x32xf32>
    %206 = vector.broadcast %205 : vector<1x32xf32> to vector<8x32xf32>
    %207 = arith.addf %203, %206 : vector<8x32xf32>
    %208 = arith.addf %191, %207 : vector<8x32xf32>
    %c0_78 = arith.constant 0 : index
    %c0_79 = arith.constant 0 : index
    %c0_80 = arith.constant 0 : index
    %209 = vector.load %arg19[%c0_78, %c0_79, %c0_80] : memref<2x1x32xf32, #tpu.memory_space<vmem>>, vector<1x1x32xf32>
    %210 = vector.shape_cast %209 : vector<1x1x32xf32> to vector<1x32xf32>
    %c0_81 = arith.constant 0 : index
    %c0_82 = arith.constant 0 : index
    %c0_83 = arith.constant 0 : index
    %211 = vector.load %arg20[%c0_81, %c0_82, %c0_83] : memref<2x1x32xf32, #tpu.memory_space<vmem>>, vector<1x1x32xf32>
    %212 = vector.shape_cast %211 : vector<1x1x32xf32> to vector<1x32xf32>
    %cst_84 = arith.constant dense<0.000000e+00> : vector<8xf32>
    %213 = vector.multi_reduction <add>, %208, %cst_84 [1] : vector<8x32xf32> to vector<8xf32>
    %214 = vector.shape_cast %213 : vector<8xf32> to vector<8x1xf32>
    %cst_85 = arith.constant 3.200000e+01 : f32
    %215 = vector.broadcast %cst_85 : f32 to vector<8x1xf32>
    %216 = arith.divf %214, %215 : vector<8x1xf32>
    %217 = vector.broadcast %216 : vector<8x1xf32> to vector<8x32xf32>
    %218 = arith.subf %208, %217 : vector<8x32xf32>
    %219 = arith.mulf %218, %218 : vector<8x32xf32>
    %cst_86 = arith.constant dense<0.000000e+00> : vector<8xf32>
    %220 = vector.multi_reduction <add>, %219, %cst_86 [1] : vector<8x32xf32> to vector<8xf32>
    %221 = vector.shape_cast %220 : vector<8xf32> to vector<8x1xf32>
    %cst_87 = arith.constant 3.200000e+01 : f32
    %222 = vector.broadcast %cst_87 : f32 to vector<8x1xf32>
    %223 = arith.divf %221, %222 : vector<8x1xf32>
    %224 = vector.broadcast %216 : vector<8x1xf32> to vector<8x32xf32>
    %225 = arith.subf %208, %224 : vector<8x32xf32>
    %cst_88 = arith.constant 9.99999974E-6 : f32
    %226 = vector.broadcast %cst_88 : f32 to vector<8x1xf32>
    %227 = arith.addf %223, %226 : vector<8x1xf32>
    %228 = math.rsqrt %227 : vector<8x1xf32>
    %229 = vector.broadcast %228 : vector<8x1xf32> to vector<8x32xf32>
    %230 = arith.mulf %225, %229 : vector<8x32xf32>
    %231 = vector.broadcast %210 : vector<1x32xf32> to vector<8x32xf32>
    %232 = arith.mulf %230, %231 : vector<8x32xf32>
    %233 = vector.broadcast %212 : vector<1x32xf32> to vector<8x32xf32>
    %234 = arith.addf %232, %233 : vector<8x32xf32>
    %c1 = arith.constant 1 : index
    %c0_89 = arith.constant 0 : index
    %c0_90 = arith.constant 0 : index
    %235 = vector.load %arg3[%c1, %c0_89, %c0_90] : memref<2x32x96xf32, #tpu.memory_space<vmem>>, vector<1x32x96xf32>
    %236 = vector.shape_cast %235 : vector<1x32x96xf32> to vector<32x96xf32>
    %c1_91 = arith.constant 1 : index
    %c0_92 = arith.constant 0 : index
    %c0_93 = arith.constant 0 : index
    %237 = vector.load %arg4[%c1_91, %c0_92, %c0_93] : memref<2x1x96xf32, #tpu.memory_space<vmem>>, vector<1x1x96xf32>
    %238 = vector.shape_cast %237 : vector<1x1x96xf32> to vector<1x96xf32>
    %c1_94 = arith.constant 1 : index
    %c0_95 = arith.constant 0 : index
    %c0_96 = arith.constant 0 : index
    %239 = vector.load %arg5[%c1_94, %c0_95, %c0_96] : memref<2x32x32xf32, #tpu.memory_space<vmem>>, vector<1x32x32xf32>
    %240 = vector.shape_cast %239 : vector<1x32x32xf32> to vector<32x32xf32>
    %c1_97 = arith.constant 1 : index
    %c0_98 = arith.constant 0 : index
    %c0_99 = arith.constant 0 : index
    %241 = vector.load %arg6[%c1_97, %c0_98, %c0_99] : memref<2x1x32xf32, #tpu.memory_space<vmem>>, vector<1x1x32xf32>
    %242 = vector.shape_cast %241 : vector<1x1x32xf32> to vector<1x32xf32>
    %cst_100 = arith.constant dense<0.000000e+00> : vector<8x96xf32>
    %243 = tpu.matmul %234, %236, %cst_100 {dimension_numbers = #tpu.dot_dimension_numbers<[1], [0], [0], [1], [0, 0, 1, 1], [], []>} : vector<8x32xf32>, vector<32x96xf32>, vector<8x96xf32> -> vector<8x96xf32>
    %244 = vector.broadcast %238 : vector<1x96xf32> to vector<8x96xf32>
    %245 = arith.addf %243, %244 : vector<8x96xf32>
    %246 = vector.extract_strided_slice %245 {offsets = [0, 0], sizes = [8, 32], strides = [1, 1]} : vector<8x96xf32> to vector<8x32xf32>
    %247 = vector.extract_strided_slice %245 {offsets = [0, 32], sizes = [8, 32], strides = [1, 1]} : vector<8x96xf32> to vector<8x32xf32>
    %248 = vector.extract_strided_slice %245 {offsets = [0, 64], sizes = [8, 32], strides = [1, 1]} : vector<8x96xf32> to vector<8x32xf32>
    %249 = vector.extract_strided_slice %246 {offsets = [0, 0], sizes = [8, 8], strides = [1, 1]} : vector<8x32xf32> to vector<8x8xf32>
    %250 = vector.extract_strided_slice %246 {offsets = [0, 8], sizes = [8, 8], strides = [1, 1]} : vector<8x32xf32> to vector<8x8xf32>
    %251 = vector.extract_strided_slice %246 {offsets = [0, 16], sizes = [8, 8], strides = [1, 1]} : vector<8x32xf32> to vector<8x8xf32>
    %252 = vector.extract_strided_slice %246 {offsets = [0, 24], sizes = [8, 8], strides = [1, 1]} : vector<8x32xf32> to vector<8x8xf32>
    %253 = vector.shape_cast %249 : vector<8x8xf32> to vector<1x8x8xf32>
    %254 = vector.shape_cast %250 : vector<8x8xf32> to vector<1x8x8xf32>
    %255 = vector.shape_cast %251 : vector<8x8xf32> to vector<1x8x8xf32>
    %256 = vector.shape_cast %252 : vector<8x8xf32> to vector<1x8x8xf32>
    %257 = tpu.concatenate %253, %254, %255, %256 in 0 : vector<1x8x8xf32>, vector<1x8x8xf32>, vector<1x8x8xf32>, vector<1x8x8xf32> -> vector<4x8x8xf32>
    %258 = vector.extract_strided_slice %247 {offsets = [0, 0], sizes = [8, 8], strides = [1, 1]} : vector<8x32xf32> to vector<8x8xf32>
    %259 = vector.extract_strided_slice %247 {offsets = [0, 8], sizes = [8, 8], strides = [1, 1]} : vector<8x32xf32> to vector<8x8xf32>
    %260 = vector.extract_strided_slice %247 {offsets = [0, 16], sizes = [8, 8], strides = [1, 1]} : vector<8x32xf32> to vector<8x8xf32>
    %261 = vector.extract_strided_slice %247 {offsets = [0, 24], sizes = [8, 8], strides = [1, 1]} : vector<8x32xf32> to vector<8x8xf32>
    %262 = vector.shape_cast %258 : vector<8x8xf32> to vector<1x8x8xf32>
    %263 = vector.shape_cast %259 : vector<8x8xf32> to vector<1x8x8xf32>
    %264 = vector.shape_cast %260 : vector<8x8xf32> to vector<1x8x8xf32>
    %265 = vector.shape_cast %261 : vector<8x8xf32> to vector<1x8x8xf32>
    %266 = tpu.concatenate %262, %263, %264, %265 in 0 : vector<1x8x8xf32>, vector<1x8x8xf32>, vector<1x8x8xf32>, vector<1x8x8xf32> -> vector<4x8x8xf32>
    %267 = vector.extract_strided_slice %248 {offsets = [0, 0], sizes = [8, 8], strides = [1, 1]} : vector<8x32xf32> to vector<8x8xf32>
    %268 = vector.extract_strided_slice %248 {offsets = [0, 8], sizes = [8, 8], strides = [1, 1]} : vector<8x32xf32> to vector<8x8xf32>
    %269 = vector.extract_strided_slice %248 {offsets = [0, 16], sizes = [8, 8], strides = [1, 1]} : vector<8x32xf32> to vector<8x8xf32>
    %270 = vector.extract_strided_slice %248 {offsets = [0, 24], sizes = [8, 8], strides = [1, 1]} : vector<8x32xf32> to vector<8x8xf32>
    %271 = vector.shape_cast %267 : vector<8x8xf32> to vector<1x8x8xf32>
    %272 = vector.shape_cast %268 : vector<8x8xf32> to vector<1x8x8xf32>
    %273 = vector.shape_cast %269 : vector<8x8xf32> to vector<1x8x8xf32>
    %274 = vector.shape_cast %270 : vector<8x8xf32> to vector<1x8x8xf32>
    %275 = tpu.concatenate %271, %272, %273, %274 in 0 : vector<1x8x8xf32>, vector<1x8x8xf32>, vector<1x8x8xf32>, vector<1x8x8xf32> -> vector<4x8x8xf32>
    "tpu.trace_start"() <{level = 10 : i32, message = "hqd,hkd->hqk"}> : () -> ()
    %cst_101 = arith.constant dense<0.000000e+00> : vector<4x8x8xf32>
    %276 = tpu.matmul %257, %266, %cst_101 {dimension_numbers = #tpu.dot_dimension_numbers<[2], [2], [1], [1], [0, 0, 0, 1, 1, 1], [0], [0]>} : vector<4x8x8xf32>, vector<4x8x8xf32>, vector<4x8x8xf32> -> vector<4x8x8xf32>
    "tpu.trace_stop"() : () -> ()
    %cst_102 = arith.constant dense<0xFF800000> : vector<4x8xf32>
    %277 = vector.multi_reduction <maximumf>, %276, %cst_102 [2] : vector<4x8x8xf32> to vector<4x8xf32>
    %278 = vector.shape_cast %277 : vector<4x8xf32> to vector<4x8x1xf32>
    %279 = vector.broadcast %278 : vector<4x8x1xf32> to vector<4x8x8xf32>
    %280 = arith.subf %276, %279 : vector<4x8x8xf32>
    %281 = math.exp %280 : vector<4x8x8xf32>
    %cst_103 = arith.constant dense<0.000000e+00> : vector<4x8xf32>
    %282 = vector.multi_reduction <add>, %281, %cst_103 [2] : vector<4x8x8xf32> to vector<4x8xf32>
    %283 = vector.shape_cast %282 : vector<4x8xf32> to vector<4x8x1xf32>
    %284 = vector.broadcast %283 : vector<4x8x1xf32> to vector<4x8x8xf32>
    %285 = arith.divf %281, %284 : vector<4x8x8xf32>
    "tpu.trace_start"() <{level = 10 : i32, message = "hqk,hkd->hqd"}> : () -> ()
    %cst_104 = arith.constant dense<0.000000e+00> : vector<4x8x8xf32>
    %286 = tpu.matmul %285, %275, %cst_104 {dimension_numbers = #tpu.dot_dimension_numbers<[2], [1], [1], [2], [0, 0, 0, 1, 1, 2], [0], [0]>} : vector<4x8x8xf32>, vector<4x8x8xf32>, vector<4x8x8xf32> -> vector<4x8x8xf32>
    "tpu.trace_stop"() : () -> ()
    %287 = vector.extract_strided_slice %286 {offsets = [0, 0, 0], sizes = [1, 8, 8], strides = [1, 1, 1]} : vector<4x8x8xf32> to vector<1x8x8xf32>
    %288 = vector.shape_cast %287 : vector<1x8x8xf32> to vector<8x8xf32>
    %289 = vector.extract_strided_slice %286 {offsets = [1, 0, 0], sizes = [1, 8, 8], strides = [1, 1, 1]} : vector<4x8x8xf32> to vector<1x8x8xf32>
    %290 = vector.shape_cast %289 : vector<1x8x8xf32> to vector<8x8xf32>
    %291 = vector.extract_strided_slice %286 {offsets = [2, 0, 0], sizes = [1, 8, 8], strides = [1, 1, 1]} : vector<4x8x8xf32> to vector<1x8x8xf32>
    %292 = vector.shape_cast %291 : vector<1x8x8xf32> to vector<8x8xf32>
    %293 = vector.extract_strided_slice %286 {offsets = [3, 0, 0], sizes = [1, 8, 8], strides = [1, 1, 1]} : vector<4x8x8xf32> to vector<1x8x8xf32>
    %294 = vector.shape_cast %293 : vector<1x8x8xf32> to vector<8x8xf32>
    %295 = tpu.concatenate %288, %290, %292, %294 in 1 : vector<8x8xf32>, vector<8x8xf32>, vector<8x8xf32>, vector<8x8xf32> -> vector<8x32xf32>
    %cst_105 = arith.constant dense<0.000000e+00> : vector<8x32xf32>
    %296 = tpu.matmul %295, %240, %cst_105 {dimension_numbers = #tpu.dot_dimension_numbers<[1], [0], [0], [1], [0, 0, 1, 1], [], []>} : vector<8x32xf32>, vector<32x32xf32>, vector<8x32xf32> -> vector<8x32xf32>
    %297 = vector.broadcast %242 : vector<1x32xf32> to vector<8x32xf32>
    %298 = arith.addf %296, %297 : vector<8x32xf32>
    %299 = arith.addf %234, %298 : vector<8x32xf32>
    %c1_106 = arith.constant 1 : index
    %c0_107 = arith.constant 0 : index
    %c0_108 = arith.constant 0 : index
    %300 = vector.load %arg15[%c1_106, %c0_107, %c0_108] : memref<2x1x32xf32, #tpu.memory_space<vmem>>, vector<1x1x32xf32>
    %301 = vector.shape_cast %300 : vector<1x1x32xf32> to vector<1x32xf32>
    %c1_109 = arith.constant 1 : index
    %c0_110 = arith.constant 0 : index
    %c0_111 = arith.constant 0 : index
    %302 = vector.load %arg16[%c1_109, %c0_110, %c0_111] : memref<2x1x32xf32, #tpu.memory_space<vmem>>, vector<1x1x32xf32>
    %303 = vector.shape_cast %302 : vector<1x1x32xf32> to vector<1x32xf32>
    %cst_112 = arith.constant dense<0.000000e+00> : vector<8xf32>
    %304 = vector.multi_reduction <add>, %299, %cst_112 [1] : vector<8x32xf32> to vector<8xf32>
    %305 = vector.shape_cast %304 : vector<8xf32> to vector<8x1xf32>
    %cst_113 = arith.constant 3.200000e+01 : f32
    %306 = vector.broadcast %cst_113 : f32 to vector<8x1xf32>
    %307 = arith.divf %305, %306 : vector<8x1xf32>
    %308 = vector.broadcast %307 : vector<8x1xf32> to vector<8x32xf32>
    %309 = arith.subf %299, %308 : vector<8x32xf32>
    %310 = arith.mulf %309, %309 : vector<8x32xf32>
    %cst_114 = arith.constant dense<0.000000e+00> : vector<8xf32>
    %311 = vector.multi_reduction <add>, %310, %cst_114 [1] : vector<8x32xf32> to vector<8xf32>
    %312 = vector.shape_cast %311 : vector<8xf32> to vector<8x1xf32>
    %cst_115 = arith.constant 3.200000e+01 : f32
    %313 = vector.broadcast %cst_115 : f32 to vector<8x1xf32>
    %314 = arith.divf %312, %313 : vector<8x1xf32>
    %315 = vector.broadcast %307 : vector<8x1xf32> to vector<8x32xf32>
    %316 = arith.subf %299, %315 : vector<8x32xf32>
    %cst_116 = arith.constant 9.99999974E-6 : f32
    %317 = vector.broadcast %cst_116 : f32 to vector<8x1xf32>
    %318 = arith.addf %314, %317 : vector<8x1xf32>
    %319 = math.rsqrt %318 : vector<8x1xf32>
    %320 = vector.broadcast %319 : vector<8x1xf32> to vector<8x32xf32>
    %321 = arith.mulf %316, %320 : vector<8x32xf32>
    %322 = vector.broadcast %301 : vector<1x32xf32> to vector<8x32xf32>
    %323 = arith.mulf %321, %322 : vector<8x32xf32>
    %324 = vector.broadcast %303 : vector<1x32xf32> to vector<8x32xf32>
    %325 = arith.addf %323, %324 : vector<8x32xf32>
    %c1_117 = arith.constant 1 : index
    %c0_118 = arith.constant 0 : index
    %c0_119 = arith.constant 0 : index
    %326 = vector.load %arg7[%c1_117, %c0_118, %c0_119] : memref<2x32x96xf32, #tpu.memory_space<vmem>>, vector<1x32x96xf32>
    %327 = vector.shape_cast %326 : vector<1x32x96xf32> to vector<32x96xf32>
    %c1_120 = arith.constant 1 : index
    %c0_121 = arith.constant 0 : index
    %c0_122 = arith.constant 0 : index
    %328 = vector.load %arg8[%c1_120, %c0_121, %c0_122] : memref<2x1x96xf32, #tpu.memory_space<vmem>>, vector<1x1x96xf32>
    %329 = vector.shape_cast %328 : vector<1x1x96xf32> to vector<1x96xf32>
    %c1_123 = arith.constant 1 : index
    %c0_124 = arith.constant 0 : index
    %c0_125 = arith.constant 0 : index
    %330 = vector.load %arg9[%c1_123, %c0_124, %c0_125] : memref<2x32x32xf32, #tpu.memory_space<vmem>>, vector<1x32x32xf32>
    %331 = vector.shape_cast %330 : vector<1x32x32xf32> to vector<32x32xf32>
    %c1_126 = arith.constant 1 : index
    %c0_127 = arith.constant 0 : index
    %c0_128 = arith.constant 0 : index
    %332 = vector.load %arg10[%c1_126, %c0_127, %c0_128] : memref<2x1x32xf32, #tpu.memory_space<vmem>>, vector<1x1x32xf32>
    %333 = vector.shape_cast %332 : vector<1x1x32xf32> to vector<1x32xf32>
    %334 = vector.extract_strided_slice %327 {offsets = [0, 0], sizes = [32, 32], strides = [1, 1]} : vector<32x96xf32> to vector<32x32xf32>
    %cst_129 = arith.constant dense<0.000000e+00> : vector<8x32xf32>
    %335 = tpu.matmul %325, %334, %cst_129 {dimension_numbers = #tpu.dot_dimension_numbers<[1], [0], [0], [1], [0, 0, 1, 1], [], []>} : vector<8x32xf32>, vector<32x32xf32>, vector<8x32xf32> -> vector<8x32xf32>
    %336 = vector.extract_strided_slice %329 {offsets = [0, 0], sizes = [1, 32], strides = [1, 1]} : vector<1x96xf32> to vector<1x32xf32>
    %337 = vector.broadcast %336 : vector<1x32xf32> to vector<8x32xf32>
    %338 = arith.addf %335, %337 : vector<8x32xf32>
    %339 = vector.extract_strided_slice %327 {offsets = [0, 32], sizes = [32, 64], strides = [1, 1]} : vector<32x96xf32> to vector<32x64xf32>
    %cst_130 = arith.constant dense<0.000000e+00> : vector<12x64xf32>
    %340 = tpu.matmul %3, %339, %cst_130 {dimension_numbers = #tpu.dot_dimension_numbers<[1], [0], [0], [1], [0, 0, 1, 1], [], []>} : vector<12x32xf32>, vector<32x64xf32>, vector<12x64xf32> -> vector<12x64xf32>
    %341 = vector.extract_strided_slice %329 {offsets = [0, 32], sizes = [1, 64], strides = [1, 1]} : vector<1x96xf32> to vector<1x64xf32>
    %342 = vector.broadcast %341 : vector<1x64xf32> to vector<12x64xf32>
    %343 = arith.addf %340, %342 : vector<12x64xf32>
    %344 = vector.extract_strided_slice %343 {offsets = [0, 0], sizes = [12, 32], strides = [1, 1]} : vector<12x64xf32> to vector<12x32xf32>
    %345 = vector.extract_strided_slice %343 {offsets = [0, 32], sizes = [12, 32], strides = [1, 1]} : vector<12x64xf32> to vector<12x32xf32>
    %346 = vector.extract_strided_slice %338 {offsets = [0, 0], sizes = [8, 8], strides = [1, 1]} : vector<8x32xf32> to vector<8x8xf32>
    %347 = vector.extract_strided_slice %338 {offsets = [0, 8], sizes = [8, 8], strides = [1, 1]} : vector<8x32xf32> to vector<8x8xf32>
    %348 = vector.extract_strided_slice %338 {offsets = [0, 16], sizes = [8, 8], strides = [1, 1]} : vector<8x32xf32> to vector<8x8xf32>
    %349 = vector.extract_strided_slice %338 {offsets = [0, 24], sizes = [8, 8], strides = [1, 1]} : vector<8x32xf32> to vector<8x8xf32>
    %350 = vector.shape_cast %346 : vector<8x8xf32> to vector<1x8x8xf32>
    %351 = vector.shape_cast %347 : vector<8x8xf32> to vector<1x8x8xf32>
    %352 = vector.shape_cast %348 : vector<8x8xf32> to vector<1x8x8xf32>
    %353 = vector.shape_cast %349 : vector<8x8xf32> to vector<1x8x8xf32>
    %354 = tpu.concatenate %350, %351, %352, %353 in 0 : vector<1x8x8xf32>, vector<1x8x8xf32>, vector<1x8x8xf32>, vector<1x8x8xf32> -> vector<4x8x8xf32>
    %355 = vector.extract_strided_slice %344 {offsets = [0, 0], sizes = [12, 8], strides = [1, 1]} : vector<12x32xf32> to vector<12x8xf32>
    %356 = vector.extract_strided_slice %344 {offsets = [0, 8], sizes = [12, 8], strides = [1, 1]} : vector<12x32xf32> to vector<12x8xf32>
    %357 = vector.extract_strided_slice %344 {offsets = [0, 16], sizes = [12, 8], strides = [1, 1]} : vector<12x32xf32> to vector<12x8xf32>
    %358 = vector.extract_strided_slice %344 {offsets = [0, 24], sizes = [12, 8], strides = [1, 1]} : vector<12x32xf32> to vector<12x8xf32>
    %359 = vector.shape_cast %355 : vector<12x8xf32> to vector<1x12x8xf32>
    %360 = vector.shape_cast %356 : vector<12x8xf32> to vector<1x12x8xf32>
    %361 = vector.shape_cast %357 : vector<12x8xf32> to vector<1x12x8xf32>
    %362 = vector.shape_cast %358 : vector<12x8xf32> to vector<1x12x8xf32>
    %363 = tpu.concatenate %359, %360, %361, %362 in 0 : vector<1x12x8xf32>, vector<1x12x8xf32>, vector<1x12x8xf32>, vector<1x12x8xf32> -> vector<4x12x8xf32>
    %364 = vector.extract_strided_slice %345 {offsets = [0, 0], sizes = [12, 8], strides = [1, 1]} : vector<12x32xf32> to vector<12x8xf32>
    %365 = vector.extract_strided_slice %345 {offsets = [0, 8], sizes = [12, 8], strides = [1, 1]} : vector<12x32xf32> to vector<12x8xf32>
    %366 = vector.extract_strided_slice %345 {offsets = [0, 16], sizes = [12, 8], strides = [1, 1]} : vector<12x32xf32> to vector<12x8xf32>
    %367 = vector.extract_strided_slice %345 {offsets = [0, 24], sizes = [12, 8], strides = [1, 1]} : vector<12x32xf32> to vector<12x8xf32>
    %368 = vector.shape_cast %364 : vector<12x8xf32> to vector<1x12x8xf32>
    %369 = vector.shape_cast %365 : vector<12x8xf32> to vector<1x12x8xf32>
    %370 = vector.shape_cast %366 : vector<12x8xf32> to vector<1x12x8xf32>
    %371 = vector.shape_cast %367 : vector<12x8xf32> to vector<1x12x8xf32>
    %372 = tpu.concatenate %368, %369, %370, %371 in 0 : vector<1x12x8xf32>, vector<1x12x8xf32>, vector<1x12x8xf32>, vector<1x12x8xf32> -> vector<4x12x8xf32>
    "tpu.trace_start"() <{level = 10 : i32, message = "hqd,hkd->hqk"}> : () -> ()
    %cst_131 = arith.constant dense<0.000000e+00> : vector<4x8x12xf32>
    %373 = tpu.matmul %354, %363, %cst_131 {dimension_numbers = #tpu.dot_dimension_numbers<[2], [2], [1], [1], [0, 0, 0, 1, 1, 1], [0], [0]>} : vector<4x8x8xf32>, vector<4x12x8xf32>, vector<4x8x12xf32> -> vector<4x8x12xf32>
    "tpu.trace_stop"() : () -> ()
    %cst_132 = arith.constant dense<0xFF800000> : vector<4x8xf32>
    %374 = vector.multi_reduction <maximumf>, %373, %cst_132 [2] : vector<4x8x12xf32> to vector<4x8xf32>
    %375 = vector.shape_cast %374 : vector<4x8xf32> to vector<4x8x1xf32>
    %376 = vector.broadcast %375 : vector<4x8x1xf32> to vector<4x8x12xf32>
    %377 = arith.subf %373, %376 : vector<4x8x12xf32>
    %378 = math.exp %377 : vector<4x8x12xf32>
    %cst_133 = arith.constant dense<0.000000e+00> : vector<4x8xf32>
    %379 = vector.multi_reduction <add>, %378, %cst_133 [2] : vector<4x8x12xf32> to vector<4x8xf32>
    %380 = vector.shape_cast %379 : vector<4x8xf32> to vector<4x8x1xf32>
    %381 = vector.broadcast %380 : vector<4x8x1xf32> to vector<4x8x12xf32>
    %382 = arith.divf %378, %381 : vector<4x8x12xf32>
    "tpu.trace_start"() <{level = 10 : i32, message = "hqk,hkd->hqd"}> : () -> ()
    %cst_134 = arith.constant dense<0.000000e+00> : vector<4x8x8xf32>
    %383 = tpu.matmul %382, %372, %cst_134 {dimension_numbers = #tpu.dot_dimension_numbers<[2], [1], [1], [2], [0, 0, 0, 1, 1, 2], [0], [0]>} : vector<4x8x12xf32>, vector<4x12x8xf32>, vector<4x8x8xf32> -> vector<4x8x8xf32>
    "tpu.trace_stop"() : () -> ()
    %384 = vector.extract_strided_slice %383 {offsets = [0, 0, 0], sizes = [1, 8, 8], strides = [1, 1, 1]} : vector<4x8x8xf32> to vector<1x8x8xf32>
    %385 = vector.shape_cast %384 : vector<1x8x8xf32> to vector<8x8xf32>
    %386 = vector.extract_strided_slice %383 {offsets = [1, 0, 0], sizes = [1, 8, 8], strides = [1, 1, 1]} : vector<4x8x8xf32> to vector<1x8x8xf32>
    %387 = vector.shape_cast %386 : vector<1x8x8xf32> to vector<8x8xf32>
    %388 = vector.extract_strided_slice %383 {offsets = [2, 0, 0], sizes = [1, 8, 8], strides = [1, 1, 1]} : vector<4x8x8xf32> to vector<1x8x8xf32>
    %389 = vector.shape_cast %388 : vector<1x8x8xf32> to vector<8x8xf32>
    %390 = vector.extract_strided_slice %383 {offsets = [3, 0, 0], sizes = [1, 8, 8], strides = [1, 1, 1]} : vector<4x8x8xf32> to vector<1x8x8xf32>
    %391 = vector.shape_cast %390 : vector<1x8x8xf32> to vector<8x8xf32>
    %392 = tpu.concatenate %385, %387, %389, %391 in 1 : vector<8x8xf32>, vector<8x8xf32>, vector<8x8xf32>, vector<8x8xf32> -> vector<8x32xf32>
    %cst_135 = arith.constant dense<0.000000e+00> : vector<8x32xf32>
    %393 = tpu.matmul %392, %331, %cst_135 {dimension_numbers = #tpu.dot_dimension_numbers<[1], [0], [0], [1], [0, 0, 1, 1], [], []>} : vector<8x32xf32>, vector<32x32xf32>, vector<8x32xf32> -> vector<8x32xf32>
    %394 = vector.broadcast %333 : vector<1x32xf32> to vector<8x32xf32>
    %395 = arith.addf %393, %394 : vector<8x32xf32>
    %396 = arith.addf %325, %395 : vector<8x32xf32>
    %c1_136 = arith.constant 1 : index
    %c0_137 = arith.constant 0 : index
    %c0_138 = arith.constant 0 : index
    %397 = vector.load %arg17[%c1_136, %c0_137, %c0_138] : memref<2x1x32xf32, #tpu.memory_space<vmem>>, vector<1x1x32xf32>
    %398 = vector.shape_cast %397 : vector<1x1x32xf32> to vector<1x32xf32>
    %c1_139 = arith.constant 1 : index
    %c0_140 = arith.constant 0 : index
    %c0_141 = arith.constant 0 : index
    %399 = vector.load %arg18[%c1_139, %c0_140, %c0_141] : memref<2x1x32xf32, #tpu.memory_space<vmem>>, vector<1x1x32xf32>
    %400 = vector.shape_cast %399 : vector<1x1x32xf32> to vector<1x32xf32>
    %cst_142 = arith.constant dense<0.000000e+00> : vector<8xf32>
    %401 = vector.multi_reduction <add>, %396, %cst_142 [1] : vector<8x32xf32> to vector<8xf32>
    %402 = vector.shape_cast %401 : vector<8xf32> to vector<8x1xf32>
    %cst_143 = arith.constant 3.200000e+01 : f32
    %403 = vector.broadcast %cst_143 : f32 to vector<8x1xf32>
    %404 = arith.divf %402, %403 : vector<8x1xf32>
    %405 = vector.broadcast %404 : vector<8x1xf32> to vector<8x32xf32>
    %406 = arith.subf %396, %405 : vector<8x32xf32>
    %407 = arith.mulf %406, %406 : vector<8x32xf32>
    %cst_144 = arith.constant dense<0.000000e+00> : vector<8xf32>
    %408 = vector.multi_reduction <add>, %407, %cst_144 [1] : vector<8x32xf32> to vector<8xf32>
    %409 = vector.shape_cast %408 : vector<8xf32> to vector<8x1xf32>
    %cst_145 = arith.constant 3.200000e+01 : f32
    %410 = vector.broadcast %cst_145 : f32 to vector<8x1xf32>
    %411 = arith.divf %409, %410 : vector<8x1xf32>
    %412 = vector.broadcast %404 : vector<8x1xf32> to vector<8x32xf32>
    %413 = arith.subf %396, %412 : vector<8x32xf32>
    %cst_146 = arith.constant 9.99999974E-6 : f32
    %414 = vector.broadcast %cst_146 : f32 to vector<8x1xf32>
    %415 = arith.addf %411, %414 : vector<8x1xf32>
    %416 = math.rsqrt %415 : vector<8x1xf32>
    %417 = vector.broadcast %416 : vector<8x1xf32> to vector<8x32xf32>
    %418 = arith.mulf %413, %417 : vector<8x32xf32>
    %419 = vector.broadcast %398 : vector<1x32xf32> to vector<8x32xf32>
    %420 = arith.mulf %418, %419 : vector<8x32xf32>
    %421 = vector.broadcast %400 : vector<1x32xf32> to vector<8x32xf32>
    %422 = arith.addf %420, %421 : vector<8x32xf32>
    %c1_147 = arith.constant 1 : index
    %c0_148 = arith.constant 0 : index
    %c0_149 = arith.constant 0 : index
    %423 = vector.load %arg11[%c1_147, %c0_148, %c0_149] : memref<2x32x64xf32, #tpu.memory_space<vmem>>, vector<1x32x64xf32>
    %424 = vector.shape_cast %423 : vector<1x32x64xf32> to vector<32x64xf32>
    %cst_150 = arith.constant dense<0.000000e+00> : vector<8x64xf32>
    %425 = tpu.matmul %422, %424, %cst_150 {dimension_numbers = #tpu.dot_dimension_numbers<[1], [0], [0], [1], [0, 0, 1, 1], [], []>} : vector<8x32xf32>, vector<32x64xf32>, vector<8x64xf32> -> vector<8x64xf32>
    %c1_151 = arith.constant 1 : index
    %c0_152 = arith.constant 0 : index
    %c0_153 = arith.constant 0 : index
    %426 = vector.load %arg12[%c1_151, %c0_152, %c0_153] : memref<2x1x64xf32, #tpu.memory_space<vmem>>, vector<1x1x64xf32>
    %427 = vector.shape_cast %426 : vector<1x1x64xf32> to vector<1x64xf32>
    %428 = vector.broadcast %427 : vector<1x64xf32> to vector<8x64xf32>
    %429 = arith.addf %425, %428 : vector<8x64xf32>
    %cst_154 = arith.constant 0.000000e+00 : f32
    %430 = vector.broadcast %cst_154 : f32 to vector<8x64xf32>
    %431 = arith.maximumf %429, %430 : vector<8x64xf32>
    %c1_155 = arith.constant 1 : index
    %c0_156 = arith.constant 0 : index
    %c0_157 = arith.constant 0 : index
    %432 = vector.load %arg13[%c1_155, %c0_156, %c0_157] : memref<2x64x32xf32, #tpu.memory_space<vmem>>, vector<1x64x32xf32>
    %433 = vector.shape_cast %432 : vector<1x64x32xf32> to vector<64x32xf32>
    %cst_158 = arith.constant dense<0.000000e+00> : vector<8x32xf32>
    %434 = tpu.matmul %431, %433, %cst_158 {dimension_numbers = #tpu.dot_dimension_numbers<[1], [0], [0], [1], [0, 0, 1, 1], [], []>} : vector<8x64xf32>, vector<64x32xf32>, vector<8x32xf32> -> vector<8x32xf32>
    %c1_159 = arith.constant 1 : index
    %c0_160 = arith.constant 0 : index
    %c0_161 = arith.constant 0 : index
    %435 = vector.load %arg14[%c1_159, %c0_160, %c0_161] : memref<2x1x32xf32, #tpu.memory_space<vmem>>, vector<1x1x32xf32>
    %436 = vector.shape_cast %435 : vector<1x1x32xf32> to vector<1x32xf32>
    %437 = vector.broadcast %436 : vector<1x32xf32> to vector<8x32xf32>
    %438 = arith.addf %434, %437 : vector<8x32xf32>
    %439 = arith.addf %422, %438 : vector<8x32xf32>
    %c1_162 = arith.constant 1 : index
    %c0_163 = arith.constant 0 : index
    %c0_164 = arith.constant 0 : index
    %440 = vector.load %arg19[%c1_162, %c0_163, %c0_164] : memref<2x1x32xf32, #tpu.memory_space<vmem>>, vector<1x1x32xf32>
    %441 = vector.shape_cast %440 : vector<1x1x32xf32> to vector<1x32xf32>
    %c1_165 = arith.constant 1 : index
    %c0_166 = arith.constant 0 : index
    %c0_167 = arith.constant 0 : index
    %442 = vector.load %arg20[%c1_165, %c0_166, %c0_167] : memref<2x1x32xf32, #tpu.memory_space<vmem>>, vector<1x1x32xf32>
    %443 = vector.shape_cast %442 : vector<1x1x32xf32> to vector<1x32xf32>
    %cst_168 = arith.constant dense<0.000000e+00> : vector<8xf32>
    %444 = vector.multi_reduction <add>, %439, %cst_168 [1] : vector<8x32xf32> to vector<8xf32>
    %445 = vector.shape_cast %444 : vector<8xf32> to vector<8x1xf32>
    %cst_169 = arith.constant 3.200000e+01 : f32
    %446 = vector.broadcast %cst_169 : f32 to vector<8x1xf32>
    %447 = arith.divf %445, %446 : vector<8x1xf32>
    %448 = vector.broadcast %447 : vector<8x1xf32> to vector<8x32xf32>
    %449 = arith.subf %439, %448 : vector<8x32xf32>
    %450 = arith.mulf %449, %449 : vector<8x32xf32>
    %cst_170 = arith.constant dense<0.000000e+00> : vector<8xf32>
    %451 = vector.multi_reduction <add>, %450, %cst_170 [1] : vector<8x32xf32> to vector<8xf32>
    %452 = vector.shape_cast %451 : vector<8xf32> to vector<8x1xf32>
    %cst_171 = arith.constant 3.200000e+01 : f32
    %453 = vector.broadcast %cst_171 : f32 to vector<8x1xf32>
    %454 = arith.divf %452, %453 : vector<8x1xf32>
    %455 = vector.broadcast %447 : vector<8x1xf32> to vector<8x32xf32>
    %456 = arith.subf %439, %455 : vector<8x32xf32>
    %cst_172 = arith.constant 9.99999974E-6 : f32
    %457 = vector.broadcast %cst_172 : f32 to vector<8x1xf32>
    %458 = arith.addf %454, %457 : vector<8x1xf32>
    %459 = math.rsqrt %458 : vector<8x1xf32>
    %460 = vector.broadcast %459 : vector<8x1xf32> to vector<8x32xf32>
    %461 = arith.mulf %456, %460 : vector<8x32xf32>
    %462 = vector.broadcast %441 : vector<1x32xf32> to vector<8x32xf32>
    %463 = arith.mulf %461, %462 : vector<8x32xf32>
    %464 = vector.broadcast %443 : vector<1x32xf32> to vector<8x32xf32>
    %465 = arith.addf %463, %464 : vector<8x32xf32>
    %c0_173 = arith.constant 0 : index
    %c0_174 = arith.constant 0 : index
    %466 = vector.load %arg21[%c0_173, %c0_174] : memref<1x32xf32, #tpu.memory_space<vmem>>, vector<1x32xf32>
    %c0_175 = arith.constant 0 : index
    %c0_176 = arith.constant 0 : index
    %467 = vector.load %arg22[%c0_175, %c0_176] : memref<1x32xf32, #tpu.memory_space<vmem>>, vector<1x32xf32>
    %cst_177 = arith.constant dense<0.000000e+00> : vector<8xf32>
    %468 = vector.multi_reduction <add>, %465, %cst_177 [1] : vector<8x32xf32> to vector<8xf32>
    %469 = vector.shape_cast %468 : vector<8xf32> to vector<8x1xf32>
    %cst_178 = arith.constant 3.200000e+01 : f32
    %470 = vector.broadcast %cst_178 : f32 to vector<8x1xf32>
    %471 = arith.divf %469, %470 : vector<8x1xf32>
    %472 = vector.broadcast %471 : vector<8x1xf32> to vector<8x32xf32>
    %473 = arith.subf %465, %472 : vector<8x32xf32>
    %474 = arith.mulf %473, %473 : vector<8x32xf32>
    %cst_179 = arith.constant dense<0.000000e+00> : vector<8xf32>
    %475 = vector.multi_reduction <add>, %474, %cst_179 [1] : vector<8x32xf32> to vector<8xf32>
    %476 = vector.shape_cast %475 : vector<8xf32> to vector<8x1xf32>
    %cst_180 = arith.constant 3.200000e+01 : f32
    %477 = vector.broadcast %cst_180 : f32 to vector<8x1xf32>
    %478 = arith.divf %476, %477 : vector<8x1xf32>
    %479 = vector.broadcast %471 : vector<8x1xf32> to vector<8x32xf32>
    %480 = arith.subf %465, %479 : vector<8x32xf32>
    %cst_181 = arith.constant 9.99999974E-6 : f32
    %481 = vector.broadcast %cst_181 : f32 to vector<8x1xf32>
    %482 = arith.addf %478, %481 : vector<8x1xf32>
    %483 = math.rsqrt %482 : vector<8x1xf32>
    %484 = vector.broadcast %483 : vector<8x1xf32> to vector<8x32xf32>
    %485 = arith.mulf %480, %484 : vector<8x32xf32>
    %486 = vector.broadcast %466 : vector<1x32xf32> to vector<8x32xf32>
    %487 = arith.mulf %485, %486 : vector<8x32xf32>
    %488 = vector.broadcast %467 : vector<1x32xf32> to vector<8x32xf32>
    %489 = arith.addf %487, %488 : vector<8x32xf32>
    %c0_182 = arith.constant 0 : index
    %c0_183 = arith.constant 0 : index
    %c0_184 = arith.constant 0 : index
    %490 = vector.load %arg23[%c0_182, %c0_183, %c0_184] : memref<1x8x32xf32, #tpu.memory_space<vmem>>, vector<1x8x32xf32>
    %491 = vector.shape_cast %490 : vector<1x8x32xf32> to vector<8x32xf32>
    %492 = vector.shape_cast %489 : vector<8x32xf32> to vector<1x8x32xf32>
    tpu.vector_store %arg23[%c0_182, %c0_183, %c0_184], %492 {strides = array<i32>} : memref<1x8x32xf32, #tpu.memory_space<vmem>>, vector<1x8x32xf32>,
    return
  }
  func.func @transform_0(%arg0: i32) -> (i32, i32, i32) {
    %c0_i32 = arith.constant 0 : i32
    %c0_i32_0 = arith.constant 0 : i32
    %c0_i32_1 = arith.constant 0 : i32
    return %arg0, %c0_i32, %c0_i32_0 : i32, i32, i32
  }
  func.func @transform_1(%arg0: i32) -> (i32, i32, i32) {
    %c0_i32 = arith.constant 0 : i32
    %c0_i32_0 = arith.constant 0 : i32
    %c0_i32_1 = arith.constant 0 : i32
    return %arg0, %c0_i32, %c0_i32_0 : i32, i32, i32
  }
  func.func @transform_2(%arg0: i32) -> (i32, i32, i32) {
    %c0_i32 = arith.constant 0 : i32
    %c0_i32_0 = arith.constant 0 : i32
    %c0_i32_1 = arith.constant 0 : i32
    %c0_i32_2 = arith.constant 0 : i32
    return %c0_i32, %c0_i32_0, %c0_i32_1 : i32, i32, i32
  }
  func.func @transform_3(%arg0: i32) -> (i32, i32, i32) {
    %c0_i32 = arith.constant 0 : i32
    %c0_i32_0 = arith.constant 0 : i32
    %c0_i32_1 = arith.constant 0 : i32
    %c0_i32_2 = arith.constant 0 : i32
    return %c0_i32, %c0_i32_0, %c0_i32_1 : i32, i32, i32
  }
  func.func @transform_4(%arg0: i32) -> (i32, i32, i32) {
    %c0_i32 = arith.constant 0 : i32
    %c0_i32_0 = arith.constant 0 : i32
    %c0_i32_1 = arith.constant 0 : i32
    %c0_i32_2 = arith.constant 0 : i32
    return %c0_i32, %c0_i32_0, %c0_i32_1 : i32, i32, i32
  }
  func.func @transform_5(%arg0: i32) -> (i32, i32, i32) {
    %c0_i32 = arith.constant 0 : i32
    %c0_i32_0 = arith.constant 0 : i32
    %c0_i32_1 = arith.constant 0 : i32
    %c0_i32_2 = arith.constant 0 : i32
    return %c0_i32, %c0_i32_0, %c0_i32_1 : i32, i32, i32
  }
  func.func @transform_6(%arg0: i32) -> (i32, i32, i32) {
    %c0_i32 = arith.constant 0 : i32
    %c0_i32_0 = arith.constant 0 : i32
    %c0_i32_1 = arith.constant 0 : i32
    %c0_i32_2 = arith.constant 0 : i32
    return %c0_i32, %c0_i32_0, %c0_i32_1 : i32, i32, i32
  }
  func.func @transform_7(%arg0: i32) -> (i32, i32, i32) {
    %c0_i32 = arith.constant 0 : i32
    %c0_i32_0 = arith.constant 0 : i32
    %c0_i32_1 = arith.constant 0 : i32
    %c0_i32_2 = arith.constant 0 : i32
    return %c0_i32, %c0_i32_0, %c0_i32_1 : i32, i32, i32
  }
  func.func @transform_8(%arg0: i32) -> (i32, i32, i32) {
    %c0_i32 = arith.constant 0 : i32
    %c0_i32_0 = arith.constant 0 : i32
    %c0_i32_1 = arith.constant 0 : i32
    %c0_i32_2 = arith.constant 0 : i32
    return %c0_i32, %c0_i32_0, %c0_i32_1 : i32, i32, i32
  }
  func.func @transform_9(%arg0: i32) -> (i32, i32, i32) {
    %c0_i32 = arith.constant 0 : i32
    %c0_i32_0 = arith.constant 0 : i32
    %c0_i32_1 = arith.constant 0 : i32
    %c0_i32_2 = arith.constant 0 : i32
    return %c0_i32, %c0_i32_0, %c0_i32_1 : i32, i32, i32
  }
  func.func @transform_10(%arg0: i32) -> (i32, i32, i32) {
    %c0_i32 = arith.constant 0 : i32
    %c0_i32_0 = arith.constant 0 : i32
    %c0_i32_1 = arith.constant 0 : i32
    %c0_i32_2 = arith.constant 0 : i32
    return %c0_i32, %c0_i32_0, %c0_i32_1 : i32, i32, i32
  }
  func.func @transform_11(%arg0: i32) -> (i32, i32, i32) {
    %c0_i32 = arith.constant 0 : i32
    %c0_i32_0 = arith.constant 0 : i32
    %c0_i32_1 = arith.constant 0 : i32
    %c0_i32_2 = arith.constant 0 : i32
    return %c0_i32, %c0_i32_0, %c0_i32_1 : i32, i32, i32
  }
  func.func @transform_12(%arg0: i32) -> (i32, i32, i32) {
    %c0_i32 = arith.constant 0 : i32
    %c0_i32_0 = arith.constant 0 : i32
    %c0_i32_1 = arith.constant 0 : i32
    %c0_i32_2 = arith.constant 0 : i32
    return %c0_i32, %c0_i32_0, %c0_i32_1 : i32, i32, i32
  }
  func.func @transform_13(%arg0: i32) -> (i32, i32, i32) {
    %c0_i32 = arith.constant 0 : i32
    %c0_i32_0 = arith.constant 0 : i32
    %c0_i32_1 = arith.constant 0 : i32
    %c0_i32_2 = arith.constant 0 : i32
    return %c0_i32, %c0_i32_0, %c0_i32_1 : i32, i32, i32
  }
  func.func @transform_14(%arg0: i32) -> (i32, i32, i32) {
    %c0_i32 = arith.constant 0 : i32
    %c0_i32_0 = arith.constant 0 : i32
    %c0_i32_1 = arith.constant 0 : i32
    %c0_i32_2 = arith.constant 0 : i32
    return %c0_i32, %c0_i32_0, %c0_i32_1 : i32, i32, i32
  }
  func.func @transform_15(%arg0: i32) -> (i32, i32, i32) {
    %c0_i32 = arith.constant 0 : i32
    %c0_i32_0 = arith.constant 0 : i32
    %c0_i32_1 = arith.constant 0 : i32
    %c0_i32_2 = arith.constant 0 : i32
    return %c0_i32, %c0_i32_0, %c0_i32_1 : i32, i32, i32
  }
  func.func @transform_16(%arg0: i32) -> (i32, i32, i32) {
    %c0_i32 = arith.constant 0 : i32
    %c0_i32_0 = arith.constant 0 : i32
    %c0_i32_1 = arith.constant 0 : i32
    %c0_i32_2 = arith.constant 0 : i32
    return %c0_i32, %c0_i32_0, %c0_i32_1 : i32, i32, i32
  }
  func.func @transform_17(%arg0: i32) -> (i32, i32, i32) {
    %c0_i32 = arith.constant 0 : i32
    %c0_i32_0 = arith.constant 0 : i32
    %c0_i32_1 = arith.constant 0 : i32
    %c0_i32_2 = arith.constant 0 : i32
    return %c0_i32, %c0_i32_0, %c0_i32_1 : i32, i32, i32
  }
  func.func @transform_18(%arg0: i32) -> (i32, i32, i32) {
    %c0_i32 = arith.constant 0 : i32
    %c0_i32_0 = arith.constant 0 : i32
    %c0_i32_1 = arith.constant 0 : i32
    %c0_i32_2 = arith.constant 0 : i32
    return %c0_i32, %c0_i32_0, %c0_i32_1 : i32, i32, i32
  }
  func.func @transform_19(%arg0: i32) -> (i32, i32, i32) {
    %c0_i32 = arith.constant 0 : i32
    %c0_i32_0 = arith.constant 0 : i32
    %c0_i32_1 = arith.constant 0 : i32
    %c0_i32_2 = arith.constant 0 : i32
    return %c0_i32, %c0_i32_0, %c0_i32_1 : i32, i32, i32
  }
  func.func @transform_20(%arg0: i32) -> (i32, i32) {
    %c0_i32 = arith.constant 0 : i32
    %c0_i32_0 = arith.constant 0 : i32
    %c0_i32_1 = arith.constant 0 : i32
    return %c0_i32, %c0_i32_0 : i32, i32
  }
  func.func @transform_21(%arg0: i32) -> (i32, i32) {
    %c0_i32 = arith.constant 0 : i32
    %c0_i32_0 = arith.constant 0 : i32
    %c0_i32_1 = arith.constant 0 : i32
    return %c0_i32, %c0_i32_0 : i32, i32
  }
  func.func @transform_22(%arg0: i32) -> (i32, i32, i32) {
    %c0_i32 = arith.constant 0 : i32
    %c0_i32_0 = arith.constant 0 : i32
    %c0_i32_1 = arith.constant 0 : i32
    return %arg0, %c0_i32, %c0_i32_0 : i32, i32, i32
  }
}

</mosaic_0001>

<bundles_post_ra>
// kernel: decoder_forward.1
= control target key start
LH: loop header
LB: loop body
LE: loop exit
PB: predicated region body
PF: predicated region fallthrough
CT: control target
= control target key end

     0   :  { %s7628_s0 = inlined_call_operand.vmem [shape: f32[2,8,32], index: 0, kind: input, shape index: {}]   ;;  %s7629_s1 = inlined_call_operand.vmem [shape: f32[2,12,32], index: 1, kind: input, shape index: {}]   ;;  %s7630_s2 = inlined_call_operand.vmem [shape: f32[2,32,96], index: 2, kind: input, shape index: {}]   ;;  %s7631_s3 = inlined_call_operand.vmem [shape: f32[2,1,96], index: 3, kind: input, shape index: {}]   ;;  %s7632_s4 = inlined_call_operand.vmem [shape: f32[2,32,32], index: 4, kind: input, shape index: {}]   ;;  %s7633_s5 = inlined_call_operand.vmem [shape: f32[2,1,32], index: 5, kind: input, shape index: {}]   ;;  %s7634_s6 = inlined_call_operand.vmem [shape: f32[2,32,96], index: 6, kind: input, shape index: {}]   ;;  %s7635_s7 = inlined_call_operand.hbm [shape: f32[2,1,96], index: 7, kind: input, shape index: {}]   ;;  %s7636_s8 = inlined_call_operand.vmem [shape: f32[2,32,32], index: 8, kind: input, shape index: {}]   ;;  %s7637_s9 = inlined_call_operand.hbm [shape: f32[2,1,32], index: 9, kind: input, shape index: {}]   ;;  %s7638_s10 = inlined_call_operand.hbm [shape: f32[2,32,64], index: 10, kind: input, shape index: {}]   ;;  %s7639_s11 = inlined_call_operand.hbm [shape: f32[2,1,64], index: 11, kind: input, shape index: {}]   ;;  %s7640_s12 = inlined_call_operand.vmem [shape: f32[2,64,32], index: 12, kind: input, shape index: {}]   ;;  %s7641_s13 = inlined_call_operand.hbm [shape: f32[2,1,32], index: 13, kind: input, shape index: {}]   ;;  %s7642_s14 = inlined_call_operand.hbm [shape: f32[2,1,32], index: 14, kind: input, shape index: {}]   ;;  %s7643_s15 = inlined_call_operand.hbm [shape: f32[2,1,32], index: 15, kind: input, shape index: {}]   ;;  %s7644_s16 = inlined_call_operand.vmem [shape: f32[2,1,32], index: 16, kind: input, shape index: {}]   ;;  %s7645_s17 = inlined_call_operand.hbm [shape: f32[2,1,32], index: 17, kind: input, shape index: {}]   ;;  %s7646_s18 = inlined_call_operand.vmem [shape: f32[2,1,32], index: 18, kind: input, shape index: {}]   ;;  %s7647_s19 = inlined_call_operand.vmem [shape: f32[2,1,32], index: 19, kind: input, shape index: {}]   ;;  %s7648_s20 = inlined_call_operand.vmem [shape: f32[1,32], index: 20, kind: input, shape index: {}]   ;;  %s7649_s21 = inlined_call_operand.hbm [shape: f32[1,32], index: 21, kind: input, shape index: {}]   ;;  %s7650_s22 = inlined_call_operand.vmem [shape: f32[2,8,32], index: 22, kind: output, shape index: {}]  }
   0x1   :  { %7680 = sst [smem:[#allocation22_spill]] %s7628_s0 }
   0x2   :  { %7681 = sst [smem:[#allocation23_spill]] %s7629_s1 }
   0x3   :  { %7682 = sst [smem:[#allocation24_spill]] %s7630_s2 }
   0x4   :  { %7683 = sst [smem:[#allocation25_spill]] %s7631_s3 }
   0x5   :  { %7684 = sst [smem:[#allocation26_spill]] %s7632_s4 }
   0x6   :  { %7685 = sst [smem:[#allocation27_spill]] %s7633_s5 }
   0x7   :  { %7686 = sst [smem:[#allocation28_spill]] %s7634_s6 }
   0x8   :  { %7687 = sst [smem:[#allocation29_spill]] %s7635_s7 }
   0x9   :  { %7688 = sst [smem:[#allocation30_spill]] %s7646_s18 }
   0xa   :  { %7689 = sst [smem:[#allocation31_spill]] %s7647_s19 }
   0xb   :  { %7690 = sst [smem:[#allocation32_spill]] %s7648_s20 }
   0xc   :  { %7691 = sst [smem:[#allocation33_spill]] %s7650_s22 }
   0xd   :  { %27 = vsyncpa [#allocation3], 0 }
   0xe   :  { %28 = vsyncpa [#allocation5], 0 }
   0xf   :  { %29 = vsyncpa [#allocation8], 0 }
  0x10   :  { %30 = vsyncpa [#allocation11], 0 }
  0x11   :  { %31 = vsyncpa [#allocation14], 0  ;;  %s6742_s3 = smov 0  }
  0x12 LB: > { %7692 = sst [smem:[#allocation21_spill]] %s6600_s3  ;;  %s6748_s28 = sadd.s32 4294967295, %s6600_s3   ;;  %s6600_s3 = sphi %s6742_s3, %s37_s3  }
  0x13   : > { %p5190_p0 = scmp.ge.s32.totalorder %s6600_s3, 1  ;;  %p540_p1 = scmp.lt.s32.totalorder %s6600_s3, 3 }
  0x14   : > { %p7659_p2 = scmp.eq.s32.totalorder %s6748_s28, 0  ;;  %s6602_s30 = smov [#allocation4]  }
  0x15   : > { %p6753_p3 = pnand %p5190_p0, %p540_p1  ;;  %s583_s4 = sshll.u32 %s6602_s30, 4  ;;  %s6757_s4 = int_to_ptr.vmem [resolvable:$true] %s583_s4 }
  0x16   : > { %s6603_s0 = smov [#allocation7]   ;;  %s6604_s5 = smov [#allocation10]  }
  0x17   : > { %s7693_s29 = scalar_select %p6753_p3, 1, 0 }
  0x18   : > { %p6075_p4 = pneg %p6753_p3  ;;  %s609_s23 = sshll.u32 %s6603_s0, 4  ;;  %s6761_s23 = int_to_ptr.vmem [resolvable:$true] %s609_s23 }
  0x19   : > { %s638_s24 = sshll.u32 %s6604_s5, 4  ;;  %s6605_s6 = smov [#allocation13]   ;;  %s6769_s24 = int_to_ptr.vmem [resolvable:$true] %s638_s24 }
  0x1a   : > { %p6765_p5 = pnand %p7659_p2, %p6075_p4  ;;  %s6771_s25 = sshll.u32 %s6605_s6, 4  ;;  %s668_s25 = int_to_ptr.vmem [resolvable:$true] %s6771_s25 }
  0x1b   : > { %s6322_s27 = scalar_lea.hbm %s7637_s9, 32 }
  0x1c   : > { %p6323_p6 = scmp.ne.s32.totalorder %s7637_s9, %s6322_s27  ;;  %p6781_p7 = pneg %p6765_p5 }
  0x1d   : > { %p6329_p10 = scmp.lt.u32.totalorder %s6322_s27, %s7637_s9 }
  0x1e   : > { %p6325_p8 = pnand %p6781_p7, %p6323_p6 }
  0x20   : > { %p6326_p9 = pneg %p6325_p8 }
  0x22   : > { %p6331_p11 = pnand %p6329_p10, %p6326_p9 }
  0x24   : > { %6334 = shalt.err (!%p6331_p11)
}
  0x25   : > { %s6335_s26 = scalar_lea.vmem %s6757_s4, 32  ;;  %p6343_p1 = scmp.lt.s32.totalorder %s6757_s4, %s6757_s4 }
  0x26   : > { %p6336_p12 = scmp.ne.s32.totalorder %s6757_s4, %s6335_s26  ;;  %p6344_p4 = scmp.lt.s32.totalorder %s6335_s26, %s6335_s26 }
  0x28   : > { %p6338_p13 = pnand %p6336_p12, %p6781_p7  ;;  %p6345_p6 = por %p6344_p4, %p6343_p1 }
  0x2a   : > { %p6339_p0 = pneg %p6338_p13 }
  0x2c   : > { %p6346_p8 = pnand %p6345_p6, %p6339_p0 }
  0x2e   : > { %6349 = shalt.err (!%p6346_p8)
}
  0x2f   : > { %s7661_s2 = smov 16   ;;  %s7663_s27 = smov 1  }
  0x30   : > { %6081 = dma.hbm_to_vmem [thread:$0]  (!%p6765_p5), %s7637_s9, 32, %s6757_s4, [#allocation5], %s7661_s2, %s7661_s2, %s7663_s27  }
  0x31   : > { %s6350_s26 = scalar_lea.hbm %s7639_s11, 32 }
  0x32   : > { %p6351_p9 = scmp.ne.s32.totalorder %s7639_s11, %s6350_s26  ;;  %p6357_p12 = scmp.lt.u32.totalorder %s6350_s26, %s7639_s11 }
  0x34   : > { %p6353_p10 = pnand %p6351_p9, %p6781_p7 }
  0x36   : > { %p6354_p11 = pneg %p6353_p10 }
  0x38   : > { %p6359_p13 = pnand %p6357_p12, %p6354_p11 }
  0x3a   : > { %6362 = shalt.err (!%p6359_p13)
}
  0x3b   : > { %s6363_s4 = scalar_lea.vmem %s6761_s23, 32  ;;  %p6371_p6 = scmp.lt.s32.totalorder %s6761_s23, %s6761_s23 }
  0x3c   : > { %p6364_p0 = scmp.ne.s32.totalorder %s6761_s23, %s6363_s4  ;;  %p6372_p8 = scmp.lt.s32.totalorder %s6363_s4, %s6363_s4 }
  0x3e   : > { %p6366_p1 = pnand %p6364_p0, %p6781_p7  ;;  %p6373_p9 = por %p6372_p8, %p6371_p6 }
  0x40   : > { %p6367_p4 = pneg %p6366_p1 }
  0x42   : > { %p6374_p10 = pnand %p6373_p9, %p6367_p4 }
  0x44   : > { %6377 = shalt.err (!%p6374_p10)
}
  0x45   : > { %6087 = dma.hbm_to_vmem [thread:$0]  (!%p6765_p5), %s7639_s11, 32, %s6761_s23, [#allocation8], %s7661_s2, %s7661_s2, %s7663_s27  }
  0x46   : > { %s6378_s30 = scalar_lea.hbm %s7642_s14, 32 }
  0x47   : > { %p6379_p11 = scmp.ne.s32.totalorder %s7642_s14, %s6378_s30  ;;  %p6385_p0 = scmp.lt.u32.totalorder %s6378_s30, %s7642_s14 }
  0x49   : > { %p6381_p12 = pnand %p6379_p11, %p6781_p7 }
  0x4b   : > { %p6382_p13 = pneg %p6381_p12 }
  0x4d   : > { %p6387_p1 = pnand %p6385_p0, %p6382_p13 }
  0x4f   : > { %6390 = shalt.err (!%p6387_p1)
}
  0x50   : > { %s6391_s23 = scalar_lea.vmem %s6769_s24, 32  ;;  %p6399_p9 = scmp.lt.s32.totalorder %s6769_s24, %s6769_s24 }
  0x51   : > { %p6392_p4 = scmp.ne.s32.totalorder %s6769_s24, %s6391_s23  ;;  %p6400_p10 = scmp.lt.s32.totalorder %s6391_s23, %s6391_s23 }
  0x53   : > { %p6394_p6 = pnand %p6392_p4, %p6781_p7  ;;  %p6401_p11 = por %p6400_p10, %p6399_p9 }
  0x55   : > { %p6395_p8 = pneg %p6394_p6 }
  0x57   : > { %p6402_p12 = pnand %p6401_p11, %p6395_p8 }
  0x59   : > { %6405 = shalt.err (!%p6402_p12)
}
  0x5a   : > { %6093 = dma.hbm_to_vmem [thread:$0]  (!%p6765_p5), %s7642_s14, 32, %s6769_s24, [#allocation11], %s7661_s2, %s7661_s2, %s7663_s27  }
  0x5b   : > { %s6406_s22 = scalar_lea.hbm %s7645_s17, 32 }
  0x5c   : > { %p6407_p13 = scmp.ne.s32.totalorder %s7645_s17, %s6406_s22  ;;  %p6413_p4 = scmp.lt.u32.totalorder %s6406_s22, %s7645_s17 }
  0x5e   : > { %p6409_p0 = pnand %p6407_p13, %p6781_p7 }
  0x60   : > { %p6410_p1 = pneg %p6409_p0 }
  0x62   : > { %p6415_p6 = pnand %p6413_p4, %p6410_p1 }
  0x64   : > { %6418 = shalt.err (!%p6415_p6)
}
  0x65   : > { %s6419_s26 = scalar_lea.vmem %s668_s25, 32  ;;  %p6427_p11 = scmp.lt.s32.totalorder %s668_s25, %s668_s25 }
  0x66   : > { %p6420_p8 = scmp.ne.s32.totalorder %s668_s25, %s6419_s26  ;;  %p6428_p12 = scmp.lt.s32.totalorder %s6419_s26, %s6419_s26 }
  0x68   : > { %p6422_p9 = pnand %p6420_p8, %p6781_p7  ;;  %p6429_p2 = por %p6428_p12, %p6427_p11 }
  0x6a   : > { %p6423_p10 = pneg %p6422_p9 }
  0x6c   : > { %p6430_p3 = pnand %p6429_p2, %p6423_p10 }
  0x6e   : > { %6433 = shalt.err (!%p6430_p3)
}
  0x6f   : > { %6099 = dma.hbm_to_vmem [thread:$0]  (!%p6765_p5), %s7645_s17, 32, %s668_s25, [#allocation14], %s7661_s2, %s7661_s2, %s7663_s27  }
  0x70   : > { %s6608_s4 = smov [#allocation2]   ;;  %s6609_s19 = smov [#allocation6]  }
  0x71   : > { %s567_s18 = sshll.u32 %s6608_s4, 4  ;;  %s596_s20 = sshll.u32 %s6609_s19, 4  ;;  %s568_s18 = int_to_ptr.vmem [resolvable:$true] %s567_s18  ;;  %s597_s20 = int_to_ptr.vmem [resolvable:$true] %s596_s20 }
  0x72   : > { %s7696_s7 = sld [smem:[#allocation29_spill]] }
  0x78   : > { %s6434_s0 = scalar_lea.hbm %s7696_s7, 32 }
  0x79   : > { %p6435_p2 = scmp.ne.s32.totalorder %s7696_s7, %s6434_s0  ;;  %p6441_p0 = scmp.lt.u32.totalorder %s6434_s0, %s7696_s7 }
  0x7b   : > { %p6437_p3 = pnand %p6435_p2, %p6781_p7 }
  0x7d   : > { %p6438_p13 = pneg %p6437_p3 }
  0x7f   : > { %p6443_p1 = pnand %p6441_p0, %p6438_p13 }
  0x81   : > { %6446 = shalt.err (!%p6443_p1)
}
  0x82   : > { %s6447_s25 = scalar_lea.vmem %s568_s18, 32  ;;  %p6455_p9 = scmp.lt.s32.totalorder %s568_s18, %s568_s18 }
  0x83   : > { %p6448_p4 = scmp.ne.s32.totalorder %s568_s18, %s6447_s25  ;;  %p6456_p10 = scmp.lt.s32.totalorder %s6447_s25, %s6447_s25 }
  0x85   : > { %p6450_p6 = pnand %p6448_p4, %p6781_p7  ;;  %p6457_p11 = por %p6456_p10, %p6455_p9 }
  0x87   : > { %p6451_p8 = pneg %p6450_p6 }
  0x89   : > { %p6458_p12 = pnand %p6457_p11, %p6451_p8 }
  0x8b   : > { %6461 = shalt.err (!%p6458_p12)
}
  0x8c   : > { %6078 = dma.hbm_to_vmem [thread:$0]  (!%p6765_p5), %s7696_s7, 32, %s568_s18, [#allocation3], %s7661_s2, %s7661_s2, %s7663_s27  }
  0x8d   : > { %s6462_s30 = scalar_lea.hbm %s7638_s10, 1024 }
  0x8e   : > { %p6463_p2 = scmp.ne.s32.totalorder %s7638_s10, %s6462_s30  ;;  %p6469_p0 = scmp.lt.u32.totalorder %s6462_s30, %s7638_s10 }
  0x90   : > { %p6465_p3 = pnand %p6463_p2, %p6781_p7 }
  0x92   : > { %p6466_p13 = pneg %p6465_p3 }
  0x94   : > { %p6471_p1 = pnand %p6469_p0, %p6466_p13 }
  0x96   : > { %6474 = shalt.err (!%p6471_p1)
}
  0x97   : > { %s6475_s24 = scalar_lea.vmem %s597_s20, 1024  ;;  %p6483_p9 = scmp.lt.s32.totalorder %s597_s20, %s597_s20 }
  0x98   : > { %p6476_p4 = scmp.ne.s32.totalorder %s597_s20, %s6475_s24  ;;  %p6484_p10 = scmp.lt.s32.totalorder %s6475_s24, %s6475_s24 }
  0x9a   : > { %p6478_p6 = pnand %p6476_p4, %p6781_p7  ;;  %p6485_p11 = por %p6484_p10, %p6483_p9 }
  0x9c   : > { %p6479_p8 = pneg %p6478_p6 }
  0x9e   : > { %p6486_p12 = pnand %p6485_p11, %p6479_p8 }
  0xa0   : > { %6489 = shalt.err (!%p6486_p12)
}
  0xa1   : > { %s6610_s18 = smov 128   ;;  %s6611_s25 = smov 8  }
  0xa2   : > { %6084 = dma.hbm_to_vmem [thread:$0]  (!%p6765_p5), %s7638_s10, 1024, %s597_s20, [#allocation5], %s6610_s18, %s6610_s18, %s6611_s25  }
  0xa3   : > { %s6612_s19 = smov [#allocation9]   ;;  %s6613_s30 = smov [#allocation12]  }
  0xa4   : > { %s625_s22 = sshll.u32 %s6612_s19, 4  ;;  %s651_s0 = sshll.u32 %s6613_s30, 4  ;;  %s626_s22 = int_to_ptr.vmem [resolvable:$true] %s625_s22  ;;  %s652_s0 = int_to_ptr.vmem [resolvable:$true] %s651_s0 }
  0xa5   : > { %s6490_s26 = scalar_lea.hbm %s7641_s13, 32 }
  0xa6   : > { %p6491_p2 = scmp.ne.s32.totalorder %s7641_s13, %s6490_s26  ;;  %p6497_p0 = scmp.lt.u32.totalorder %s6490_s26, %s7641_s13 }
  0xa8   : > { %p6493_p3 = pnand %p6491_p2, %p6781_p7 }
  0xaa   : > { %p6494_p13 = pneg %p6493_p3 }
  0xac   : > { %p6499_p1 = pnand %p6497_p0, %p6494_p13 }
  0xae   : > { %6502 = shalt.err (!%p6499_p1)
}
  0xaf   : > { %s6503_s20 = scalar_lea.vmem %s626_s22, 32  ;;  %p6511_p9 = scmp.lt.s32.totalorder %s626_s22, %s626_s22 }
  0xb0   : > { %p6504_p4 = scmp.ne.s32.totalorder %s626_s22, %s6503_s20  ;;  %p6512_p10 = scmp.lt.s32.totalorder %s6503_s20, %s6503_s20 }
  0xb2   : > { %p6506_p6 = pnand %p6504_p4, %p6781_p7  ;;  %p6513_p11 = por %p6512_p10, %p6511_p9 }
  0xb4   : > { %p6507_p8 = pneg %p6506_p6 }
  0xb6   : > { %p6514_p12 = pnand %p6513_p11, %p6507_p8 }
  0xb8   : > { %6517 = shalt.err (!%p6514_p12)
}
  0xb9   : > { %s7697_s2 = smov 1   ;;  %s7698_s18 = smov 16  }
  0xba   : > { %6090 = dma.hbm_to_vmem [thread:$0]  (!%p6765_p5), %s7641_s13, 32, %s626_s22, [#allocation8], %s7698_s18, %s7698_s18, %s7697_s2  }
  0xbb   : > { %s6518_s4 = scalar_lea.hbm %s7643_s15, 32 }
  0xbc   : > { %p6519_p2 = scmp.ne.s32.totalorder %s7643_s15, %s6518_s4  ;;  %p6525_p0 = scmp.lt.u32.totalorder %s6518_s4, %s7643_s15 }
  0xbe   : > { %p6521_p3 = pnand %p6519_p2, %p6781_p7 }
  0xc0   : > { %p6522_p13 = pneg %p6521_p3 }
  0xc2   : > { %p6527_p1 = pnand %p6525_p0, %p6522_p13 }
  0xc4   : > { %6530 = shalt.err (!%p6527_p1)
}
  0xc5   : > { %s6531_s26 = scalar_lea.vmem %s652_s0, 32  ;;  %p6539_p9 = scmp.lt.s32.totalorder %s652_s0, %s652_s0 }
  0xc6   : > { %p6532_p4 = scmp.ne.s32.totalorder %s652_s0, %s6531_s26  ;;  %p6540_p10 = scmp.lt.s32.totalorder %s6531_s26, %s6531_s26 }
  0xc8   : > { %p6534_p6 = pnand %p6532_p4, %p6781_p7  ;;  %p6541_p11 = por %p6540_p10, %p6539_p9 }
  0xca   : > { %p6535_p8 = pneg %p6534_p6 }
  0xcc   : > { %p6542_p12 = pnand %p6541_p11, %p6535_p8 }
  0xce   : > { %6545 = shalt.err (!%p6542_p12)
}
  0xcf   : > { %6096 = dma.hbm_to_vmem [thread:$0]  (!%p6765_p5), %s7643_s15, 32, %s652_s0, [#allocation11], %s7698_s18, %s7698_s18, %s7697_s2  }
  0xd0   : > { %s6614_s20 = smov [#allocation15]   ;;  %s6546_s23 = scalar_lea.hbm %s7649_s21, 16 }
  0xd1   : > { %s690_s7 = sshll.u32 %s6614_s20, 4  ;;  %p6547_p2 = scmp.ne.s32.totalorder %s7649_s21, %s6546_s23  ;;  %s691_s7 = int_to_ptr.vmem [resolvable:$true] %s690_s7 }
  0xd2   : > { %p6553_p0 = scmp.lt.u32.totalorder %s6546_s23, %s7649_s21 }
  0xd3   : > { %p6549_p3 = pnand %p6547_p2, %p6781_p7 }
  0xd5   : > { %p6550_p13 = pneg %p6549_p3 }
  0xd7   : > { %p6555_p1 = pnand %p6553_p0, %p6550_p13 }
  0xd9   : > { %6558 = shalt.err (!%p6555_p1)
}
  0xda   : > { %s6559_s0 = scalar_lea.vmem %s691_s7, 16  ;;  %s6566_s2 = scalar_lea.vmem %s691_s7, 32 }
  0xdb   : > { %p6560_p4 = scmp.ne.s32.totalorder %s691_s7, %s6559_s0  ;;  %p6567_p9 = scmp.lt.s32.totalorder %s691_s7, %s691_s7 }
  0xdc   : > { %p6568_p10 = scmp.lt.s32.totalorder %s6566_s2, %s6559_s0 }
  0xdd   : > { %p6562_p6 = pnand %p6560_p4, %p6781_p7 }
  0xde   : > { %p6569_p11 = por %p6568_p10, %p6567_p9 }
  0xdf   : > { %p6563_p8 = pneg %p6562_p6 }
  0xe1   : > { %p6570_p12 = pnand %p6569_p11, %p6563_p8 }
  0xe3   : > { %6573 = shalt.err (!%p6570_p12)
}
  0xe4   : > { %6102 = dma.hbm_to_vmem [thread:$0]  (!%p6765_p5), %s7649_s21, 16, %s691_s7, [#allocation14]  }
  0xe5   : > { %p7699_p2 = scmp.ne.s32.totalorder %s7693_s29, 0 }
  0xe6   : > { %p7700_p3 = scmp.eq.s32.totalorder (!%p7699_p2), %s6748_s28, 0 }
  0xe7   : > { %718 = sbr.rel (%p7699_p2) target bundleno = 9194 (0x23ea), region = 108 }
  0xee   : > { %6579 = dma.done.wait (%p7700_p3), [#allocation3], 32   ;;  %p7701_p7 = pmov %p7700_p3 }
  0xef   : > { %p7702_p13 = pmov %p7700_p3 }
  0xf0   : > { %6581 = vsyncadd (%p7701_p7), [#allocation3], 4294967264 }
  0xf1   : > { %6583 = dma.done.wait (%p7702_p13), [#allocation5], 1056   ;;  %p7703_p0 = pmov %p7700_p3 }
  0xf3   : > { %6585 = vsyncadd (%p7703_p0), [#allocation5], 4294966240  ;;  %p7704_p1 = pmov %p7703_p0 }
  0xf4   : > { %p7705_p5 = pmov %p7703_p0 }
  0xf5   : > { %6587 = dma.done.wait (%p7704_p1), [#allocation8], 64  }
  0xf6   : > { %6589 = vsyncadd (%p7705_p5), [#allocation8], 4294967232  ;;  %p7706_p4 = pmov %p7703_p0 }
  0xf7   : > { %p7707_p6 = pmov %p7703_p0 }
  0xf8   : > { %6591 = dma.done.wait (%p7706_p4), [#allocation11], 64  }
  0xf9   : > { %6593 = vsyncadd (%p7707_p6), [#allocation11], 4294967232  ;;  %p7708_p8 = pmov %p7703_p0 }
  0xfa   : > { %p7709_p9 = pmov %p7703_p0 }
  0xfb   : > { %6595 = dma.done.wait (%p7708_p8), [#allocation14], 48  }
  0xfc   : > { %6597 = vsyncadd (%p7709_p9), [#allocation14], 4294967248  ;;  %p815_p10 = scmp.lt.s32.totalorder %s6748_s28, 1  ;;  %v6615_v0 = vmov 0.0|0.0   ;;  %vm6616_vm0 = vmmov 0   ;;  %v6617_v1 = vmov 0.0  }
  0xfd   : > { %5875 = vmatprep.subr.bf16.mxu1 %v6615_v0  ;;  %5521 = vmatprep.mubr.msk.f32.mxu1 %vm6616_vm0, %v6617_v1  ;;  %s7710_s1 = sld [smem:[#allocation24_spill]]  ;;  %s7711_s19 = sld [smem:[#allocation22_spill]]  ;;  %vm847_vm1 = vcmask 261120   ;;  %vm930_vm2 = vcmask 64512   ;;  %vm1594_vm3 = vcmask 130048   ;;  %vm1596_vm4 = vcmask 195584  }
  0xfe   : > { %5534 = vmatprep.subr.mxu0 %v6617_v1  ;;  %5536 = vmatprep.mubr.msk.f32.mxu0 %vm6616_vm0, %v6617_v1  ;;  %s7735_s28 = smov (!%p815_p10, %s6748_s28), 1  ;;  %s7712_s2 = sld [smem:[#allocation25_spill]]  ;;  %vm7170_vm5 = vmpackc.low %vm930_vm2, %vm930_vm2  ;;  %vm2222_vm6 = vcmask 97280   ;;  %vm2275_vm7 = vcmask 1043456   ;;  %vm6626_vm8 = vmmov 1   ;;  %vm2812_vm10 = vcmask 523264  }
  0xff   : > { %s7665_s25 = sshll.u32 %s7735_s28, 3  ;;  %s7674_s18 = smov 104   ;;  %vm7219_vm9 = vmpackc.low %vm2275_vm7, %vm6626_vm8 }
 0x100   : > { %s7676_s6 = smov 120   ;;  %s6620_s3 = smov 96  }
 0x101   : > { %s7678_s29 = smov 112   ;;  %s7666_s26 = smov 64  }
 0x102   : > { %s7713_s20 = sld [smem:[#allocation26_spill]]  ;;  %s7672_s5 = smov 8  }
 0x103   : > { %v831_v2 = vld [vmem:[%s7710_s1] sm:$0xff]  ;;  %v832_v3 = vld [vmem:[%s7710_s1 + $0x8] sm:$0xff]  ;;  %v833_v4 = vld [vmem:[%s7710_s1 + $0x10] sm:$0xff]  ;;  %s818_s30 = scalar_lea.vmem %s7711_s19, %s7665_s25  ;;  %s7668_s0 = smov 24  }
 0x104   : > { %v5876_v5 = vpack.c.bf16 %v832_v3, %v831_v2  ;;  %v834_v6 = vld [vmem:[%s7710_s1 + $0x18] sm:$0xff]  ;;  %v7029_v8 = vld [vmem:[%s818_s30] sm:$0xff]  ;;  %s7670_s22 = smov 16   ;;  %s7714_s27 = sld [smem:[#allocation27_spill]] }
 0x105   : > { %v5879_v7 = vpack.c.bf16 %v834_v6, %v833_v4  ;;  %v5215_v9 = vld [vmem:[%s7712_s2] ss:$0 sm:$0xff]  ;;  %s7715_s19 = sld [smem:[#allocation28_spill]]  ;;  %s5352_s25 = sshll.u32 %s7735_s28, 4 }
 0x106   : > { %5877 = vmatpush3.bf16.msra.mxu1 %v5876_v5  ;;  %s7716_s23 = sld [smem:[#allocation23_spill]]  ;;  %s7721_s30 = smov 24  }
 0x107   : > { %5878 = vmatprep.subr.bf16.mxu1 %v6615_v0  ;;  %s7722_s7 = sld [smem:[#allocation30_spill]]  ;;  %s7726_s24 = smov 16  }
 0x108   : > { %v836_v6 = vld [vmem:[%s7713_s20] sm:$0xff] }
 0x10a   : > { %5880 = vmatpush3.bf16.msra.mxu1 %v5879_v7  ;;  %v837_v7 = vld [vmem:[%s7713_s20 + $0x8] sm:$0xff] }
 0x10b   : > { %5524 = vmatprep.subr.mxu1 %v6617_v1 }
 0x10c   : > { %s823_s4 = scalar_lea.vmem %s7716_s23, %s5352_s25  ;;  %s7724_s23 = smov 64  }
 0x10d   : > { %5522 = vmatmul.mubr.msk.f32.vlgmr.msra.gmra.mrb[0].mxu1 %vm847_vm1, %v7029_v8 }
 0x10e   : > { %5526 = vmatprep.mubr.msk.f32.mxu1 %vm6616_vm0, %v6617_v1 }
 0x1e0   : > { %v917_v10 = vpop.f32.mrb[0].mxu1 }
 0x1e1   : > { %v918_v11 = vadd.f32 %v5215_v9, %v917_v10  ;;  %v5523_v12 = vpop.f32.mrb[1].mxu1  ;;  %v5882_v9 = vpack.c.bf16 %v837_v7, %v836_v6 }
 0x1e2   : > { %v838_v12 = vld [vmem:[%s7713_s20 + $0x10] sm:$0xff] }
 0x1e3   : > { %926 = vrot.lane.b32.xlu1 %v918_v11, %s7674_s18  ;;  %922 = vrot.lane.b32.xlu0 %v918_v11, %s7676_s6 }
 0x1e7   : > { %928 = vrot.lane.b32.xlu1 %v918_v11, %s6620_s3  ;;  %924 = vrot.lane.b32.xlu0 %v918_v11, %s7678_s29 }
 0x255   : > { %v7043_v13 = vpop.permute.xlu1 %926  ;;  %v923_v14 = vpop.permute.xlu0 %922 }
 0x256   : > { %1005 = vrot.lane.b32.xlu0 %v923_v14, %s6620_s3 }
 0x259   : > { %v929_v15 = vpop.permute.xlu1 %928  ;;  %v7046_v16 = vpop.permute.xlu0 %924 }
 0x25a   : > { %5525 = vmatpush3.xpose.msk.msra.mxu1 %vm930_vm2, %v929_v15  ;;  %1157 = vrot.lane.b32.xlu0 %v7043_v13, %s6620_s3 }
 0x25b   : > { %1081 = vrot.lane.b32.xlu1 %v7046_v16, %s6620_s3  ;;  %5529 = vmatprep.subr.mxu1 %v6617_v1 }
 0x25d   : > { %5527 = vmatmul.mubr.msk.f32.vlgmr.msra.gmra.mrb[2].mxu1 %vm930_vm2, %v918_v11 }
 0x25e   : > { %5531 = vmatprep.mubr.msk.f32.mxu1 %vm6616_vm0, %v6617_v1 }
 0x2c8   : > { %v1006_v17 = vpop.permute.xlu0 %1005 }
 0x2c9   : > { %5530 = vmatpush3.xpose.msk.msra.mxu1 %vm930_vm2, %v1006_v17 }
 0x2ca   : > { %5539 = vmatprep.subr.mxu1 %v6617_v1 }
 0x2cc   : > { %5532 = vmatmul.mubr.msk.f32.vlgmr.msra.gmra.mrb[4].mxu1 %vm930_vm2, %v923_v14  ;;  %v1158_v18 = vpop.permute.xlu0 %1157 }
 0x2cd   : > { %v1082_v19 = vpop.permute.xlu1 %1081  ;;  %5540 = vmatpush3.xpose.msk.msra.mxu1 %vm930_vm2, %v1158_v18  ;;  %5541 = vmatprep.mubr.msk.f32.mxu1 %vm6616_vm0, %v6617_v1 }
 0x2ce   : > { %5535 = vmatpush3.xpose.msk.msra.mxu0 %vm930_vm2, %v1082_v19  ;;  %5549 = vmatprep.subr.mxu1 %v6617_v1 }
 0x2cf   : > { %5544 = vmatprep.subr.mxu0 %v6617_v1 }
 0x2d0   : > { %5542 = vmatmul.mubr.msk.f32.vlgmr.msra.gmra.mrb[6].mxu1 %vm930_vm2, %v7043_v13 }
 0x2d1   : > { %5537 = vmatmul.mubr.msk.f32.vlgmr.msra.gmra.mrb[0].mxu0 %vm930_vm2, %v7046_v16  ;;  %5551 = vmatprep.mubr.msk.f32.mxu1 %vm6616_vm0, %v6617_v1 }
 0x2d2   : > { %5546 = vmatprep.mubr.msk.f32.mxu0 %vm6616_vm0, %v6617_v1 }
 0x330   : > { %v1001_v20 = vpop.f32.mrb[2].mxu1 }
 0x331   : > { %v5528_v21 = vpop.f32.mrb[3].mxu1  ;;  %v1233_v22 = vsel %vm930_vm2, %v1001_v20, -inf }
 0x332   : > { %1234 = vmax.xlane.f32.xlu1 %v1233_v22 }
 0x39f   : > { %v1077_v23 = vpop.f32.mrb[4].mxu1 }
 0x3a0   : > { %v5533_v24 = vpop.f32.mrb[5].mxu1  ;;  %v1236_v25 = vsel %vm930_vm2, %v1077_v23, -inf }
 0x3a1   : > { %1237 = vmax.xlane.f32.xlu0 %v1236_v25 }
 0x3a3   : > { %v1229_v26 = vpop.f32.mrb[6].mxu1 }
 0x3a4   : > { %v1153_v27 = vpop.f32.mrb[0].mxu0  ;;  %v5543_v28 = vpop.f32.mrb[7].mxu1  ;;  %v1242_v29 = vsel %vm930_vm2, %v1229_v26, -inf }
 0x3a5   : > { %v5538_v30 = vpop.f32.mrb[1].mxu0  ;;  %v1239_v31 = vsel %vm930_vm2, %v1153_v27, -inf  ;;  %1243 = vmax.xlane.f32.xlu1 %v1242_v29 }
 0x3a6   : > { %1240 = vmax.xlane.f32.xlu0 %v1239_v31 }
 0x3b6   : > { %1353 = vrot.lane.b32.xlu1 %v923_v14, %s7666_s26 }
 0x3bc   : > { %1277 = vrot.lane.b32.xlu0 %v918_v11, %s7666_s26 }
 0x3bf   : > { %v1235_v32 = vpop.xlane.xlu1 %1234 }
 0x3c0   : > { %v1245_v33 = vsub.f32 %v1001_v20, %v1235_v32 }
 0x3c2   : > { %v1249_v34 = vmul.f32 1.442695, %v1245_v33  ;;  %v1708_v33 = vld [vmem:[%s7715_s19] sm:$0xff] }
 0x3c4   : > { %6244 = vpow2.f32 %v1249_v34  ;;  %v1709_v34 = vld [vmem:[%s7715_s19 + $0x8] sm:$0xff] }
 0x3ce   : > { %v6245_v35 = vpop.eup %6244 }
 0x3cf   : > { %v1257_v36 = vsel %vm930_vm2, %v6245_v35, 0.0 }
 0x3db   : > { %1258 = vadd.xlane.f32.xlu0 %v1257_v36  ;;  %v6154_v36 = vpack.i.bf16 %v1709_v34, %v1708_v33 }
 0x42e   : > { %v1238_v37 = vpop.xlane.xlu0 %1237 }
 0x42f   : > { %v1246_v38 = vsub.f32 %v1077_v23, %v1238_v37  ;;  %v5888_v37 = vpack.c.bf16 %v1709_v34, %v1708_v33 }
 0x431   : > { %v1251_v39 = vmul.f32 1.442695, %v1246_v38 }
 0x432   : > { %v1244_v40 = vpop.xlane.xlu1 %1243 }
 0x433   : > { %6246 = vpow2.f32 %v1251_v39  ;;  %v1241_v41 = vpop.xlane.xlu0 %1240  ;;  %v1248_v42 = vsub.f32 %v1229_v26, %v1244_v40 }
 0x434   : > { %v1247_v43 = vsub.f32 %v1153_v27, %v1241_v41  ;;  %v5229_v27 = vld [vmem:[%s7714_s27] ss:$0 sm:$0xff] }
 0x435   : > { %v1255_v44 = vmul.f32 1.442695, %v1248_v42 }
 0x436   : > { %v1253_v45 = vmul.f32 1.442695, %v1247_v43  ;;  %v1354_v46 = vpop.permute.xlu1 %1353 }
 0x437   : > { %6248 = vpow2.f32 %v1255_v44  ;;  %v1278_v47 = vpop.permute.xlu0 %1277  ;;  %5550 = vmatpush3.msra.mxu1 %v1354_v46 }
 0x438   : > { %6250 = vpow2.f32 %v1253_v45  ;;  %5545 = vmatpush3.msra.mxu0 %v1278_v47  ;;  %5559 = vmatprep.subr.mxu1 %v6617_v1 }
 0x439   : > { %5554 = vmatprep.subr.mxu0 %v6617_v1 }
 0x43d   : > { %v6247_v48 = vpop.eup %6246 }
 0x43e   : > { %v1260_v49 = vsel %vm930_vm2, %v6247_v48, 0.0 }
 0x43f   : > { %1261 = vadd.xlane.f32.xlu1 %v1260_v49  ;;  %v7150_v49 = vld [vmem:[%s823_s4] sm:$0xff] }
 0x441   : > { %v6249_v50 = vpop.eup %6248 }
 0x442   : > { %v6251_v51 = vpop.eup %6250  ;;  %v1266_v52 = vsel %vm930_vm2, %v6249_v50, 0.0 }
 0x443   : > { %v1263_v53 = vsel %vm930_vm2, %v6251_v51, 0.0  ;;  %1267 = vadd.xlane.f32.xlu1 %v1266_v52 }
 0x444   : > { %1264 = vadd.xlane.f32.xlu0 %v1263_v53 }
 0x454   : > { %1429 = vrot.lane.b32.xlu1 %v7046_v16, %s7666_s26 }
 0x45a   : > { %1505 = vrot.lane.b32.xlu0 %v7043_v13, %s7666_s26  ;;  %v839_v13 = vld [vmem:[%s7713_s20 + $0x18] sm:$0xff]  ;;  %s7723_s26 = sld [smem:[#allocation31_spill]] }
 0x45b   : > { %v5885_v14 = vpack.c.bf16 %v839_v13, %v838_v12 }
 0x468   : > { %v1259_v54 = vpop.xlane.xlu0 %1258 }
 0x469   : > { %6252 = vrcp.f32 %v1259_v54 }
 0x473   : > { %v6253_v55 = vpop.eup %6252 }
 0x474   : > { %v1270_v56 = vmul.f32 %v6253_v55, %v6245_v35  ;;  %v1710_v35 = vld [vmem:[%s7715_s19 + $0x10] sm:$0xff] }
 0x476   : > { %5547 = vmatmul.mubr.msk.f32.vlgmr.msra.gmra.mrb[2].mxu0 %vm930_vm2, %v1270_v56 }
 0x477   : > { %5556 = vmatprep.mubr.msk.f32.mxu0 %vm6616_vm0, %v6617_v1 }
 0x4cc   : > { %v1262_v57 = vpop.xlane.xlu1 %1261 }
 0x4cd   : > { %6254 = vrcp.f32 %v1262_v57 }
 0x4d0   : > { %v1268_v58 = vpop.xlane.xlu1 %1267 }
 0x4d1   : > { %v1265_v59 = vpop.xlane.xlu0 %1264  ;;  %6256 = vrcp.f32 %v1268_v58  ;;  %v7155_v58 = vld [vmem:[%s823_s4 + $0x8] sm:$0xf]  ;;  %s7725_s4 = smov 8  }
 0x4d2   : > { %6258 = vrcp.f32 %v1265_v59 }
 0x4d4   : > { %v1430_v60 = vpop.permute.xlu1 %1429 }
 0x4d5   : > { %5555 = vmatpush3.msra.mxu0 %v1430_v60  ;;  %v1506_v63 = vpop.permute.xlu0 %1505  ;;  %v5231_v60 = vld [vmem:[#allocation10] ss:$0 sm:$0xff] }
 0x4d6   : > { %5881 = vmatprep.subr.bf16.mxu0 %v6615_v0 }
 0x4d7   : > { %v6255_v61 = vpop.eup %6254 }
 0x4d8   : > { %v1272_v62 = vmul.f32 %v6255_v61, %v6247_v48 }
 0x4da   : > { %5552 = vmatmul.mubr.msk.f32.vlgmr.msra.gmra.mrb[8].mxu1 %vm930_vm2, %v1272_v62  ;;  %v5232_v62 = vld [vmem:[#allocation12] ss:$0 sm:$0xff] }
 0x4db   : > { %v6257_v2 = vpop.eup %6256  ;;  %5560 = vmatpush3.msra.mxu1 %v1506_v63  ;;  %5561 = vmatprep.mubr.msk.f32.mxu1 %vm6616_vm0, %v6617_v1 }
 0x4dc   : > { %v6259_v3 = vpop.eup %6258  ;;  %v1276_v4 = vmul.f32 %v6257_v2, %v6249_v50  ;;  %5887 = vmatprep.subr.bf16.mxu1 %v6615_v0  ;;  %v5233_v50 = vld [vmem:[#allocation2] ss:$0 sm:$0xff] }
 0x4dd   : > { %v1274_v5 = vmul.f32 %v6259_v3, %v6251_v51 }
 0x4de   : > { %5562 = vmatmul.mubr.msk.f32.vlgmr.msra.gmra.mrb[10].mxu1 %vm930_vm2, %v1276_v4 }
 0x4df   : > { %5557 = vmatmul.mubr.msk.f32.vlgmr.msra.gmra.mrb[4].mxu0 %vm930_vm2, %v1274_v5  ;;  %5583 = vmatprep.mubr.msk.f32.mxu1 %vm6616_vm0, %v6617_v1 }
 0x4e0   : > { %5572 = vmatprep.mubr.msk.f32.mxu0 %vm6616_vm0, %v6617_v1  ;;  %5883 = vmatpush3.bf16.msra.mxu0 %v5882_v9 }
 0x4e1   : > { %5884 = vmatprep.subr.bf16.mxu0 %v6615_v0  ;;  %5889 = vmatpush3.bf16.msra.mxu1 %v5888_v37 }
 0x4e2   : > { %5890 = vmatprep.subr.bf16.mxu1 %v6615_v0 }
 0x4e4   : > { %5886 = vmatpush3.bf16.msra.mxu0 %v5885_v14 }
 0x549   : > { %v1349_v10 = vpop.f32.mrb[2].mxu0 }
 0x54a   : > { %v5548_v11 = vpop.f32.mrb[3].mxu0 }
 0x5ad   : > { %v1425_v15 = vpop.f32.mrb[8].mxu1 }
 0x5ae   : > { %1582 = vrot.lane.b32.xlu1 %v1425_v15, %s7672_s5  ;;  %v5553_v16 = vpop.f32.mrb[9].mxu1 }
 0x5b1   : > { %v1577_v17 = vpop.f32.mrb[10].mxu1 }
 0x5b2   : > { %v1501_v18 = vpop.f32.mrb[4].mxu0  ;;  %1590 = vrot.lane.b32.xlu1 %v1577_v17, %s7668_s0  ;;  %v5563_v19 = vpop.f32.mrb[11].mxu1 }
 0x5b3   : > { %1586 = vrot.lane.b32.xlu0 %v1501_v18, %s7670_s22  ;;  %v5558_v20 = vpop.f32.mrb[5].mxu0 }
 0x620   : > { %v1583_v21 = vpop.permute.xlu1 %1582 }
 0x621   : > { %v1593_v23 = vsel %vm930_vm2, %v1349_v10, %v1583_v21 }
 0x624   : > { %v1591_v22 = vpop.permute.xlu1 %1590 }
 0x625   : > { %v1587_v24 = vpop.permute.xlu0 %1586 }
 0x626   : > { %v1595_v25 = vsel %vm1594_vm3, %v1593_v23, %v1587_v24 }
 0x627   : > { %v1597_v26 = vsel %vm1596_vm4, %v1595_v25, %v1591_v22 }
 0x628   : > { %5573 = vmatmul.mubr.msk.f32.vlgmr.msra.gmra.mrb[6].mxu0 %vm847_vm1, %v1597_v26 }
 0x629   : > { %5594 = vmatprep.mubr.msk.f32.mxu0 %vm847_vm1, %v7150_v49 }
 0x6fb   : > { %v1673_v28 = vpop.f32.mrb[6].mxu0 }
 0x6fc   : > { %v1674_v29 = vadd.f32 %v5229_v27, %v1673_v28  ;;  %v5574_v30 = vpop.f32.mrb[7].mxu0 }
 0x6fe   : > { %v1677_v31 = vadd.f32 %v1674_v29, %v7029_v8  ;;  %v1711_v8 = vld [vmem:[%s7715_s19 + $0x18] sm:$0xff] }
 0x6ff   : > { %v6159_v38 = vpack.i.bf16 %v1711_v8, %v1710_v35  ;;  %v5891_v39 = vpack.c.bf16 %v1711_v8, %v1710_v35 }
 0x700   : > { %v1680_v32 = vsel %vm847_vm1, %v1677_v31, 0.0 }
 0x701   : > { %1681 = vadd.xlane.f32.xlu0 %v1680_v32  ;;  %5892 = vmatpush3.bf16.msra.mxu1 %v5891_v39 }
 0x702   : > { %5901 = vmatprep.subr.bf16.mxu1 %v6615_v0 }
 0x717   : > { %6155 = vrot.lane.b32.xlu0 %v6154_v36, %s6620_s3 }
 0x71b   : > { %1813 = vrot.lane.b32.xlu0 %v5233_v50, %s6620_s3 }
 0x78e   : > { %v1682_v40 = vpop.xlane.xlu0 %1681 }
 0x78f   : > { %v1684_v41 = vmul.f32 0.03125, %v1682_v40 }
 0x791   : > { %v1685_v42 = vsub.f32 %v1677_v31, %v1684_v41 }
 0x792   : > { %v6156_v43 = vpop.permute.xlu0 %6155 }
 0x793   : > { %v1686_v44 = vmul.f32 %v1685_v42, %v1685_v42  ;;  %v6158_v45 = vunpack.i.h.bf16 %v6156_v43  ;;  %v6157_v46 = vunpack.i.l.bf16 %v6156_v43 }
 0x795   : > { %v1687_v47 = vsel %vm847_vm1, %v1686_v44, 0.0  ;;  %v5893_v48 = vpack.c.bf16 %v6158_v45, %v6157_v46 }
 0x796   : > { %1688 = vadd.xlane.f32.xlu1 %v1687_v47  ;;  %v1814_v3 = vpop.permute.xlu0 %1813 }
 0x797   : > { %5894 = vmatprep.subr.bf16.mxu0 %v5893_v48 }
 0x798   : > { %5896 = vmatpush3.bf16.msra.mxu0 %v5893_v48 }
 0x7a7   : > { %6160 = vrot.lane.b32.xlu1 %v6159_v38, %s6620_s3 }
 0x823   : > { %v1689_v51 = vpop.xlane.xlu1 %1688 }
 0x824   : > { %v1690_v52 = vmul.f32 0.03125, %v1689_v51 }
 0x826   : > { %v1691_v53 = vadd.f32 1e-05, %v1690_v52 }
 0x827   : > { %v6161_v54 = vpop.permute.xlu1 %6160 }
 0x828   : > { %6260 = vrsqrt.f32 %v1691_v53  ;;  %v6163_v55 = vunpack.i.h.bf16 %v6161_v54  ;;  %v6162_v56 = vunpack.i.l.bf16 %v6161_v54 }
 0x82a   : > { %v5897_v57 = vpack.c.bf16 %v6163_v55, %v6162_v56 }
 0x82c   : > { %5898 = vmatprep.subr.bf16.mxu0 %v5897_v57 }
 0x82d   : > { %5900 = vmatpush3.bf16.msra.mxu0 %v5897_v57 }
 0x82e   : > { %5905 = vmatprep.subr.bf16.mxu0 %v6615_v0 }
 0x830   : > { %5595 = vmatmul.mubr.msk.f32.vlgmr.msra.gmra.mrb[8].mxu0 %vm847_vm1, %v7155_v58 }
 0x831   : > { %5608 = vmatprep.mubr.msk.f32.mxu0 %vm6616_vm0, %v6617_v1 }
 0x832   : > { %v6261_v59 = vpop.eup %6260 }
 0x833   : > { %v1693_v61 = vmul.f32 %v6261_v59, %v1685_v42  ;;  %v5299_v59 = vld [vmem:[%s7636_s8 + $0x20] sm:$0xff] }
 0x835   : > { %v1700_v63 = vmul.f32 %v5231_v60, %v1693_v61 }
 0x837   : > { %v7162_v2 = vadd.f32 %v5232_v62, %v1700_v63 }
 0x839   : > { %5584 = vmatmul.mubr.msk.f32.vlgmr.msra.gmra.mrb[12].mxu1 %vm847_vm1, %v7162_v2 }
 0x83a   : > { %5601 = vmatprep.mubr.msk.f32.mxu1 %vm6616_vm0, %v6617_v1 }
 0x903   : > { %v5596_v4 = vpop.f32.mrb[8].mxu0 }
 0x904   : > { %v1894_v5 = vadd.f32 %v5596_v4, %v1814_v3  ;;  %v1888_v6 = vpop.f32.mrb[9].mxu0 }
 0x905   : > { %v1889_v7 = vadd.f32 %v1888_v6, %v1814_v3 }
 0x907   : > { %v6169_v9 = vpack.i.bf16 %v1894_v5, %v1889_v7  ;;  %v5902_v10 = vpack.c.bf16 %v1894_v5, %v1889_v7 }
 0x909   : > { %6170 = vrot.lane.b32.xlu0 %v6169_v9, %s7678_s29  ;;  %6165 = vrot.lane.b32.xlu1 %v6169_v9, %s7676_s6 }
 0x90a   : > { %5904 = vmatpush3.bf16.xpose.msk.msra.mxu1 %vm7170_vm5, %v5902_v10 }
 0x90b   : > { %5909 = vmatprep.subr.bf16.mxu1 %v6615_v0 }
 0x90c   : > { %v1793_v12 = vpop.f32.mrb[12].mxu1 }
 0x90d   : > { %v1794_v13 = vadd.f32 %v5233_v50, %v1793_v12  ;;  %6175 = vrot.lane.b32.xlu1 %v6169_v9, %s7674_s18  ;;  %v5585_v14 = vpop.f32.mrb[13].mxu1 }
 0x90f   : > { %1898 = vrot.lane.b32.xlu0 %v1794_v13, %s7676_s6 }
 0x911   : > { %5602 = vmatmul.mubr.msk.f32.vlgmr.msra.gmra.mrb[14].mxu1 %vm930_vm2, %v1794_v13  ;;  %1900 = vrot.lane.b32.xlu1 %v1794_v13, %s7678_s29 }
 0x912   : > { %5615 = vmatprep.mubr.msk.f32.mxu1 %vm6616_vm0, %v6617_v1 }
 0x913   : > { %1902 = vrot.lane.b32.xlu0 %v1794_v13, %s7674_s18 }
 0x97b   : > { %v7186_v15 = vpop.permute.xlu0 %6170  ;;  %v6166_v16 = vpop.permute.xlu1 %6165 }
 0x97c   : > { %v6173_v17 = vunpack.i.h.bf16 %v7186_v15  ;;  %v6172_v18 = vunpack.i.l.bf16 %v7186_v15  ;;  %v6168_v19 = vunpack.i.h.bf16 %v6166_v16  ;;  %v6167_v20 = vunpack.i.l.bf16 %v6166_v16 }
 0x97e   : > { %v5910_v21 = vpack.c.bf16 %v6173_v17, %v6172_v18  ;;  %v5906_v22 = vpack.c.bf16 %v6168_v19, %v6167_v20 }
 0x97f   : > { %v7190_v23 = vpop.permute.xlu1 %6175 }
 0x980   : > { %v6178_v24 = vunpack.i.h.bf16 %v7190_v23  ;;  %v6177_v25 = vunpack.i.l.bf16 %v7190_v23  ;;  %5908 = vmatpush3.bf16.xpose.msk.msra.mxu0 %vm7170_vm5, %v5906_v22  ;;  %5912 = vmatpush3.bf16.xpose.msk.msra.mxu1 %vm7170_vm5, %v5910_v21 }
 0x981   : > { %5913 = vmatprep.subr.bf16.mxu0 %v6615_v0  ;;  %5917 = vmatprep.subr.bf16.mxu1 %v6615_v0  ;;  %v1899_v27 = vpop.permute.xlu0 %1898 }
 0x982   : > { %v5914_v26 = vpack.c.bf16 %v6178_v24, %v6177_v25 }
 0x983   : > { %v1901_v28 = vpop.permute.xlu1 %1900 }
 0x985   : > { %v1903_v29 = vpop.permute.xlu0 %1902 }
 0x987   : > { %5609 = vmatmul.mubr.msk.f32.vlgmr.msra.gmra.mrb[10].mxu0 %vm930_vm2, %v1899_v27  ;;  %5616 = vmatmul.mubr.msk.f32.vlgmr.msra.gmra.mrb[16].mxu1 %vm930_vm2, %v1901_v28 }
 0x988   : > { %5916 = vmatpush3.bf16.xpose.msk.msra.mxu0 %vm7170_vm5, %v5914_v26  ;;  %5622 = vmatprep.mubr.msk.f32.mxu0 %vm6616_vm0, %v6617_v1 }
 0x989   : > { %5629 = vmatprep.mubr.msk.f32.mxu1 %vm6616_vm0, %v6617_v1  ;;  %5925 = vmatprep.subr.bf16.mxu0 %v6615_v0 }
 0x98f   : > { %5623 = vmatmul.mubr.msk.f32.vlgmr.msra.gmra.mrb[12].mxu0 %vm930_vm2, %v1903_v29 }
 0x990   : > { %5643 = vmatprep.mubr.msk.f32.mxu0 %vm6616_vm0, %v6617_v1 }
 0x9e4   : > { %v1990_v30 = vpop.f32.mrb[14].mxu1 }
 0x9e5   : > { %v5603_v31 = vpop.f32.mrb[15].mxu1  ;;  %v2223_v32 = vsel %vm2222_vm6, %v1990_v30, -inf }
 0x9e6   : > { %2224 = vmax.xlane.f32.xlu1 %v2223_v32 }
 0xa5a   : > { %v2066_v33 = vpop.f32.mrb[10].mxu0  ;;  %v2142_v34 = vpop.f32.mrb[16].mxu1 }
 0xa5b   : > { %v5610_v35 = vpop.f32.mrb[11].mxu0  ;;  %v5617_v36 = vpop.f32.mrb[17].mxu1  ;;  %v2226_v37 = vsel %vm2222_vm6, %v2066_v33, -inf  ;;  %v2229_v8 = vsel %vm2222_vm6, %v2142_v34, -inf }
 0xa5c   : > { %2227 = vmax.xlane.f32.xlu0 %v2226_v37  ;;  %v1713_v35 = vld [vmem:[%s7636_s8] sm:$0xff]  ;;  %v1714_v36 = vld [vmem:[%s7636_s8 + $0x8] sm:$0xff] }
 0xa5d   : > { %v5934_v37 = vpack.c.bf16 %v1714_v36, %v1713_v35 }
 0xa60   : > { %2230 = vmax.xlane.f32.xlu0 %v2229_v8  ;;  %v1715_v8 = vld [vmem:[%s7636_s8 + $0x10] sm:$0xff] }
 0xa62   : > { %v2218_v38 = vpop.f32.mrb[12].mxu0 }
 0xa63   : > { %v5624_v39 = vpop.f32.mrb[13].mxu0  ;;  %v2232_v40 = vsel %vm2222_vm6, %v2218_v38, -inf }
 0xa64   : > { %2233 = vmax.xlane.f32.xlu1 %v2232_v40 }
 0xa73   : > { %v2225_v41 = vpop.xlane.xlu1 %2224 }
 0xa74   : > { %v2235_v42 = vsub.f32 %v1990_v30, %v2225_v41 }
 0xa75   : > { %6185 = vrot.lane.b32.xlu1 %v6166_v16, %s6620_s3 }
 0xa76   : > { %6180 = vrot.lane.b32.xlu0 %v6169_v9, %s6620_s3  ;;  %v2239_v43 = vmul.f32 1.442695, %v2235_v42 }
 0xa78   : > { %6262 = vpow2.f32 %v2239_v43 }
 0xa82   : > { %v6263_v44 = vpop.eup %6262 }
 0xa83   : > { %v2247_v45 = vsel %vm2222_vm6, %v6263_v44, 0.0 }
 0xa95   : > { %2248 = vadd.xlane.f32.xlu0 %v2247_v45 }
 0xae9   : > { %v2228_v46 = vpop.xlane.xlu0 %2227 }
 0xaea   : > { %v2236_v47 = vsub.f32 %v2066_v33, %v2228_v46 }
 0xaec   : > { %v2241_v48 = vmul.f32 1.442695, %v2236_v47 }
 0xaed   : > { %v2231_v50 = vpop.xlane.xlu0 %2230 }
 0xaee   : > { %6264 = vpow2.f32 %v2241_v48  ;;  %v2237_v51 = vsub.f32 %v2142_v34, %v2231_v50 }
 0xaf0   : > { %v2243_v52 = vmul.f32 1.442695, %v2237_v51 }
 0xaf1   : > { %v2234_v53 = vpop.xlane.xlu1 %2233  ;;  %v6181_v54 = vpop.permute.xlu0 %6180 }
 0xaf2   : > { %6266 = vpow2.f32 %v2243_v52  ;;  %v2238_v55 = vsub.f32 %v2218_v38, %v2234_v53  ;;  %v6183_v56 = vunpack.i.h.bf16 %v6181_v54  ;;  %v6182_v57 = vunpack.i.l.bf16 %v6181_v54  ;;  %v1716_v38 = vld [vmem:[%s7636_s8 + $0x18] sm:$0xff]  ;;  %v5257_v53 = vld [vmem:[#allocation4] ss:$0 sm:$0xff] }
 0xaf3   : > { %v5937_v39 = vpack.c.bf16 %v1716_v38, %v1715_v8  ;;  %v5263_v8 = vld [vmem:[#allocation9] ss:$0 sm:$0xff] }
 0xaf4   : > { %v2245_v60 = vmul.f32 1.442695, %v2238_v55  ;;  %v5918_v61 = vpack.c.bf16 %v6183_v56, %v6182_v57 }
 0xaf5   : > { %v6186_v9 = vpop.permute.xlu1 %6185 }
 0xaf6   : > { %6268 = vpow2.f32 %v2245_v60  ;;  %5920 = vmatpush3.bf16.msk.msra.mxu1 %vm7219_vm9, %v5918_v61  ;;  %v6188_v10 = vunpack.i.h.bf16 %v6186_v9  ;;  %v6187_v12 = vunpack.i.l.bf16 %v6186_v9  ;;  %v2714_v9 = vld [vmem:[#allocation6 + $0x10] sm:$0xff] }
 0xaf7   : > { %5921 = vmatprep.subr.bf16.mxu1 %v6615_v0 }
 0xaf8   : > { %v6265_v62 = vpop.eup %6264  ;;  %v5922_v16 = vpack.c.bf16 %v6188_v10, %v6187_v12  ;;  %v2715_v10 = vld [vmem:[#allocation6 + $0x18] sm:$0xff] }
 0xaf9   : > { %v2250_v63 = vsel %vm2222_vm6, %v6265_v62, 0.0  ;;  %v5943_v12 = vpack.c.bf16 %v2715_v10, %v2714_v9 }
 0xafa   : > { %2251 = vadd.xlane.f32.xlu1 %v2250_v63 }
 0xafc   : > { %v6267_v3 = vpop.eup %6266 }
 0xafd   : > { %v2253_v4 = vsel %vm2222_vm6, %v6267_v3, 0.0 }
 0xafe   : > { %2254 = vadd.xlane.f32.xlu0 %v2253_v4 }
 0xb00   : > { %v6269_v5 = vpop.eup %6268 }
 0xb01   : > { %v2256_v6 = vsel %vm2222_vm6, %v6269_v5, 0.0 }
 0xb02   : > { %2257 = vadd.xlane.f32.xlu1 %v2256_v6  ;;  %v2713_v6 = vld [vmem:[#allocation6 + $0x8] sm:$0xff] }
 0xb13   : > { %6190 = vrot.lane.b32.xlu1 %v7186_v15, %s6620_s3 }
 0xb14   : > { %6195 = vrot.lane.b32.xlu0 %v7190_v23, %s6620_s3 }
 0xb22   : > { %v2249_v7 = vpop.xlane.xlu0 %2248 }
 0xb23   : > { %6270 = vrcp.f32 %v2249_v7 }
 0xb2d   : > { %v6271_v13 = vpop.eup %6270 }
 0xb2e   : > { %v2260_v14 = vmul.f32 %v6271_v13, %v6263_v44  ;;  %v2798_v13 = vld [vmem:[%s7640_s12 + $0x8] sm:$0xff] }
 0xb30   : > { %5630 = vmatmul.mubr.msk.f32.vlgmr.msra.gmra.mrb[18].mxu1 %vm2222_vm6, %v2260_v14  ;;  %v2799_v14 = vld [vmem:[%s7640_s12 + $0x10] sm:$0xff] }
 0xb31   : > { %5924 = vmatpush3.bf16.msk.msra.mxu1 %vm7219_vm9, %v5922_v16  ;;  %5636 = vmatprep.mubr.msk.f32.mxu1 %vm6616_vm0, %v6617_v1 }
 0xb32   : > { %5929 = vmatprep.subr.bf16.mxu1 %v6615_v0 }
 0xb87   : > { %v2252_v15 = vpop.xlane.xlu1 %2251 }
 0xb88   : > { %6272 = vrcp.f32 %v2252_v15  ;;  %v2800_v15 = vld [vmem:[%s7640_s12 + $0x18] sm:$0xff] }
 0xb8b   : > { %v2255_v17 = vpop.xlane.xlu0 %2254 }
 0xb8c   : > { %6274 = vrcp.f32 %v2255_v17  ;;  %v5949_v17 = vpack.c.bf16 %v2800_v15, %v2799_v14 }
 0xb8f   : > { %v2258_v18 = vpop.xlane.xlu1 %2257  ;;  %v6196_v19 = vpop.permute.xlu0 %6195 }
 0xb90   : > { %6276 = vrcp.f32 %v2258_v18  ;;  %v6198_v20 = vunpack.i.h.bf16 %v6196_v19  ;;  %v6197_v21 = vunpack.i.l.bf16 %v6196_v19  ;;  %v2801_v18 = vld [vmem:[%s7640_s12 + $0x20] sm:$0xff]  ;;  %v2802_v19 = vld [vmem:[%s7640_s12 + $0x28] sm:$0xff] }
 0xb92   : > { %v6273_v22 = vpop.eup %6272  ;;  %v5930_v23 = vpack.c.bf16 %v6198_v20, %v6197_v21  ;;  %v5952_v20 = vpack.c.bf16 %v2802_v19, %v2801_v18 }
 0xb93   : > { %v2262_v24 = vmul.f32 %v6273_v22, %v6265_v62  ;;  %v6191_v25 = vpop.permute.xlu1 %6190 }
 0xb94   : > { %v6193_v26 = vunpack.i.h.bf16 %v6191_v25  ;;  %v6192_v27 = vunpack.i.l.bf16 %v6191_v25  ;;  %v5259_v25 = vld [vmem:[%s7644_s16] ss:$0 sm:$0xff] }
 0xb95   : > { %5637 = vmatmul.mubr.msk.f32.vlgmr.msra.gmra.mrb[20].mxu1 %vm2222_vm6, %v2262_v24 }
 0xb96   : > { %v6275_v28 = vpop.eup %6274  ;;  %v5926_v29 = vpack.c.bf16 %v6193_v26, %v6192_v27  ;;  %5932 = vmatpush3.bf16.msk.msra.mxu1 %vm7219_vm9, %v5930_v23  ;;  %5650 = vmatprep.mubr.msk.f32.mxu1 %vm6616_vm0, %v6617_v1  ;;  %v5260_v27 = vld [vmem:[#allocation13] ss:$0 sm:$0xff] }
 0xb97   : > { %5939 = vmatprep.subr.bf16.mxu1 %v6615_v0  ;;  %v2264_v30 = vmul.f32 %v6275_v28, %v6267_v3 }
 0xb98   : > { %5928 = vmatpush3.bf16.msk.msra.mxu0 %vm7219_vm9, %v5926_v29 }
 0xb99   : > { %5933 = vmatprep.subr.bf16.mxu0 %v6615_v0 }
 0xb9a   : > { %v6277_v31 = vpop.eup %6276 }
 0xb9b   : > { %v2266_v32 = vmul.f32 %v6277_v31, %v6269_v5  ;;  %5644 = vmatmul.mubr.msk.f32.vlgmr.msra.gmra.mrb[14].mxu0 %vm2222_vm6, %v2264_v30  ;;  %v2712_v5 = vld [vmem:[#allocation6] sm:$0xff] }
 0xb9c   : > { %5661 = vmatprep.mubr.msk.f32.mxu0 %vm6616_vm0, %v6617_v1  ;;  %5935 = vmatpush3.bf16.msra.mxu0 %v5934_v37  ;;  %v5940_v7 = vpack.c.bf16 %v2713_v6, %v2712_v5  ;;  %v2803_v30 = vld [vmem:[%s7640_s12 + $0x30] sm:$0xff]  ;;  %v2804_v31 = vld [vmem:[%s7640_s12 + $0x38] sm:$0xff]  ;;  %v5277_v5 = vld [vmem:[%s7712_s2 + $0x1] ss:$0 sm:$0xff] }
 0xb9d   : > { %5651 = vmatmul.mubr.msk.f32.vlgmr.msra.gmra.mrb[22].mxu1 %vm2222_vm6, %v2266_v32  ;;  %5936 = vmatprep.subr.bf16.mxu0 %v6615_v0  ;;  %v5955_v32 = vpack.c.bf16 %v2804_v31, %v2803_v30 }
 0xb9e   : > { %5672 = vmatprep.mubr.msk.f32.mxu1 %vm6616_vm0, %v6617_v1  ;;  %5941 = vmatpush3.bf16.msra.mxu1 %v5940_v7 }
 0xb9f   : > { %5942 = vmatprep.subr.bf16.mxu1 %v6615_v0 }
 0xba0   : > { %5938 = vmatpush3.bf16.msra.mxu0 %v5937_v39 }
 0xba1   : > { %5945 = vmatprep.subr.bf16.mxu0 %v6615_v0 }
 0xba2   : > { %5944 = vmatpush3.bf16.msra.mxu1 %v5943_v12 }
 0xba3   : > { %5957 = vmatprep.subr.bf16.mxu1 %v6615_v0 }
 0xc03   : > { %v2344_v33 = vpop.f32.mrb[18].mxu1 }
 0xc04   : > { %v5631_v34 = vpop.f32.mrb[19].mxu1 }
 0xc68   : > { %v2424_v40 = vpop.f32.mrb[20].mxu1 }
 0xc69   : > { %2589 = vrot.lane.b32.xlu1 %v2424_v40, %s7672_s5  ;;  %v5638_v41 = vpop.f32.mrb[21].mxu1 }
 0xc6e   : > { %v2504_v42 = vpop.f32.mrb[14].mxu0 }
 0xc6f   : > { %2593 = vrot.lane.b32.xlu0 %v2504_v42, %s7670_s22  ;;  %v5645_v43 = vpop.f32.mrb[15].mxu0  ;;  %s7729_s22 = smov 104  }
 0xc70   : > { %v2584_v44 = vpop.f32.mrb[22].mxu1 }
 0xc71   : > { %2597 = vrot.lane.b32.xlu1 %v2584_v44, %s7721_s30  ;;  %v5652_v45 = vpop.f32.mrb[23].mxu1 }
 0xcdb   : > { %v2590_v46 = vpop.permute.xlu1 %2589 }
 0xcdc   : > { %v2600_v47 = vsel %vm930_vm2, %v2344_v33, %v2590_v46  ;;  %v5261_v33 = vld [vmem:[#allocation7] ss:$0 sm:$0xff] }
 0xce1   : > { %v2594_v48 = vpop.permute.xlu0 %2593 }
 0xce2   : > { %v2601_v50 = vsel %vm1594_vm3, %v2600_v47, %v2594_v48  ;;  %v5267_v48 = vld [vmem:[%s7710_s1 + $0x20] sm:$0xff] }
 0xce3   : > { %v2598_v51 = vpop.permute.xlu1 %2597 }
 0xce4   : > { %v2602_v52 = vsel %vm1596_vm4, %v2601_v50, %v2598_v51  ;;  %v5268_v50 = vld [vmem:[%s7710_s1 + $0x28] sm:$0xff] }
 0xce5   : > { %5662 = vmatmul.mubr.msk.f32.vlgmr.msra.gmra.mrb[16].mxu0 %vm847_vm1, %v2602_v52  ;;  %v5958_v51 = vpack.c.bf16 %v5268_v50, %v5267_v48  ;;  %v5269_v52 = vld [vmem:[%s7710_s1 + $0x30] sm:$0xff] }
 0xce6   : > { %5691 = vmatprep.mubr.msk.f32.mxu0 %vm6616_vm0, %v6617_v1 }
 0xdb8   : > { %v2678_v54 = vpop.f32.mrb[16].mxu0 }
 0xdb9   : > { %v2679_v55 = vadd.f32 %v5257_v53, %v2678_v54  ;;  %v5663_v56 = vpop.f32.mrb[17].mxu0  ;;  %v5270_v53 = vld [vmem:[%s7710_s1 + $0x38] sm:$0xff] }
 0xdba   : > { %v5961_v54 = vpack.c.bf16 %v5270_v53, %v5269_v52 }
 0xdbb   : > { %v2682_v57 = vadd.f32 %v2679_v55, %v7162_v2  ;;  %v2797_v2 = vld [vmem:[%s7640_s12] sm:$0xff] }
 0xdbc   : > { %v5946_v16 = vpack.c.bf16 %v2798_v13, %v2797_v2 }
 0xdbd   : > { %v2685_v60 = vsel %vm847_vm1, %v2682_v57, 0.0 }
 0xdbe   : > { %2686 = vadd.xlane.f32.xlu0 %v2685_v60  ;;  %5947 = vmatpush3.bf16.msra.mxu0 %v5946_v16 }
 0xdbf   : > { %5948 = vmatprep.subr.bf16.mxu0 %v6615_v0 }
 0xdc2   : > { %5950 = vmatpush3.bf16.msra.mxu0 %v5949_v17 }
 0xdc3   : > { %5951 = vmatprep.subr.bf16.mxu0 %v6615_v0 }
 0xdc6   : > { %5953 = vmatpush3.bf16.msra.mxu0 %v5952_v20 }
 0xdc7   : > { %5954 = vmatprep.subr.bf16.mxu0 %v6615_v0 }
 0xdca   : > { %5956 = vmatpush3.bf16.msra.mxu0 %v5955_v32 }
 0xdcb   : > { %5715 = vmatprep.subr.mxu0 %v6617_v1 }
 0xe4b   : > { %v2687_v61 = vpop.xlane.xlu0 %2686 }
 0xe4c   : > { %v2688_v62 = vmul.f32 0.03125, %v2687_v61  ;;  %v5265_v61 = vld [vmem:[%s7722_s7] ss:$0 sm:$0xff] }
 0xe4e   : > { %v2689_v63 = vsub.f32 %v2682_v57, %v2688_v62 }
 0xe50   : > { %v2690_v3 = vmul.f32 %v2689_v63, %v2689_v63 }
 0xe52   : > { %v2691_v4 = vsel %vm847_vm1, %v2690_v3, 0.0 }
 0xe53   : > { %2692 = vadd.xlane.f32.xlu1 %v2691_v4 }
 0xee0   : > { %v2693_v21 = vpop.xlane.xlu1 %2692 }
 0xee1   : > { %v2694_v22 = vmul.f32 0.03125, %v2693_v21 }
 0xee3   : > { %v2695_v23 = vadd.f32 1e-05, %v2694_v22 }
 0xee5   : > { %6278 = vrsqrt.f32 %v2695_v23 }
 0xeef   : > { %v6279_v24 = vpop.eup %6278 }
 0xef0   : > { %v2697_v26 = vmul.f32 %v6279_v24, %v2689_v63  ;;  %v5266_v63 = vld [vmem:[%s7723_s26] ss:$0 sm:$0xff] }
 0xef2   : > { %v2704_v28 = vmul.f32 %v5259_v25, %v2697_v26 }
 0xef4   : > { %v2711_v29 = vadd.f32 %v5260_v27, %v2704_v28 }
 0xef6   : > { %5673 = vmatmul.mubr.msk.f32.vlgmr.msra.gmra.mrb[24].mxu1 %vm847_vm1, %v2711_v29 }
 0xef7   : > { %5702 = vmatprep.mubr.msk.f32.mxu1 %vm6616_vm0, %v6617_v1  ;;  %5959 = vmatpush3.bf16.msra.mxu1 %v5958_v51 }
 0xef8   : > { %5960 = vmatprep.subr.bf16.mxu1 %v6615_v0 }
 0xefb   : > { %5962 = vmatpush3.bf16.msra.mxu1 %v5961_v54 }
 0xefc   : > { %5705 = vmatprep.subr.mxu1 %v6617_v1 }
 0xfc9   : > { %v2792_v34 = vpop.f32.mrb[24].mxu1 }
 0xfca   : > { %v2793_v35 = vadd.f32 %v5261_v33, %v2792_v34  ;;  %v5674_v36 = vpop.f32.mrb[25].mxu1 }
 0xfcc   : > { %v2796_v37 = vmax.f32 %v2793_v35, 0.0 }
 0xfce   : > { %5692 = vmatmul.mubr.msk.f32.vlgmr.msra.gmra.mrb[18].mxu0 %vm2812_vm10, %v2796_v37 }
 0xfcf   : > { %5717 = vmatprep.mubr.msk.f32.mxu0 %vm6616_vm0, %v6617_v1 }
0x10a1   : > { %v2882_v38 = vpop.f32.mrb[18].mxu0 }
0x10a2   : > { %v2883_v39 = vadd.f32 %v5263_v8, %v2882_v38  ;;  %v5693_v40 = vpop.f32.mrb[19].mxu0 }
0x10a4   : > { %v2886_v41 = vadd.f32 %v2883_v39, %v2711_v29 }
0x10a6   : > { %v2889_v42 = vsel %vm847_vm1, %v2886_v41, 0.0 }
0x10a7   : > { %2890 = vadd.xlane.f32.xlu0 %v2889_v42 }
0x1134   : > { %v2891_v43 = vpop.xlane.xlu0 %2890 }
0x1135   : > { %v2892_v44 = vmul.f32 0.03125, %v2891_v43 }
0x1137   : > { %v2893_v45 = vsub.f32 %v2886_v41, %v2892_v44 }
0x1139   : > { %v2894_v46 = vmul.f32 %v2893_v45, %v2893_v45 }
0x113b   : > { %v2895_v47 = vsel %vm847_vm1, %v2894_v46, 0.0 }
0x113c   : > { %2896 = vadd.xlane.f32.xlu0 %v2895_v47 }
0x11c9   : > { %v2897_v55 = vpop.xlane.xlu0 %2896 }
0x11ca   : > { %v2898_v56 = vmul.f32 0.03125, %v2897_v55 }
0x11cc   : > { %v2899_v57 = vadd.f32 1e-05, %v2898_v56 }
0x11ce   : > { %6280 = vrsqrt.f32 %v2899_v57 }
0x11d8   : > { %v6281_v60 = vpop.eup %6280 }
0x11d9   : > { %v2901_v62 = vmul.f32 %v6281_v60, %v2893_v45 }
0x11db   : > { %v2908_v3 = vmul.f32 %v5265_v61, %v2901_v62 }
0x11dd   : > { %v7341_v4 = vadd.f32 %v5266_v63, %v2908_v3 }
0x11df   : > { %5703 = vmatmul.mubr.msk.f32.vlgmr.msra.gmra.mrb[26].mxu1 %vm847_vm1, %v7341_v4 }
0x11e0   : > { %5707 = vmatprep.mubr.msk.f32.mxu1 %vm6616_vm0, %v6617_v1 }
0x12b2   : > { %v3005_v6 = vpop.f32.mrb[26].mxu1 }
0x12b3   : > { %v3006_v7 = vadd.f32 %v5277_v5, %v3005_v6  ;;  %v5704_v9 = vpop.f32.mrb[27].mxu1 }
0x12b4   : > { %v5273_v9 = vld [vmem:[%s7713_s20 + $0x28] sm:$0xff] }
0x12b5   : > { %3012 = vrot.lane.b32.xlu0 %v3006_v7, %s7678_s29  ;;  %3010 = vrot.lane.b32.xlu1 %v3006_v7, %s7676_s6  ;;  %s7727_s6 = smov 112   ;;  %s7728_s29 = smov 120  }
0x12b9   : > { %3014 = vrot.lane.b32.xlu1 %v3006_v7, %s7674_s18 }
0x12bd   : > { %3016 = vrot.lane.b32.xlu1 %v3006_v7, %s6620_s3 }
0x1327   : > { %v7354_v10 = vpop.permute.xlu0 %3012  ;;  %v3011_v12 = vpop.permute.xlu1 %3010 }
0x1328   : > { %3168 = vrot.lane.b32.xlu1 %v7354_v10, %s6620_s3  ;;  %3092 = vrot.lane.b32.xlu0 %v3011_v12, %s6620_s3 }
0x132b   : > { %v7359_v2 = vpop.permute.xlu1 %3014 }
0x132c   : > { %3244 = vrot.lane.b32.xlu0 %v7359_v2, %s6620_s3 }
0x132f   : > { %v3017_v13 = vpop.permute.xlu1 %3016 }
0x1330   : > { %5706 = vmatpush3.xpose.msk.msra.mxu1 %vm930_vm2, %v3017_v13  ;;  %v5274_v13 = vld [vmem:[%s7713_s20 + $0x30] sm:$0xff] }
0x1331   : > { %5710 = vmatprep.subr.mxu1 %v6617_v1 }
0x1333   : > { %5708 = vmatmul.mubr.msk.f32.vlgmr.msra.gmra.mrb[28].mxu1 %vm930_vm2, %v3006_v7 }
0x1334   : > { %5712 = vmatprep.mubr.msk.f32.mxu1 %vm6616_vm0, %v6617_v1 }
0x139a   : > { %v3093_v14 = vpop.permute.xlu0 %3092  ;;  %v3169_v16 = vpop.permute.xlu1 %3168 }
0x139b   : > { %5711 = vmatpush3.xpose.msk.msra.mxu1 %vm930_vm2, %v3093_v14  ;;  %5716 = vmatpush3.xpose.msk.msra.mxu0 %vm930_vm2, %v3169_v16  ;;  %v5275_v14 = vld [vmem:[%s7713_s20 + $0x38] sm:$0xff] }
0x139c   : > { %5720 = vmatprep.subr.mxu1 %v6617_v1  ;;  %5725 = vmatprep.subr.mxu0 %v6617_v1  ;;  %v5967_v16 = vpack.c.bf16 %v5275_v14, %v5274_v13 }
0x139e   : > { %v3245_v15 = vpop.permute.xlu0 %3244  ;;  %5713 = vmatmul.mubr.msk.f32.vlgmr.msra.gmra.mrb[30].mxu1 %vm930_vm2, %v3011_v12  ;;  %5718 = vmatmul.mubr.msk.f32.vlgmr.msra.gmra.mrb[20].mxu0 %vm930_vm2, %v7354_v10 }
0x139f   : > { %5721 = vmatpush3.xpose.msk.msra.mxu1 %vm930_vm2, %v3245_v15  ;;  %5722 = vmatprep.mubr.msk.f32.mxu1 %vm6616_vm0, %v6617_v1 }
0x13a0   : > { %5730 = vmatprep.subr.mxu1 %v6617_v1  ;;  %5727 = vmatprep.mubr.msk.f32.mxu0 %vm6616_vm0, %v6617_v1 }
0x13a2   : > { %5723 = vmatmul.mubr.msk.f32.vlgmr.msra.gmra.mrb[32].mxu1 %vm930_vm2, %v7359_v2 }
0x13a3   : > { %5732 = vmatprep.mubr.msk.f32.mxu1 %vm6616_vm0, %v6617_v1 }
0x1406   : > { %v3088_v17 = vpop.f32.mrb[28].mxu1 }
0x1407   : > { %v5709_v18 = vpop.f32.mrb[29].mxu1  ;;  %v3320_v19 = vsel %vm930_vm2, %v3088_v17, -inf }
0x1408   : > { %3321 = vmax.xlane.f32.xlu1 %v3320_v19 }
0x1471   : > { %v3164_v20 = vpop.f32.mrb[30].mxu1  ;;  %v3240_v21 = vpop.f32.mrb[20].mxu0 }
0x1472   : > { %v5714_v22 = vpop.f32.mrb[31].mxu1  ;;  %v5719_v23 = vpop.f32.mrb[21].mxu0  ;;  %v3323_v24 = vsel %vm930_vm2, %v3164_v20, -inf  ;;  %v3326_v27 = vsel %vm930_vm2, %v3240_v21, -inf }
0x1473   : > { %3324 = vmax.xlane.f32.xlu0 %v3323_v24 }
0x1475   : > { %v3316_v25 = vpop.f32.mrb[32].mxu1 }
0x1476   : > { %v5724_v26 = vpop.f32.mrb[33].mxu1  ;;  %v3329_v28 = vsel %vm930_vm2, %v3316_v25, -inf }
0x1477   : > { %3327 = vmax.xlane.f32.xlu0 %v3326_v27  ;;  %3330 = vmax.xlane.f32.xlu1 %v3329_v28  ;;  %v5291_v28 = vld [vmem:[%s7714_s27 + $0x1] ss:$0 sm:$0xff] }
0x1488   : > { %3440 = vrot.lane.b32.xlu1 %v3011_v12, %s7724_s23 }
0x148d   : > { %3364 = vrot.lane.b32.xlu0 %v3006_v7, %s7724_s23  ;;  %v5272_v7 = vld [vmem:[%s7713_s20 + $0x20] sm:$0xff] }
0x1495   : > { %v3322_v29 = vpop.xlane.xlu1 %3321 }
0x1496   : > { %v3332_v30 = vsub.f32 %v3088_v17, %v3322_v29 }
0x1498   : > { %v3336_v31 = vmul.f32 1.442695, %v3332_v30 }
0x149a   : > { %6282 = vpow2.f32 %v3336_v31 }
0x14a4   : > { %v6283_v32 = vpop.eup %6282 }
0x14a5   : > { %v3344_v33 = vsel %vm930_vm2, %v6283_v32, 0.0 }
0x14ac   : > { %3345 = vadd.xlane.f32.xlu0 %v3344_v33 }
0x1500   : > { %v3325_v34 = vpop.xlane.xlu0 %3324 }
0x1501   : > { %v3333_v35 = vsub.f32 %v3164_v20, %v3325_v34  ;;  %v5295_v34 = vld [vmem:[%s7715_s19 + $0x20] sm:$0xff] }
0x1503   : > { %v3338_v36 = vmul.f32 1.442695, %v3333_v35  ;;  %v5297_v35 = vld [vmem:[%s7715_s19 + $0x30] sm:$0xff] }
0x1504   : > { %v3328_v37 = vpop.xlane.xlu0 %3327  ;;  %v3331_v8 = vpop.xlane.xlu1 %3330 }
0x1505   : > { %6284 = vpow2.f32 %v3338_v36  ;;  %v3334_v38 = vsub.f32 %v3240_v21, %v3328_v37  ;;  %v3335_v39 = vsub.f32 %v3316_v25, %v3331_v8 }
0x1507   : > { %v3340_v40 = vmul.f32 1.442695, %v3334_v38  ;;  %v3342_v41 = vmul.f32 1.442695, %v3335_v39 }
0x1508   : > { %v3365_v42 = vpop.permute.xlu0 %3364  ;;  %v3441_v43 = vpop.permute.xlu1 %3440 }
0x1509   : > { %6286 = vpow2.f32 %v3340_v40  ;;  %5726 = vmatpush3.msra.mxu0 %v3365_v42  ;;  %5731 = vmatpush3.msra.mxu1 %v3441_v43 }
0x150a   : > { %6288 = vpow2.f32 %v3342_v41  ;;  %5735 = vmatprep.subr.mxu0 %v6617_v1  ;;  %5740 = vmatprep.subr.mxu1 %v6617_v1 }
0x150f   : > { %v6285_v44 = vpop.eup %6284 }
0x1510   : > { %v3347_v45 = vsel %vm930_vm2, %v6285_v44, 0.0 }
0x1511   : > { %3348 = vadd.xlane.f32.xlu1 %v3347_v45 }
0x1513   : > { %v6287_v46 = vpop.eup %6286 }
0x1514   : > { %v6289_v47 = vpop.eup %6288  ;;  %v3350_v48 = vsel %vm930_vm2, %v6287_v46, 0.0 }
0x1515   : > { %3351 = vadd.xlane.f32.xlu0 %v3350_v48  ;;  %v3353_v50 = vsel %vm930_vm2, %v6289_v47, 0.0  ;;  %v5303_v48 = vld [vmem:[#allocation2 + $0x1] ss:$0 sm:$0xff] }
0x1516   : > { %3354 = vadd.xlane.f32.xlu1 %v3353_v50 }
0x1527   : > { %3516 = vrot.lane.b32.xlu1 %v7354_v10, %s7724_s23  ;;  %v5964_v10 = vpack.c.bf16 %v5273_v9, %v5272_v7 }
0x152b   : > { %3592 = vrot.lane.b32.xlu0 %v7359_v2, %s7724_s23 }
0x1539   : > { %v3346_v51 = vpop.xlane.xlu0 %3345 }
0x153a   : > { %6290 = vrcp.f32 %v3346_v51 }
0x1544   : > { %v6291_v52 = vpop.eup %6290 }
0x1545   : > { %v3357_v53 = vmul.f32 %v6291_v52, %v6283_v32 }
0x1547   : > { %5728 = vmatmul.mubr.msk.f32.vlgmr.msra.gmra.mrb[22].mxu0 %vm930_vm2, %v3357_v53 }
0x1548   : > { %5737 = vmatprep.mubr.msk.f32.mxu0 %vm6616_vm0, %v6617_v1 }
0x159e   : > { %v3349_v54 = vpop.xlane.xlu1 %3348 }
0x159f   : > { %6292 = vrcp.f32 %v3349_v54 }
0x15a2   : > { %v3352_v55 = vpop.xlane.xlu0 %3351 }
0x15a3   : > { %6294 = vrcp.f32 %v3352_v55  ;;  %v3355_v56 = vpop.xlane.xlu1 %3354 }
0x15a4   : > { %6296 = vrcp.f32 %v3355_v56 }
0x15a6   : > { %v3593_v62 = vpop.permute.xlu0 %3592 }
0x15a7   : > { %v3517_v57 = vpop.permute.xlu1 %3516 }
0x15a8   : > { %5736 = vmatpush3.msra.mxu0 %v3517_v57 }
0x15a9   : > { %v6293_v60 = vpop.eup %6292  ;;  %5963 = vmatprep.subr.bf16.mxu0 %v6615_v0 }
0x15aa   : > { %v3359_v61 = vmul.f32 %v6293_v60, %v6285_v44  ;;  %v5293_v60 = vld [vmem:[#allocation10 + $0x1] ss:$0 sm:$0xff] }
0x15ac   : > { %5733 = vmatmul.mubr.msk.f32.vlgmr.msra.gmra.mrb[34].mxu1 %vm930_vm2, %v3359_v61 }
0x15ad   : > { %v6295_v63 = vpop.eup %6294  ;;  %5741 = vmatpush3.msra.mxu1 %v3593_v62  ;;  %5742 = vmatprep.mubr.msk.f32.mxu1 %vm6616_vm0, %v6617_v1  ;;  %v5294_v62 = vld [vmem:[#allocation12 + $0x1] ss:$0 sm:$0xff] }
0x15ae   : > { %v6297_v3 = vpop.eup %6296  ;;  %v3361_v5 = vmul.f32 %v6295_v63, %v6287_v46  ;;  %5969 = vmatprep.subr.bf16.mxu1 %v6615_v0 }
0x15af   : > { %v3363_v6 = vmul.f32 %v6297_v3, %v6289_v47 }
0x15b0   : > { %5738 = vmatmul.mubr.msk.f32.vlgmr.msra.gmra.mrb[24].mxu0 %vm930_vm2, %v3361_v5 }
0x15b1   : > { %5743 = vmatmul.mubr.msk.f32.vlgmr.msra.gmra.mrb[36].mxu1 %vm930_vm2, %v3363_v6  ;;  %5753 = vmatprep.mubr.msk.f32.mxu0 %vm6616_vm0, %v6617_v1 }
0x15b2   : > { %5764 = vmatprep.mubr.msk.f32.mxu1 %vm6616_vm0, %v6617_v1  ;;  %5965 = vmatpush3.bf16.msra.mxu0 %v5964_v10 }
0x15b3   : > { %5966 = vmatprep.subr.bf16.mxu0 %v6615_v0 }
0x15b6   : > { %5968 = vmatpush3.bf16.msra.mxu0 %v5967_v16 }
0x161a   : > { %v3436_v12 = vpop.f32.mrb[22].mxu0 }
0x161b   : > { %v5729_v2 = vpop.f32.mrb[23].mxu0 }
0x167f   : > { %v3512_v15 = vpop.f32.mrb[34].mxu1 }
0x1680   : > { %3669 = vrot.lane.b32.xlu1 %v3512_v15, %s7725_s4  ;;  %v5734_v17 = vpop.f32.mrb[35].mxu1 }
0x1683   : > { %v3588_v18 = vpop.f32.mrb[24].mxu0 }
0x1684   : > { %v3664_v19 = vpop.f32.mrb[36].mxu1  ;;  %3673 = vrot.lane.b32.xlu0 %v3588_v18, %s7726_s24  ;;  %v5739_v20 = vpop.f32.mrb[25].mxu0 }
0x1685   : > { %3677 = vrot.lane.b32.xlu1 %v3664_v19, %s7721_s30  ;;  %v5744_v21 = vpop.f32.mrb[37].mxu1 }
0x16f2   : > { %v3670_v22 = vpop.permute.xlu1 %3669 }
0x16f3   : > { %v3680_v23 = vsel %vm930_vm2, %v3436_v12, %v3670_v22 }
0x16f6   : > { %v3674_v24 = vpop.permute.xlu0 %3673 }
0x16f7   : > { %v3681_v25 = vsel %vm1594_vm3, %v3680_v23, %v3674_v24  ;;  %v3678_v26 = vpop.permute.xlu1 %3677 }
0x16f8   : > { %v3682_v27 = vsel %vm1596_vm4, %v3681_v25, %v3678_v26 }
0x16f9   : > { %5754 = vmatmul.mubr.msk.f32.vlgmr.msra.gmra.mrb[26].mxu0 %vm847_vm1, %v3682_v27 }
0x16fa   : > { %5775 = vmatprep.mubr.msk.f32.mxu0 %vm847_vm1, %v7150_v49  ;;  %v5296_v49 = vld [vmem:[%s7715_s19 + $0x28] sm:$0xff] }
0x16fb   : > { %v6199_v36 = vpack.i.bf16 %v5296_v49, %v5295_v34  ;;  %v5970_v37 = vpack.c.bf16 %v5296_v49, %v5295_v34 }
0x16fd   : > { %5971 = vmatpush3.bf16.msra.mxu1 %v5970_v37 }
0x16fe   : > { %5972 = vmatprep.subr.bf16.mxu1 %v6615_v0 }
0x17cc   : > { %v3758_v29 = vpop.f32.mrb[26].mxu0 }
0x17cd   : > { %v3759_v30 = vadd.f32 %v5291_v28, %v3758_v29  ;;  %v5755_v31 = vpop.f32.mrb[27].mxu0 }
0x17cf   : > { %v3762_v32 = vadd.f32 %v3759_v30, %v7341_v4  ;;  %v5298_v4 = vld [vmem:[%s7715_s19 + $0x38] sm:$0xff] }
0x17d0   : > { %v6204_v8 = vpack.i.bf16 %v5298_v4, %v5297_v35  ;;  %v5973_v38 = vpack.c.bf16 %v5298_v4, %v5297_v35 }
0x17d1   : > { %v3767_v33 = vsel %vm847_vm1, %v3762_v32, 0.0 }
0x17d2   : > { %3768 = vadd.xlane.f32.xlu0 %v3767_v33  ;;  %5974 = vmatpush3.bf16.msra.mxu1 %v5973_v38 }
0x17d3   : > { %5983 = vmatprep.subr.bf16.mxu1 %v6615_v0 }
0x17e8   : > { %6200 = vrot.lane.b32.xlu0 %v6199_v36, %s6620_s3 }
0x17ec   : > { %3903 = vrot.lane.b32.xlu0 %v5303_v48, %s6620_s3 }
0x185f   : > { %v3769_v39 = vpop.xlane.xlu0 %3768 }
0x1860   : > { %v3770_v40 = vmul.f32 0.03125, %v3769_v39 }
0x1862   : > { %v3771_v41 = vsub.f32 %v3762_v32, %v3770_v40 }
0x1863   : > { %v6201_v44 = vpop.permute.xlu0 %6200 }
0x1864   : > { %v3772_v42 = vmul.f32 %v3771_v41, %v3771_v41  ;;  %v6203_v45 = vunpack.i.h.bf16 %v6201_v44  ;;  %v6202_v46 = vunpack.i.l.bf16 %v6201_v44 }
0x1866   : > { %v3773_v43 = vsel %vm847_vm1, %v3772_v42, 0.0  ;;  %v5975_v47 = vpack.c.bf16 %v6203_v45, %v6202_v46 }
0x1867   : > { %3774 = vadd.xlane.f32.xlu1 %v3773_v43  ;;  %v3904_v5 = vpop.permute.xlu0 %3903 }
0x1868   : > { %5976 = vmatprep.subr.bf16.mxu0 %v5975_v47 }
0x1869   : > { %5978 = vmatpush3.bf16.msra.mxu0 %v5975_v47 }
0x1878   : > { %6205 = vrot.lane.b32.xlu1 %v6204_v8, %s6620_s3 }
0x18f4   : > { %v3775_v50 = vpop.xlane.xlu1 %3774 }
0x18f5   : > { %v3776_v51 = vmul.f32 0.03125, %v3775_v50 }
0x18f7   : > { %v3777_v52 = vadd.f32 1e-05, %v3776_v51 }
0x18f8   : > { %v6206_v53 = vpop.permute.xlu1 %6205 }
0x18f9   : > { %6298 = vrsqrt.f32 %v3777_v52  ;;  %v6208_v54 = vunpack.i.h.bf16 %v6206_v53  ;;  %v6207_v55 = vunpack.i.l.bf16 %v6206_v53 }
0x18fb   : > { %v5979_v56 = vpack.c.bf16 %v6208_v54, %v6207_v55 }
0x18fd   : > { %5980 = vmatprep.subr.bf16.mxu0 %v5979_v56 }
0x18fe   : > { %5982 = vmatpush3.bf16.msra.mxu0 %v5979_v56 }
0x18ff   : > { %5987 = vmatprep.subr.bf16.mxu0 %v6615_v0 }
0x1901   : > { %5776 = vmatmul.mubr.msk.f32.vlgmr.msra.gmra.mrb[28].mxu0 %vm847_vm1, %v7155_v58 }
0x1902   : > { %5789 = vmatprep.mubr.msk.f32.mxu0 %vm6616_vm0, %v6617_v1 }
0x1903   : > { %v6299_v57 = vpop.eup %6298 }
0x1904   : > { %v3779_v61 = vmul.f32 %v6299_v57, %v3771_v41 }
0x1906   : > { %v3786_v63 = vmul.f32 %v5293_v60, %v3779_v61 }
0x1908   : > { %v7465_v3 = vadd.f32 %v5294_v62, %v3786_v63 }
0x190a   : > { %5765 = vmatmul.mubr.msk.f32.vlgmr.msra.gmra.mrb[38].mxu1 %vm847_vm1, %v7465_v3 }
0x190b   : > { %5782 = vmatprep.mubr.msk.f32.mxu1 %vm6616_vm0, %v6617_v1 }
0x19d4   : > { %v5777_v6 = vpop.f32.mrb[28].mxu0 }
0x19d5   : > { %v3978_v7 = vadd.f32 %v5777_v6, %v3904_v5  ;;  %v3972_v58 = vpop.f32.mrb[29].mxu0 }
0x19d6   : > { %v3973_v9 = vadd.f32 %v3972_v58, %v3904_v5 }
0x19d8   : > { %v6214_v10 = vpack.i.bf16 %v3978_v7, %v3973_v9  ;;  %v5984_v12 = vpack.c.bf16 %v3978_v7, %v3973_v9 }
0x19da   : > { %6215 = vrot.lane.b32.xlu0 %v6214_v10, %s7727_s6  ;;  %6210 = vrot.lane.b32.xlu1 %v6214_v10, %s7728_s29 }
0x19db   : > { %5986 = vmatpush3.bf16.xpose.msk.msra.mxu1 %vm7170_vm5, %v5984_v12 }
0x19dc   : > { %5991 = vmatprep.subr.bf16.mxu1 %v6615_v0 }
0x19dd   : > { %v3883_v2 = vpop.f32.mrb[38].mxu1 }
0x19de   : > { %v3884_v13 = vadd.f32 %v5303_v48, %v3883_v2  ;;  %6220 = vrot.lane.b32.xlu1 %v6214_v10, %s7729_s22  ;;  %v5766_v14 = vpop.f32.mrb[39].mxu1 }
0x19e0   : > { %3982 = vrot.lane.b32.xlu0 %v3884_v13, %s7728_s29 }
0x19e2   : > { %5783 = vmatmul.mubr.msk.f32.vlgmr.msra.gmra.mrb[40].mxu1 %vm930_vm2, %v3884_v13  ;;  %3984 = vrot.lane.b32.xlu1 %v3884_v13, %s7727_s6 }
0x19e3   : > { %5796 = vmatprep.mubr.msk.f32.mxu1 %vm6616_vm0, %v6617_v1 }
0x19e4   : > { %3986 = vrot.lane.b32.xlu0 %v3884_v13, %s7729_s22 }
0x1a4c   : > { %v7483_v16 = vpop.permute.xlu0 %6215  ;;  %v6211_v15 = vpop.permute.xlu1 %6210 }
0x1a4d   : > { %v6218_v17 = vunpack.i.h.bf16 %v7483_v16  ;;  %v6217_v18 = vunpack.i.l.bf16 %v7483_v16  ;;  %v6213_v19 = vunpack.i.h.bf16 %v6211_v15  ;;  %v6212_v20 = vunpack.i.l.bf16 %v6211_v15 }
0x1a4f   : > { %v5992_v21 = vpack.c.bf16 %v6218_v17, %v6217_v18  ;;  %v5988_v22 = vpack.c.bf16 %v6213_v19, %v6212_v20 }
0x1a50   : > { %v7487_v23 = vpop.permute.xlu1 %6220 }
0x1a51   : > { %v6223_v24 = vunpack.i.h.bf16 %v7487_v23  ;;  %v6222_v25 = vunpack.i.l.bf16 %v7487_v23  ;;  %5990 = vmatpush3.bf16.xpose.msk.msra.mxu0 %vm7170_vm5, %v5988_v22  ;;  %5994 = vmatpush3.bf16.xpose.msk.msra.mxu1 %vm7170_vm5, %v5992_v21 }
0x1a52   : > { %5995 = vmatprep.subr.bf16.mxu0 %v6615_v0  ;;  %5999 = vmatprep.subr.bf16.mxu1 %v6615_v0  ;;  %v3983_v27 = vpop.permute.xlu0 %3982 }
0x1a53   : > { %v5996_v26 = vpack.c.bf16 %v6223_v24, %v6222_v25 }
0x1a54   : > { %v3985_v28 = vpop.permute.xlu1 %3984 }
0x1a56   : > { %v3987_v29 = vpop.permute.xlu0 %3986 }
0x1a58   : > { %5790 = vmatmul.mubr.msk.f32.vlgmr.msra.gmra.mrb[30].mxu0 %vm930_vm2, %v3983_v27  ;;  %5797 = vmatmul.mubr.msk.f32.vlgmr.msra.gmra.mrb[42].mxu1 %vm930_vm2, %v3985_v28 }
0x1a59   : > { %5998 = vmatpush3.bf16.xpose.msk.msra.mxu0 %vm7170_vm5, %v5996_v26  ;;  %5803 = vmatprep.mubr.msk.f32.mxu0 %vm6616_vm0, %v6617_v1 }
0x1a5a   : > { %5810 = vmatprep.mubr.msk.f32.mxu1 %vm6616_vm0, %v6617_v1  ;;  %6007 = vmatprep.subr.bf16.mxu0 %v6615_v0 }
0x1a60   : > { %5804 = vmatmul.mubr.msk.f32.vlgmr.msra.gmra.mrb[32].mxu0 %vm930_vm2, %v3987_v29 }
0x1a61   : > { %5824 = vmatprep.mubr.msk.f32.mxu0 %vm6616_vm0, %v6617_v1 }
0x1ab5   : > { %v4074_v30 = vpop.f32.mrb[40].mxu1 }
0x1ab6   : > { %v5784_v31 = vpop.f32.mrb[41].mxu1  ;;  %v4306_v32 = vsel %vm2222_vm6, %v4074_v30, -inf }
0x1ab7   : > { %4307 = vmax.xlane.f32.xlu1 %v4306_v32  ;;  %v5300_v32 = vld [vmem:[%s7636_s8 + $0x28] sm:$0xff] }
0x1b2b   : > { %v4150_v11 = vpop.f32.mrb[30].mxu0  ;;  %v4226_v33 = vpop.f32.mrb[42].mxu1 }
0x1b2c   : > { %v5791_v34 = vpop.f32.mrb[31].mxu0  ;;  %v5798_v49 = vpop.f32.mrb[43].mxu1  ;;  %v4309_v35 = vsel %vm2222_vm6, %v4150_v11, -inf  ;;  %v4312_v36 = vsel %vm2222_vm6, %v4226_v33, -inf }
0x1b2d   : > { %4310 = vmax.xlane.f32.xlu0 %v4309_v35  ;;  %v5302_v34 = vld [vmem:[%s7636_s8 + $0x38] sm:$0xff] }
0x1b31   : > { %4313 = vmax.xlane.f32.xlu0 %v4312_v36 }
0x1b33   : > { %v4302_v37 = vpop.f32.mrb[32].mxu0 }
0x1b34   : > { %v5805_v4 = vpop.f32.mrb[33].mxu0  ;;  %v4315_v8 = vsel %vm2222_vm6, %v4302_v37, -inf }
0x1b35   : > { %4316 = vmax.xlane.f32.xlu1 %v4315_v8 }
0x1b44   : > { %v4308_v38 = vpop.xlane.xlu1 %4307 }
0x1b45   : > { %v4318_v39 = vsub.f32 %v4074_v30, %v4308_v38 }
0x1b46   : > { %6230 = vrot.lane.b32.xlu1 %v6211_v15, %s6620_s3 }
0x1b47   : > { %6225 = vrot.lane.b32.xlu0 %v6214_v10, %s6620_s3  ;;  %v4322_v40 = vmul.f32 1.442695, %v4318_v39 }
0x1b49   : > { %6300 = vpow2.f32 %v4322_v40 }
0x1b53   : > { %v6301_v41 = vpop.eup %6300 }
0x1b54   : > { %v4330_v42 = vsel %vm2222_vm6, %v6301_v41, 0.0 }
0x1b66   : > { %4331 = vadd.xlane.f32.xlu0 %v4330_v42 }
0x1bba   : > { %v4311_v43 = vpop.xlane.xlu0 %4310 }
0x1bbb   : > { %v4319_v44 = vsub.f32 %v4150_v11, %v4311_v43  ;;  %v6016_v11 = vpack.c.bf16 %v5300_v32, %v5299_v59 }
0x1bbd   : > { %v4324_v45 = vmul.f32 1.442695, %v4319_v44 }
0x1bbe   : > { %v4314_v46 = vpop.xlane.xlu0 %4313 }
0x1bbf   : > { %6302 = vpow2.f32 %v4324_v45  ;;  %v4320_v47 = vsub.f32 %v4226_v33, %v4314_v46  ;;  %v5301_v33 = vld [vmem:[%s7636_s8 + $0x30] sm:$0xff] }
0x1bc0   : > { %v6019_v49 = vpack.c.bf16 %v5302_v34, %v5301_v33  ;;  %v5327_v45 = vld [vmem:[#allocation4 + $0x1] ss:$0 sm:$0xff] }
0x1bc1   : > { %v4326_v48 = vmul.f32 1.442695, %v4320_v47 }
0x1bc2   : > { %v4317_v50 = vpop.xlane.xlu1 %4316  ;;  %v6226_v51 = vpop.permute.xlu0 %6225 }
0x1bc3   : > { %6304 = vpow2.f32 %v4326_v48  ;;  %v4321_v52 = vsub.f32 %v4302_v37, %v4317_v50  ;;  %v6228_v53 = vunpack.i.h.bf16 %v6226_v51  ;;  %v6227_v54 = vunpack.i.l.bf16 %v6226_v51 }
0x1bc5   : > { %v4328_v55 = vmul.f32 1.442695, %v4321_v52  ;;  %v6000_v56 = vpack.c.bf16 %v6228_v53, %v6227_v54 }
0x1bc6   : > { %v6231_v7 = vpop.permute.xlu1 %6230 }
0x1bc7   : > { %6306 = vpow2.f32 %v4328_v55  ;;  %6002 = vmatpush3.bf16.msk.msra.mxu1 %vm7219_vm9, %v6000_v56  ;;  %v6233_v58 = vunpack.i.h.bf16 %v6231_v7  ;;  %v6232_v9 = vunpack.i.l.bf16 %v6231_v7 }
0x1bc8   : > { %6003 = vmatprep.subr.bf16.mxu1 %v6615_v0 }
0x1bc9   : > { %v6303_v57 = vpop.eup %6302  ;;  %v6004_v2 = vpack.c.bf16 %v6233_v58, %v6232_v9  ;;  %v5337_v58 = vld [vmem:[%s7640_s12 + $0x58] sm:$0xff] }
0x1bca   : > { %v4333_v60 = vsel %vm2222_vm6, %v6303_v57, 0.0 }
0x1bcb   : > { %4334 = vadd.xlane.f32.xlu1 %v4333_v60  ;;  %v4798_v60 = vld [vmem:[#allocation6 + $0x28] sm:$0xff] }
0x1bcd   : > { %v6305_v61 = vpop.eup %6304 }
0x1bce   : > { %v4336_v62 = vsel %vm2222_vm6, %v6305_v61, 0.0 }
0x1bcf   : > { %4337 = vadd.xlane.f32.xlu0 %v4336_v62  ;;  %v4800_v62 = vld [vmem:[#allocation6 + $0x38] sm:$0xff] }
0x1bd1   : > { %v6307_v63 = vpop.eup %6306 }
0x1bd2   : > { %v4339_v5 = vsel %vm2222_vm6, %v6307_v63, 0.0 }
0x1bd3   : > { %4340 = vadd.xlane.f32.xlu1 %v4339_v5  ;;  %v5335_v5 = vld [vmem:[%s7640_s12 + $0x48] sm:$0xff] }
0x1be4   : > { %6235 = vrot.lane.b32.xlu1 %v7483_v16, %s6620_s3 }
0x1be5   : > { %6240 = vrot.lane.b32.xlu0 %v7487_v23, %s6620_s3  ;;  %s7732_s3 = sld [smem:[#allocation33_spill]] }
0x1bf3   : > { %v4332_v6 = vpop.xlane.xlu0 %4331 }
0x1bf4   : > { %6308 = vrcp.f32 %v4332_v6  ;;  %v5336_v6 = vld [vmem:[%s7640_s12 + $0x50] sm:$0xff] }
0x1bf5   : > { %v6031_v9 = vpack.c.bf16 %v5337_v58, %v5336_v6 }
0x1bfe   : > { %v6309_v10 = vpop.eup %6308 }
0x1bff   : > { %v4343_v12 = vmul.f32 %v6309_v10, %v6301_v41  ;;  %v5338_v10 = vld [vmem:[%s7640_s12 + $0x60] sm:$0xff] }
0x1c01   : > { %5811 = vmatmul.mubr.msk.f32.vlgmr.msra.gmra.mrb[44].mxu1 %vm2222_vm6, %v4343_v12  ;;  %v5339_v12 = vld [vmem:[%s7640_s12 + $0x68] sm:$0xff] }
0x1c02   : > { %6006 = vmatpush3.bf16.msk.msra.mxu1 %vm7219_vm9, %v6004_v2  ;;  %5817 = vmatprep.mubr.msk.f32.mxu1 %vm6616_vm0, %v6617_v1  ;;  %v6034_v2 = vpack.c.bf16 %v5339_v12, %v5338_v10 }
0x1c03   : > { %6011 = vmatprep.subr.bf16.mxu1 %v6615_v0 }
0x1c58   : > { %v4335_v13 = vpop.xlane.xlu1 %4334 }
0x1c59   : > { %6310 = vrcp.f32 %v4335_v13 }
0x1c5c   : > { %v4338_v14 = vpop.xlane.xlu0 %4337 }
0x1c5d   : > { %6312 = vrcp.f32 %v4338_v14 }
0x1c60   : > { %v4341_v16 = vpop.xlane.xlu1 %4340  ;;  %v6241_v15 = vpop.permute.xlu0 %6240 }
0x1c61   : > { %6314 = vrcp.f32 %v4341_v16  ;;  %v6243_v17 = vunpack.i.h.bf16 %v6241_v15  ;;  %v6242_v18 = vunpack.i.l.bf16 %v6241_v15 }
0x1c63   : > { %v6311_v19 = vpop.eup %6310  ;;  %v6012_v20 = vpack.c.bf16 %v6243_v17, %v6242_v18  ;;  %v5330_v17 = vld [vmem:[%s7644_s16 + $0x1] ss:$0 sm:$0xff] }
0x1c64   : > { %v4345_v21 = vmul.f32 %v6311_v19, %v6303_v57  ;;  %v6236_v22 = vpop.permute.xlu1 %6235  ;;  %v4797_v57 = vld [vmem:[#allocation6 + $0x20] sm:$0xff]  ;;  %v5331_v19 = vld [vmem:[#allocation13 + $0x1] ss:$0 sm:$0xff] }
0x1c65   : > { %v6238_v23 = vunpack.i.h.bf16 %v6236_v22  ;;  %v6237_v24 = vunpack.i.l.bf16 %v6236_v22  ;;  %v5340_v22 = vld [vmem:[%s7640_s12 + $0x70] sm:$0xff] }
0x1c66   : > { %5818 = vmatmul.mubr.msk.f32.vlgmr.msra.gmra.mrb[46].mxu1 %vm2222_vm6, %v4345_v21 }
0x1c67   : > { %v6313_v25 = vpop.eup %6312  ;;  %v6008_v26 = vpack.c.bf16 %v6238_v23, %v6237_v24  ;;  %6014 = vmatpush3.bf16.msk.msra.mxu1 %vm7219_vm9, %v6012_v20  ;;  %5831 = vmatprep.mubr.msk.f32.mxu1 %vm6616_vm0, %v6617_v1  ;;  %v5332_v24 = vld [vmem:[#allocation7 + $0x1] ss:$0 sm:$0xff] }
0x1c68   : > { %6021 = vmatprep.subr.bf16.mxu1 %v6615_v0  ;;  %v4347_v27 = vmul.f32 %v6313_v25, %v6305_v61  ;;  %v6022_v61 = vpack.c.bf16 %v4798_v60, %v4797_v57  ;;  %v5349_v57 = vld [vmem:[#allocation15] ss:$0 sm:$0xff] }
0x1c69   : > { %6010 = vmatpush3.bf16.msk.msra.mxu0 %vm7219_vm9, %v6008_v26 }
0x1c6a   : > { %6015 = vmatprep.subr.bf16.mxu0 %v6615_v0 }
0x1c6b   : > { %v6315_v28 = vpop.eup %6314 }
0x1c6c   : > { %v4349_v29 = vmul.f32 %v6315_v28, %v6307_v63  ;;  %5825 = vmatmul.mubr.msk.f32.vlgmr.msra.gmra.mrb[34].mxu0 %vm2222_vm6, %v4347_v27 }
0x1c6d   : > { %5842 = vmatprep.mubr.msk.f32.mxu0 %vm6616_vm0, %v6617_v1  ;;  %6017 = vmatpush3.bf16.msra.mxu0 %v6016_v11 }
0x1c6e   : > { %5832 = vmatmul.mubr.msk.f32.vlgmr.msra.gmra.mrb[48].mxu1 %vm2222_vm6, %v4349_v29  ;;  %6018 = vmatprep.subr.bf16.mxu0 %v6615_v0  ;;  %v5342_v29 = vld [vmem:[#allocation9 + $0x1] ss:$0 sm:$0xff] }
0x1c6f   : > { %5853 = vmatprep.mubr.msk.f32.mxu1 %vm6616_vm0, %v6617_v1  ;;  %6023 = vmatpush3.bf16.msra.mxu1 %v6022_v61 }
0x1c70   : > { %6024 = vmatprep.subr.bf16.mxu1 %v6615_v0 }
0x1c71   : > { %6020 = vmatpush3.bf16.msra.mxu0 %v6019_v49 }
0x1c72   : > { %6027 = vmatprep.subr.bf16.mxu0 %v6615_v0 }
0x1cd4   : > { %v4426_v30 = vpop.f32.mrb[44].mxu1 }
0x1cd5   : > { %v5812_v31 = vpop.f32.mrb[45].mxu1 }
0x1d39   : > { %v4506_v35 = vpop.f32.mrb[46].mxu1 }
0x1d3a   : > { %4671 = vrot.lane.b32.xlu1 %v4506_v35, %s7725_s4  ;;  %v5819_v36 = vpop.f32.mrb[47].mxu1  ;;  %s7731_s4 = sshll.u32 %s7735_s28, 3 }
0x1d3b   : > { %s827_s5 = scalar_lea.vmem %s7732_s3, %s7731_s4 }
0x1d3f   : > { %v4586_v37 = vpop.f32.mrb[34].mxu0 }
0x1d40   : > { %4675 = vrot.lane.b32.xlu0 %v4586_v37, %s7726_s24  ;;  %v5826_v4 = vpop.f32.mrb[35].mxu0 }
0x1d41   : > { %v4666_v8 = vpop.f32.mrb[48].mxu1 }
0x1d42   : > { %4679 = vrot.lane.b32.xlu1 %v4666_v8, %s7721_s30  ;;  %v5833_v38 = vpop.f32.mrb[49].mxu1  ;;  %s7730_s30 = sld [smem:[#allocation32_spill]] }
0x1dac   : > { %v4672_v39 = vpop.permute.xlu1 %4671 }
0x1dad   : > { %v4682_v40 = vsel %vm930_vm2, %v4426_v30, %v4672_v39  ;;  %v5346_v39 = vld [vmem:[%s7722_s7 + $0x1] ss:$0 sm:$0xff] }
0x1db2   : > { %v4676_v41 = vpop.permute.xlu0 %4675 }
0x1db3   : > { %v4683_v42 = vsel %vm1594_vm3, %v4682_v40, %v4676_v41  ;;  %v5347_v41 = vld [vmem:[%s7723_s26 + $0x1] ss:$0 sm:$0xff] }
0x1db4   : > { %v4680_v43 = vpop.permute.xlu1 %4679 }
0x1db5   : > { %v4684_v44 = vsel %vm1596_vm4, %v4683_v42, %v4680_v43 }
0x1db6   : > { %5843 = vmatmul.mubr.msk.f32.vlgmr.msra.gmra.mrb[36].mxu0 %vm847_vm1, %v4684_v44 }
0x1db7   : > { %5872 = vmatprep.mubr.msk.f32.mxu0 %vm6616_vm0, %v6617_v1  ;;  %v4799_v1 = vld [vmem:[#allocation6 + $0x30] sm:$0xff] }
0x1db8   : > { %v6025_v63 = vpack.c.bf16 %v4800_v62, %v4799_v1 }
0x1dba   : > { %6026 = vmatpush3.bf16.msra.mxu1 %v6025_v63 }
0x1e89   : > { %v4760_v46 = vpop.f32.mrb[36].mxu0 }
0x1e8a   : > { %v4761_v47 = vadd.f32 %v5327_v45, %v4760_v46  ;;  %v5844_v48 = vpop.f32.mrb[37].mxu0 }
0x1e8c   : > { %v4764_v50 = vadd.f32 %v4761_v47, %v7465_v3  ;;  %v5334_v3 = vld [vmem:[%s7640_s12 + $0x40] sm:$0xff] }
0x1e8d   : > { %v6028_v7 = vpack.c.bf16 %v5335_v5, %v5334_v3 }
0x1e8e   : > { %v4769_v51 = vsel %vm847_vm1, %v4764_v50, 0.0 }
0x1e8f   : > { %4770 = vadd.xlane.f32.xlu0 %v4769_v51  ;;  %6029 = vmatpush3.bf16.msra.mxu0 %v6028_v7 }
0x1e90   : > { %6030 = vmatprep.subr.bf16.mxu0 %v6615_v0 }
0x1e93   : > { %6032 = vmatpush3.bf16.msra.mxu0 %v6031_v9 }
0x1e94   : > { %6033 = vmatprep.subr.bf16.mxu0 %v6615_v0 }
0x1e97   : > { %6035 = vmatpush3.bf16.msra.mxu0 %v6034_v2 }
0x1e98   : > { %6036 = vmatprep.subr.bf16.mxu0 %v6615_v0  ;;  %v5341_v0 = vld [vmem:[%s7640_s12 + $0x78] sm:$0xff] }
0x1e99   : > { %v6037_v23 = vpack.c.bf16 %v5341_v0, %v5340_v22 }
0x1e9b   : > { %6038 = vmatpush3.bf16.msra.mxu0 %v6037_v23 }
0x1f1c   : > { %v4771_v52 = vpop.xlane.xlu0 %4770 }
0x1f1d   : > { %v4772_v53 = vmul.f32 0.03125, %v4771_v52 }
0x1f1f   : > { %v4773_v54 = vsub.f32 %v4764_v50, %v4772_v53 }
0x1f21   : > { %v4774_v55 = vmul.f32 %v4773_v54, %v4773_v54 }
0x1f23   : > { %v4775_v56 = vsel %vm847_vm1, %v4774_v55, 0.0  ;;  %v5348_v55 = vld [vmem:[%s7730_s30] ss:$0 sm:$0xff] }
0x1f24   : > { %4776 = vadd.xlane.f32.xlu1 %v4775_v56 }
0x1fb1   : > { %v4777_v13 = vpop.xlane.xlu1 %4776 }
0x1fb2   : > { %v4778_v14 = vmul.f32 0.03125, %v4777_v13 }
0x1fb4   : > { %v4779_v16 = vadd.f32 1e-05, %v4778_v14 }
0x1fb6   : > { %6316 = vrsqrt.f32 %v4779_v16 }
0x1fc0   : > { %v6317_v15 = vpop.eup %6316 }
0x1fc1   : > { %v4781_v18 = vmul.f32 %v6317_v15, %v4773_v54 }
0x1fc3   : > { %v4788_v20 = vmul.f32 %v5330_v17, %v4781_v18 }
0x1fc5   : > { %v4795_v21 = vadd.f32 %v5331_v19, %v4788_v20 }
0x1fc7   : > { %5854 = vmatmul.mubr.msk.f32.vlgmr.msra.gmra.mrb[50].mxu1 %vm847_vm1, %v4795_v21 }
0x209a   : > { %v4878_v25 = vpop.f32.mrb[50].mxu1 }
0x209b   : > { %v4879_v26 = vadd.f32 %v5332_v24, %v4878_v25  ;;  %v5855_v27 = vpop.f32.mrb[51].mxu1 }
0x209d   : > { %v4882_v28 = vmax.f32 %v4879_v26, 0.0 }
0x209f   : > { %5873 = vmatmul.mubr.msk.f32.vlgmr.msra.gmra.mrb[38].mxu0 %vm2812_vm10, %v4882_v28 }
0x2172   : > { %v4969_v30 = vpop.f32.mrb[38].mxu0 }
0x2173   : > { %v4970_v31 = vadd.f32 %v5342_v29, %v4969_v30  ;;  %v5874_v59 = vpop.f32.mrb[39].mxu0 }
0x2175   : > { %v4973_v32 = vadd.f32 %v4970_v31, %v4795_v21 }
0x2177   : > { %v4978_v11 = vsel %vm847_vm1, %v4973_v32, 0.0 }
0x2178   : > { %4979 = vadd.xlane.f32.xlu0 %v4978_v11 }
0x2205   : > { %v4980_v33 = vpop.xlane.xlu0 %4979 }
0x2206   : > { %v4981_v34 = vmul.f32 0.03125, %v4980_v33 }
0x2208   : > { %v4982_v49 = vsub.f32 %v4973_v32, %v4981_v34 }
0x220a   : > { %v4983_v35 = vmul.f32 %v4982_v49, %v4982_v49 }
0x220c   : > { %v4984_v36 = vsel %vm847_vm1, %v4983_v35, 0.0 }
0x220d   : > { %4985 = vadd.xlane.f32.xlu0 %v4984_v36 }
0x229a   : > { %v4986_v37 = vpop.xlane.xlu0 %4985 }
0x229b   : > { %v4987_v4 = vmul.f32 0.03125, %v4986_v37 }
0x229d   : > { %v4988_v8 = vadd.f32 1e-05, %v4987_v4 }
0x229f   : > { %6318 = vrsqrt.f32 %v4988_v8 }
0x22a9   : > { %v6319_v38 = vpop.eup %6318 }
0x22aa   : > { %v4990_v40 = vmul.f32 %v6319_v38, %v4982_v49 }
0x22ac   : > { %v4997_v42 = vmul.f32 %v5346_v39, %v4990_v40 }
0x22ae   : > { %v5004_v43 = vadd.f32 %v5347_v41, %v4997_v42 }
0x22b0   : > { %v5007_v44 = vsel %vm847_vm1, %v5004_v43, 0.0 }
0x22b1   : > { %5008 = vadd.xlane.f32.xlu1 %v5007_v44 }
0x233e   : > { %v5009_v45 = vpop.xlane.xlu1 %5008 }
0x233f   : > { %v5010_v46 = vmul.f32 0.03125, %v5009_v45 }
0x2341   : > { %v5011_v47 = vsub.f32 %v5004_v43, %v5010_v46 }
0x2343   : > { %v5012_v48 = vmul.f32 %v5011_v47, %v5011_v47 }
0x2345   : > { %v5013_v50 = vsel %vm847_vm1, %v5012_v48, 0.0 }
0x2346   : > { %5014 = vadd.xlane.f32.xlu0 %v5013_v50 }
0x23d3   : > { %v5015_v51 = vpop.xlane.xlu0 %5014 }
0x23d4   : > { %v5016_v52 = vmul.f32 0.03125, %v5015_v51 }
0x23d6   : > { %v5017_v53 = vadd.f32 1e-05, %v5016_v52 }
0x23d8   : > { %6320 = vrsqrt.f32 %v5017_v53 }
0x23e2   : > { %v6321_v54 = vpop.eup %6320 }
0x23e3   : > { %v5019_v56 = vmul.f32 %v6321_v54, %v5011_v47 }
0x23e5   : > { %v5026_v60 = vmul.f32 %v5348_v55, %v5019_v56 }
0x23e7   : > { %v5033_v61 = vadd.f32 %v5349_v57, %v5026_v60 }
0x23e9   : > { %5034 = vst.msk [vmem:[%s827_s5] sm:$0xff] %vm847_vm1, %v5033_v61 }
0x23ea PF: > { %s7733_s0 = sld [smem:[#allocation21_spill]] }
0x23f0   : > { %s37_s3 = sadd.s32 1, %s7733_s0  }
0x23f1   : > { %p34_p11 = scmp.ge.s32.totalorder %s37_s3, 4  }
0x23f3   :  { %36 = sbr.rel (!%p34_p11) target bundleno = 18 (0x12), region = 196 }
0x23fa   :  { %5054 = vsyncpa [#allocation3], 1 }
0x23fb   :  { %5056 = vsyncpa [#allocation3 + $0x1], 1 }
0x23fc   :  { %5057 = vsyncpa [#allocation5], 1 }
0x23fd   :  { %5058 = vsyncpa [#allocation8], 1 }
0x23fe   :  { %5059 = vsyncpa [#allocation11], 1 }
0x23ff   :  { %5060 = vsyncpa [#allocation14], 1 }

</bundles_post_ra>
